<compile_context>
chip_gen: v6e
topology: v6e:2x2x1
jax: 0.10.0
libtpu: 0.0.40
codegen_flags: <defaults>
</compile_context>

<pallas_src>
import functools

import jax
import jax.numpy as jnp
from jax import lax
from jax.experimental import pallas as pl
from jax.experimental.pallas import tpu as pltpu

_BN_EPS = 1e-5
_COMPUTE_DTYPE = jnp.bfloat16


# ---------------------------------------------------------------------------
# Fused residual-block kernel (one batch tile per grid step)
# ---------------------------------------------------------------------------
def _block_kernel(x_ref, w1_ref, b1_ref, w2_ref, b2_ref, o_ref, a1_ref, a2_ref,
                  *, B, H, W, Cin, Cout, Ho, Wo, HP, stride, shortcut_mode,
                  pad_ch):
    """x_ref  : (B, H, W, Cin) f32                       (stride == 1)
               (B, 4*HP, WP, Cin) f32 padded phases       (stride == 2)
       w*_ref : (9, Cin|Cout, Cout) bf16, BN-scale folded (tap index = kh*3+kw)
       b*_ref : (1, Cout) f32 folded BN bias
       o_ref  : (B, Ho, Wo, Cout) f32
       a1_ref : conv1 input scratch (relu(x), padded), bf16
       a2_ref : conv2 input scratch (out1, padded), bf16
    """
    cdt = a1_ref.dtype
    M = B * Ho * Wo

    # ---- stage 0: input ReLU + cast applied ONCE, into the conv1 scratch ----
    if stride == 1:
        a1_ref[...] = jnp.zeros(a1_ref.shape, cdt)                 # zero border
        a1_ref[:, 1:H + 1, 1:W + 1, :] = jnp.maximum(x_ref[...].astype(cdt), 0)
    else:
        # phase-decomposed input already carries the zero padding
        a1_ref[...] = jnp.maximum(x_ref[...].astype(cdt), 0)

    # ---- conv1 (3x3, stride) + folded BN1 + ReLU -> out1 (stays in VMEM) ----
    acc = jnp.zeros((M, Cout), jnp.float32)
    for kh in range(3):
        for kw in range(3):
            if stride == 1:
                r0, c0 = kh, kw
            else:
                phase = (kh % stride) * stride + (kw % stride)
                r0 = phase * HP + kh // stride
                c0 = kw // stride
            xt = a1_ref[:, r0:r0 + Ho, c0:c0 + Wo, :].reshape(M, Cin)
            acc = acc + jnp.dot(xt, w1_ref[kh * 3 + kw],
                                preferred_element_type=jnp.float32)
    out1 = jnp.maximum(acc + b1_ref[...], 0.0)

    # ---- stage out1 (padded) as conv2's input; never written to HBM ----
    a2_ref[...] = jnp.zeros(a2_ref.shape, cdt)
    a2_ref[:, 1:Ho + 1, 1:Wo + 1, :] = out1.astype(cdt).reshape(B, Ho, Wo, Cout)

    # ---- conv2 (3x3, stride 1) + folded BN2 ----
    acc = jnp.zeros((M, Cout), jnp.float32)
    for kh in range(3):
        for kw in range(3):
            xt = a2_ref[:, kh:kh + Ho, kw:kw + Wo, :].reshape(M, Cout)
            acc = acc + jnp.dot(xt, w2_ref[kh * 3 + kw],
                                preferred_element_type=jnp.float32)
    out2 = acc + b2_ref[...]

    # ---- shortcut on ReLU(x), fused residual add (no final ReLU) ----
    if shortcut_mode == "identity":
        sc = a1_ref[:, 1:H + 1, 1:W + 1, :].reshape(M, Cin)
        out2 = out2 + sc.astype(jnp.float32)
    else:
        # 'cifar10': relu(x)[:, ::2, ::2, :] zero-padded on channels by pad_ch.
        # Phase (1,1) of the padded input == x[::2, ::2]; the channel placement
        # is an exact 0/1 selection-matrix matmul (avoids lane-offset stores).
        sc = a1_ref[:, 3 * HP:3 * HP + Ho, 0:Wo, :].reshape(M, Cin)
        ci = lax.broadcasted_iota(jnp.int32, (Cin, Cout), 0)
        co = lax.broadcasted_iota(jnp.int32, (Cin, Cout), 1)
        sel = jnp.where(co == ci + pad_ch, jnp.float32(1.0),
                        jnp.float32(0.0)).astype(cdt)
        out2 = out2 + jnp.dot(sc, sel, preferred_element_type=jnp.float32)

    o_ref[...] = out2.reshape(B, Ho, Wo, Cout).astype(o_ref.dtype)


# ---------------------------------------------------------------------------
# Stride-2 helper: pad + phase-decompose so the kernel only takes contiguous
# per-tap slices.
# TODO(synk): this is still materialized by XLA in the wrapper (one extra HBM
# round trip of x, downsampling blocks only); moving it in-kernel needs strided
# VMEM reads.
# ---------------------------------------------------------------------------
def _make_phases(x_nhwc, stride):
    n, h, w, c = x_nhwc.shape
    xp = jnp.pad(x_nhwc, ((0, 0), (1, 1), (1, 1), (0, 0)))
    hp = -(-(h + 2) // stride)
    wp = -(-(w + 2) // stride)
    phases = []
    for a in range(stride):
        for b in range(stride):
            ph = xp[:, a::stride, b::stride, :]
            ph = jnp.pad(ph, ((0, 0), (0, hp - ph.shape[1]),
                              (0, wp - ph.shape[2]), (0, 0)))
            phases.append(ph)
    return jnp.concatenate(phases, axis=1), hp, wp


# ---------------------------------------------------------------------------
# Parameter folding (eval-mode BatchNorm -> weight scale + bias)
# ---------------------------------------------------------------------------
def fold_conv_bn(w_oihw, bn):
    gamma, beta, mean, var = bn
    scale = gamma / jnp.sqrt(var + _BN_EPS)
    bias = beta - mean * scale
    w_hwio = jnp.transpose(w_oihw, (2, 3, 1, 0)) * scale   # scale over Cout
    return w_hwio, bias


# ---------------------------------------------------------------------------
# BasicBlockWithRelu forward (NCHW in / NCHW out)
# ---------------------------------------------------------------------------
def basic_block_forward(x_nchw, params, stride, option="cifar10",
                        max_batch_tile=8):
    # TODO(synk): only the full-precision (non-binarized) branch of the PyTorch
    # forward is implemented; BatchNorm uses folded running stats (eval mode).
    x = jnp.transpose(x_nchw, (0, 2, 3, 1)).astype(jnp.float32)     # NHWC
    n, h, w, cin = x.shape
    w1, b1 = fold_conv_bn(params["conv1_w"], params["bn1"])
    w2, b2 = fold_conv_bn(params["conv2_w"], params["bn2"])
    planes = w1.shape[-1]
    ho = (h - 1) // stride + 1
    wo = (w - 1) // stride + 1

    if stride == 1 and cin == planes:
        shortcut_mode, pad_ch = "identity", 0
    else:
        if option != "cifar10":
            # TODO(synk): the conv1x1+BN shortcut option is not implemented.
            raise NotImplementedError("only the 'cifar10' shortcut is implemented")
        if stride != 2:
            raise NotImplementedError("cifar10 shortcut implemented for stride=2 only")
        pad_ch = planes // 4
        assert cin + 2 * pad_ch == planes, (cin, planes)
        shortcut_mode = "pad"

    # Batch tiling: keep >=~8 grid steps when possible (pipelining / megacore),
    # batch-block up to `max_batch_tile` images/step for large batches.
    cap = max(1, min(max_batch_tile, n // 8)) if n >= 8 else 1
    btile = max(d for d in range(1, cap + 1) if n % d == 0)

    if stride == 1:
        x_in, hp = x, 0
        a1_shape = (btile, h + 2, w + 2, cin)
    else:
        x_in, hp, _ = _make_phases(x, stride)
        a1_shape = (btile,) + x_in.shape[1:]
    in_block = (btile,) + x_in.shape[1:]

    kern = functools.partial(
        _block_kernel, B=btile, H=h, W=w, Cin=cin, Cout=planes, Ho=ho, Wo=wo,
        HP=hp, stride=stride, shortcut_mode=shortcut_mode, pad_ch=pad_ch)

    out = pl.pallas_call(
        kern,
        out_shape=jax.ShapeDtypeStruct((n, ho, wo, planes), jnp.float32),
        grid_spec=pltpu.PrefetchScalarGridSpec(
            num_scalar_prefetch=0,
            grid=(n // btile,),
            in_specs=[
                pl.BlockSpec(in_block, lambda i: (i, 0, 0, 0)),
                pl.BlockSpec((9, cin, planes), lambda i: (0, 0, 0)),     # invariant
                pl.BlockSpec((1, planes), lambda i: (0, 0)),             # invariant
                pl.BlockSpec((9, planes, planes), lambda i: (0, 0, 0)),  # invariant
                pl.BlockSpec((1, planes), lambda i: (0, 0)),             # invariant
            ],
            out_specs=pl.BlockSpec((btile, ho, wo, planes),
                                   lambda i: (i, 0, 0, 0)),
            scratch_shapes=[
                pltpu.VMEM(a1_shape, _COMPUTE_DTYPE),                    # relu(x), padded
                pltpu.VMEM((btile, ho + 2, wo + 2, planes), _COMPUTE_DTYPE),  # out1, padded
            ],
        ),
        compiler_params=pltpu.CompilerParams(
            dimension_semantics=("parallel",),
        ),
    )(x_in,
      w1.reshape(9, cin, planes).astype(_COMPUTE_DTYPE),
      b1.reshape(1, planes).astype(jnp.float32),
      w2.reshape(9, planes, planes).astype(_COMPUTE_DTYPE),
      b2.reshape(1, planes).astype(jnp.float32))

    return jnp.transpose(out, (0, 3, 1, 2))   # back to NCHW


# ---------------------------------------------------------------------------
# Pure-JAX reference (lax.conv, same bf16 operand rounding) for the self-check
# ---------------------------------------------------------------------------
def basic_block_ref(x_nchw, params, stride, option="cifar10"):
    rd = lambda a: a.astype(_COMPUTE_DTYPE).astype(jnp.float32)
    x = rd(jnp.transpose(x_nchw, (0, 2, 3, 1)))
    xr = jnp.maximum(x, 0.0)
    w1, b1 = fold_conv_bn(params["conv1_w"], params["bn1"])
    w2, b2 = fold_conv_bn(params["conv2_w"], params["bn2"])
    planes = w1.shape[-1]

    def conv(inp, w_hwio, s):
        return lax.conv_general_dilated(
            inp, rd(w_hwio), (s, s), ((1, 1), (1, 1)),
            dimension_numbers=("NHWC", "HWIO", "NHWC"),
            precision=lax.Precision.HIGHEST)

    out = conv(xr, w1, stride) + b1.reshape(1, 1, 1, -1)
    out = rd(jnp.maximum(out, 0.0))          # kernel stages out1 as bf16
    out = conv(out, w2, 1) + b2.reshape(1, 1, 1, -1)

    cin = x.shape[-1]
    if stride == 1 and cin == planes:
        sc = xr
    else:
        pad = planes // 4
        sc = jnp.pad(xr[:, ::2, ::2, :], ((0, 0), (0, 0), (0, 0), (pad, pad)))
    return jnp.transpose(out + sc, (0, 3, 1, 2))


# ---------------------------------------------------------------------------
def init_params(key, in_planes, planes):
    ks = jax.random.split(key, 4)

    def conv_w(k, cout, cin):
        return jax.random.normal(k, (cout, cin, 3, 3), jnp.float32) / jnp.sqrt(9 * cin)

    def bn(k, c):
        k1, k2, k3, k4 = jax.random.split(k, 4)
        return (jax.random.uniform(k1, (c,), jnp.float32, 0.5, 1.5),
                0.1 * jax.random.normal(k2, (c,), jnp.float32),
                0.1 * jax.random.normal(k3, (c,), jnp.float32),
                jax.random.uniform(k4, (c,), jnp.float32, 0.5, 1.5))

    return {"conv1_w": conv_w(ks[0], planes, in_planes), "bn1": bn(ks[1], planes),
            "conv2_w": conv_w(ks[2], planes, planes), "bn2": bn(ks[3], planes)}


if __name__ == "__main__":
    key = jax.random.PRNGKey(0)
    k1, k2, k3, k4 = jax.random.split(key, 4)

    # Case 1: downsampling block (stride=2, 4 -> 8 channels, cifar10 pad shortcut)
    x_a = jax.random.normal(k1, (2, 4, 16, 16), jnp.float32)       # NCHW
    p_a = init_params(k2, 4, 8)
    y_a = jax.block_until_ready(basic_block_forward(x_a, p_a, stride=2))
    r_a = jax.block_until_ready(basic_block_ref(x_a, p_a, stride=2))
    assert y_a.shape == (2, 8, 8, 8), y_a.shape
    assert jnp.allclose(y_a, r_a, atol=5e-3, rtol=5e-3), \
        float(jnp.max(jnp.abs(y_a - r_a)))

    # Case 2: identity-shortcut block (stride=1, 8 -> 8 channels)
    x_b = jax.random.normal(k3, (2, 8, 16, 16), jnp.float32)
    p_b = init_params(k4, 8, 8)
    y_b = jax.block_until_ready(basic_block_forward(x_b, p_b, stride=1))
    r_b = jax.block_until_ready(basic_block_ref(x_b, p_b, stride=1))
    assert y_b.shape == (2, 8, 16, 16), y_b.shape
    assert jnp.allclose(y_b, r_b, atol=5e-3, rtol=5e-3), \
        float(jnp.max(jnp.abs(y_b - r_b)))

    print("KERNEL_OK")
</pallas_src>

<mosaic_0001>
module attributes {stable_mosaic.version = 11 : i64} {
  func.func @_block_kernel(%arg0: i32, %arg1: memref<1x36x9x4xf32, #tpu.memory_space<vmem>>, %arg2: memref<9x4x8xbf16, #tpu.memory_space<vmem>>, %arg3: memref<1x8xf32, #tpu.memory_space<vmem>>, %arg4: memref<9x8x8xbf16, #tpu.memory_space<vmem>>, %arg5: memref<1x8xf32, #tpu.memory_space<vmem>>, %arg6: memref<1x8x8x8xf32, #tpu.memory_space<vmem>>, %arg7: memref<1x36x9x4xbf16, #tpu.memory_space<vmem>>, %arg8: memref<1x10x10x8xbf16, #tpu.memory_space<vmem>>) attributes {dimension_semantics = [#tpu.dimension_semantics<parallel>], iteration_bounds = array<i64: 2>, scalar_prefetch = 0 : i64, scratch_operands = 2 : i64, tpu.core_type = #tpu.core_type<tc>, window_params = [{transform_indices = @transform_0, window_bounds = array<i64: 1, 36, 9, 4>}, {pipeline_mode = #tpu.pipeline_mode<synchronous>, transform_indices = @transform_1, window_bounds = array<i64: 9, 4, 8>}, {pipeline_mode = #tpu.pipeline_mode<synchronous>, transform_indices = @transform_2, window_bounds = array<i64: 1, 8>}, {pipeline_mode = #tpu.pipeline_mode<synchronous>, transform_indices = @transform_3, window_bounds = array<i64: 9, 8, 8>}, {pipeline_mode = #tpu.pipeline_mode<synchronous>, transform_indices = @transform_4, window_bounds = array<i64: 1, 8>}, {transform_indices = @transform_5, window_bounds = array<i64: 1, 8, 8, 8>}]} {
    %c0 = arith.constant 0 : index
    %c0_0 = arith.constant 0 : index
    %c0_1 = arith.constant 0 : index
    %c0_2 = arith.constant 0 : index
    %0 = vector.load %arg1[%c0, %c0_0, %c0_1, %c0_2] : memref<1x36x9x4xf32, #tpu.memory_space<vmem>>, vector<1x36x9x4xf32>
    %1 = arith.truncf %0 : vector<1x36x9x4xf32> to vector<1x36x9x4xbf16>
    %cst = arith.constant 0.000000e+00 : bf16
    %2 = vector.broadcast %cst : bf16 to vector<1x36x9x4xbf16>
    %3 = arith.maximumf %1, %2 : vector<1x36x9x4xbf16>
    %c0_3 = arith.constant 0 : index
    %c0_4 = arith.constant 0 : index
    %c0_5 = arith.constant 0 : index
    %c0_6 = arith.constant 0 : index
    %4 = vector.load %arg7[%c0_3, %c0_4, %c0_5, %c0_6] : memref<1x36x9x4xbf16, #tpu.memory_space<vmem>>, vector<1x36x9x4xbf16>
    tpu.vector_store %arg7[%c0_3, %c0_4, %c0_5, %c0_6], %3 {strides = array<i32>} : memref<1x36x9x4xbf16, #tpu.memory_space<vmem>>, vector<1x36x9x4xbf16>,
    %cst_7 = arith.constant 0.000000e+00 : f32
    %5 = vector.broadcast %cst_7 : f32 to vector<64x8xf32>
    %c0_8 = arith.constant 0 : index
    %c0_9 = arith.constant 0 : index
    %c0_10 = arith.constant 0 : index
    %c0_11 = arith.constant 0 : index
    %6 = vector.load %arg7[%c0_8, %c0_9, %c0_10, %c0_11] : memref<1x36x9x4xbf16, #tpu.memory_space<vmem>>, vector<1x8x8x4xbf16>
    %7 = vector.shape_cast %6 : vector<1x8x8x4xbf16> to vector<64x4xbf16>
    %c0_12 = arith.constant 0 : index
    %c0_13 = arith.constant 0 : index
    %c0_14 = arith.constant 0 : index
    %8 = vector.load %arg2[%c0_12, %c0_13, %c0_14] : memref<9x4x8xbf16, #tpu.memory_space<vmem>>, vector<1x4x8xbf16>
    %9 = vector.shape_cast %8 : vector<1x4x8xbf16> to vector<4x8xbf16>
    %cst_15 = arith.constant dense<0.000000e+00> : vector<64x8xf32>
    %10 = tpu.matmul %7, %9, %cst_15 {dimension_numbers = #tpu.dot_dimension_numbers<[1], [0], [0], [1], [0, 0, 1, 1], [], []>} : vector<64x4xbf16>, vector<4x8xbf16>, vector<64x8xf32> -> vector<64x8xf32>
    %11 = arith.addf %5, %10 : vector<64x8xf32>
    %c0_16 = arith.constant 0 : index
    %c9 = arith.constant 9 : index
    %c0_17 = arith.constant 0 : index
    %c0_18 = arith.constant 0 : index
    %12 = vector.load %arg7[%c0_16, %c9, %c0_17, %c0_18] : memref<1x36x9x4xbf16, #tpu.memory_space<vmem>>, vector<1x8x8x4xbf16>
    %13 = vector.shape_cast %12 : vector<1x8x8x4xbf16> to vector<64x4xbf16>
    %c1 = arith.constant 1 : index
    %c0_19 = arith.constant 0 : index
    %c0_20 = arith.constant 0 : index
    %14 = vector.load %arg2[%c1, %c0_19, %c0_20] : memref<9x4x8xbf16, #tpu.memory_space<vmem>>, vector<1x4x8xbf16>
    %15 = vector.shape_cast %14 : vector<1x4x8xbf16> to vector<4x8xbf16>
    %cst_21 = arith.constant dense<0.000000e+00> : vector<64x8xf32>
    %16 = tpu.matmul %13, %15, %cst_21 {dimension_numbers = #tpu.dot_dimension_numbers<[1], [0], [0], [1], [0, 0, 1, 1], [], []>} : vector<64x4xbf16>, vector<4x8xbf16>, vector<64x8xf32> -> vector<64x8xf32>
    %17 = arith.addf %11, %16 : vector<64x8xf32>
    %c0_22 = arith.constant 0 : index
    %c0_23 = arith.constant 0 : index
    %c1_24 = arith.constant 1 : index
    %c0_25 = arith.constant 0 : index
    %18 = vector.load %arg7[%c0_22, %c0_23, %c1_24, %c0_25] : memref<1x36x9x4xbf16, #tpu.memory_space<vmem>>, vector<1x8x8x4xbf16>
    %19 = vector.shape_cast %18 : vector<1x8x8x4xbf16> to vector<64x4xbf16>
    %c2 = arith.constant 2 : index
    %c0_26 = arith.constant 0 : index
    %c0_27 = arith.constant 0 : index
    %20 = vector.load %arg2[%c2, %c0_26, %c0_27] : memref<9x4x8xbf16, #tpu.memory_space<vmem>>, vector<1x4x8xbf16>
    %21 = vector.shape_cast %20 : vector<1x4x8xbf16> to vector<4x8xbf16>
    %cst_28 = arith.constant dense<0.000000e+00> : vector<64x8xf32>
    %22 = tpu.matmul %19, %21, %cst_28 {dimension_numbers = #tpu.dot_dimension_numbers<[1], [0], [0], [1], [0, 0, 1, 1], [], []>} : vector<64x4xbf16>, vector<4x8xbf16>, vector<64x8xf32> -> vector<64x8xf32>
    %23 = arith.addf %17, %22 : vector<64x8xf32>
    %c0_29 = arith.constant 0 : index
    %c18 = arith.constant 18 : index
    %c0_30 = arith.constant 0 : index
    %c0_31 = arith.constant 0 : index
    %24 = vector.load %arg7[%c0_29, %c18, %c0_30, %c0_31] : memref<1x36x9x4xbf16, #tpu.memory_space<vmem>>, vector<1x8x8x4xbf16>
    %25 = vector.shape_cast %24 : vector<1x8x8x4xbf16> to vector<64x4xbf16>
    %c3 = arith.constant 3 : index
    %c0_32 = arith.constant 0 : index
    %c0_33 = arith.constant 0 : index
    %26 = vector.load %arg2[%c3, %c0_32, %c0_33] : memref<9x4x8xbf16, #tpu.memory_space<vmem>>, vector<1x4x8xbf16>
    %27 = vector.shape_cast %26 : vector<1x4x8xbf16> to vector<4x8xbf16>
    %cst_34 = arith.constant dense<0.000000e+00> : vector<64x8xf32>
    %28 = tpu.matmul %25, %27, %cst_34 {dimension_numbers = #tpu.dot_dimension_numbers<[1], [0], [0], [1], [0, 0, 1, 1], [], []>} : vector<64x4xbf16>, vector<4x8xbf16>, vector<64x8xf32> -> vector<64x8xf32>
    %29 = arith.addf %23, %28 : vector<64x8xf32>
    %c0_35 = arith.constant 0 : index
    %c27 = arith.constant 27 : index
    %c0_36 = arith.constant 0 : index
    %c0_37 = arith.constant 0 : index
    %30 = vector.load %arg7[%c0_35, %c27, %c0_36, %c0_37] : memref<1x36x9x4xbf16, #tpu.memory_space<vmem>>, vector<1x8x8x4xbf16>
    %31 = vector.shape_cast %30 : vector<1x8x8x4xbf16> to vector<64x4xbf16>
    %c4 = arith.constant 4 : index
    %c0_38 = arith.constant 0 : index
    %c0_39 = arith.constant 0 : index
    %32 = vector.load %arg2[%c4, %c0_38, %c0_39] : memref<9x4x8xbf16, #tpu.memory_space<vmem>>, vector<1x4x8xbf16>
    %33 = vector.shape_cast %32 : vector<1x4x8xbf16> to vector<4x8xbf16>
    %cst_40 = arith.constant dense<0.000000e+00> : vector<64x8xf32>
    %34 = tpu.matmul %31, %33, %cst_40 {dimension_numbers = #tpu.dot_dimension_numbers<[1], [0], [0], [1], [0, 0, 1, 1], [], []>} : vector<64x4xbf16>, vector<4x8xbf16>, vector<64x8xf32> -> vector<64x8xf32>
    %35 = arith.addf %29, %34 : vector<64x8xf32>
    %c0_41 = arith.constant 0 : index
    %c18_42 = arith.constant 18 : index
    %c1_43 = arith.constant 1 : index
    %c0_44 = arith.constant 0 : index
    %36 = vector.load %arg7[%c0_41, %c18_42, %c1_43, %c0_44] : memref<1x36x9x4xbf16, #tpu.memory_space<vmem>>, vector<1x8x8x4xbf16>
    %37 = vector.shape_cast %36 : vector<1x8x8x4xbf16> to vector<64x4xbf16>
    %c5 = arith.constant 5 : index
    %c0_45 = arith.constant 0 : index
    %c0_46 = arith.constant 0 : index
    %38 = vector.load %arg2[%c5, %c0_45, %c0_46] : memref<9x4x8xbf16, #tpu.memory_space<vmem>>, vector<1x4x8xbf16>
    %39 = vector.shape_cast %38 : vector<1x4x8xbf16> to vector<4x8xbf16>
    %cst_47 = arith.constant dense<0.000000e+00> : vector<64x8xf32>
    %40 = tpu.matmul %37, %39, %cst_47 {dimension_numbers = #tpu.dot_dimension_numbers<[1], [0], [0], [1], [0, 0, 1, 1], [], []>} : vector<64x4xbf16>, vector<4x8xbf16>, vector<64x8xf32> -> vector<64x8xf32>
    %41 = arith.addf %35, %40 : vector<64x8xf32>
    %c0_48 = arith.constant 0 : index
    %c1_49 = arith.constant 1 : index
    %c0_50 = arith.constant 0 : index
    %c0_51 = arith.constant 0 : index
    %42 = vector.load %arg7[%c0_48, %c1_49, %c0_50, %c0_51] : memref<1x36x9x4xbf16, #tpu.memory_space<vmem>>, vector<1x8x8x4xbf16>
    %43 = vector.shape_cast %42 : vector<1x8x8x4xbf16> to vector<64x4xbf16>
    %c6 = arith.constant 6 : index
    %c0_52 = arith.constant 0 : index
    %c0_53 = arith.constant 0 : index
    %44 = vector.load %arg2[%c6, %c0_52, %c0_53] : memref<9x4x8xbf16, #tpu.memory_space<vmem>>, vector<1x4x8xbf16>
    %45 = vector.shape_cast %44 : vector<1x4x8xbf16> to vector<4x8xbf16>
    %cst_54 = arith.constant dense<0.000000e+00> : vector<64x8xf32>
    %46 = tpu.matmul %43, %45, %cst_54 {dimension_numbers = #tpu.dot_dimension_numbers<[1], [0], [0], [1], [0, 0, 1, 1], [], []>} : vector<64x4xbf16>, vector<4x8xbf16>, vector<64x8xf32> -> vector<64x8xf32>
    %47 = arith.addf %41, %46 : vector<64x8xf32>
    %c0_55 = arith.constant 0 : index
    %c10 = arith.constant 10 : index
    %c0_56 = arith.constant 0 : index
    %c0_57 = arith.constant 0 : index
    %48 = vector.load %arg7[%c0_55, %c10, %c0_56, %c0_57] : memref<1x36x9x4xbf16, #tpu.memory_space<vmem>>, vector<1x8x8x4xbf16>
    %49 = vector.shape_cast %48 : vector<1x8x8x4xbf16> to vector<64x4xbf16>
    %c7 = arith.constant 7 : index
    %c0_58 = arith.constant 0 : index
    %c0_59 = arith.constant 0 : index
    %50 = vector.load %arg2[%c7, %c0_58, %c0_59] : memref<9x4x8xbf16, #tpu.memory_space<vmem>>, vector<1x4x8xbf16>
    %51 = vector.shape_cast %50 : vector<1x4x8xbf16> to vector<4x8xbf16>
    %cst_60 = arith.constant dense<0.000000e+00> : vector<64x8xf32>
    %52 = tpu.matmul %49, %51, %cst_60 {dimension_numbers = #tpu.dot_dimension_numbers<[1], [0], [0], [1], [0, 0, 1, 1], [], []>} : vector<64x4xbf16>, vector<4x8xbf16>, vector<64x8xf32> -> vector<64x8xf32>
    %53 = arith.addf %47, %52 : vector<64x8xf32>
    %c0_61 = arith.constant 0 : index
    %c1_62 = arith.constant 1 : index
    %c1_63 = arith.constant 1 : index
    %c0_64 = arith.constant 0 : index
    %54 = vector.load %arg7[%c0_61, %c1_62, %c1_63, %c0_64] : memref<1x36x9x4xbf16, #tpu.memory_space<vmem>>, vector<1x8x8x4xbf16>
    %55 = vector.shape_cast %54 : vector<1x8x8x4xbf16> to vector<64x4xbf16>
    %c8 = arith.constant 8 : index
    %c0_65 = arith.constant 0 : index
    %c0_66 = arith.constant 0 : index
    %56 = vector.load %arg2[%c8, %c0_65, %c0_66] : memref<9x4x8xbf16, #tpu.memory_space<vmem>>, vector<1x4x8xbf16>
    %57 = vector.shape_cast %56 : vector<1x4x8xbf16> to vector<4x8xbf16>
    %cst_67 = arith.constant dense<0.000000e+00> : vector<64x8xf32>
    %58 = tpu.matmul %55, %57, %cst_67 {dimension_numbers = #tpu.dot_dimension_numbers<[1], [0], [0], [1], [0, 0, 1, 1], [], []>} : vector<64x4xbf16>, vector<4x8xbf16>, vector<64x8xf32> -> vector<64x8xf32>
    %59 = arith.addf %53, %58 : vector<64x8xf32>
    %c0_68 = arith.constant 0 : index
    %c0_69 = arith.constant 0 : index
    %60 = vector.load %arg3[%c0_68, %c0_69] : memref<1x8xf32, #tpu.memory_space<vmem>>, vector<1x8xf32>
    %61 = vector.broadcast %60 : vector<1x8xf32> to vector<64x8xf32>
    %62 = arith.addf %59, %61 : vector<64x8xf32>
    %cst_70 = arith.constant 0.000000e+00 : f32
    %63 = vector.broadcast %cst_70 : f32 to vector<64x8xf32>
    %64 = arith.maximumf %62, %63 : vector<64x8xf32>
    %cst_71 = arith.constant 0.000000e+00 : bf16
    %65 = vector.broadcast %cst_71 : bf16 to vector<1x10x10x8xbf16>
    %c0_72 = arith.constant 0 : index
    %c0_73 = arith.constant 0 : index
    %c0_74 = arith.constant 0 : index
    %c0_75 = arith.constant 0 : index
    %66 = vector.load %arg8[%c0_72, %c0_73, %c0_74, %c0_75] : memref<1x10x10x8xbf16, #tpu.memory_space<vmem>>, vector<1x10x10x8xbf16>
    tpu.vector_store %arg8[%c0_72, %c0_73, %c0_74, %c0_75], %65 {strides = array<i32>} : memref<1x10x10x8xbf16, #tpu.memory_space<vmem>>, vector<1x10x10x8xbf16>,
    %67 = arith.truncf %64 : vector<64x8xf32> to vector<64x8xbf16>
    %68 = vector.shape_cast %67 : vector<64x8xbf16> to vector<1x8x8x8xbf16>
    %c0_76 = arith.constant 0 : index
    %c1_77 = arith.constant 1 : index
    %c1_78 = arith.constant 1 : index
    %c0_79 = arith.constant 0 : index
    %69 = vector.load %arg8[%c0_76, %c1_77, %c1_78, %c0_79] : memref<1x10x10x8xbf16, #tpu.memory_space<vmem>>, vector<1x8x8x8xbf16>
    tpu.vector_store %arg8[%c0_76, %c1_77, %c1_78, %c0_79], %68 {strides = array<i32>} : memref<1x10x10x8xbf16, #tpu.memory_space<vmem>>, vector<1x8x8x8xbf16>,
    %cst_80 = arith.constant 0.000000e+00 : f32
    %70 = vector.broadcast %cst_80 : f32 to vector<64x8xf32>
    %c0_81 = arith.constant 0 : index
    %c0_82 = arith.constant 0 : index
    %c0_83 = arith.constant 0 : index
    %c0_84 = arith.constant 0 : index
    %71 = vector.load %arg8[%c0_81, %c0_82, %c0_83, %c0_84] : memref<1x10x10x8xbf16, #tpu.memory_space<vmem>>, vector<1x8x8x8xbf16>
    %72 = vector.shape_cast %71 : vector<1x8x8x8xbf16> to vector<64x8xbf16>
    %c0_85 = arith.constant 0 : index
    %c0_86 = arith.constant 0 : index
    %c0_87 = arith.constant 0 : index
    %73 = vector.load %arg4[%c0_85, %c0_86, %c0_87] : memref<9x8x8xbf16, #tpu.memory_space<vmem>>, vector<1x8x8xbf16>
    %74 = vector.shape_cast %73 : vector<1x8x8xbf16> to vector<8x8xbf16>
    %cst_88 = arith.constant dense<0.000000e+00> : vector<64x8xf32>
    %75 = tpu.matmul %72, %74, %cst_88 {dimension_numbers = #tpu.dot_dimension_numbers<[1], [0], [0], [1], [0, 0, 1, 1], [], []>} : vector<64x8xbf16>, vector<8x8xbf16>, vector<64x8xf32> -> vector<64x8xf32>
    %76 = arith.addf %70, %75 : vector<64x8xf32>
    %c0_89 = arith.constant 0 : index
    %c0_90 = arith.constant 0 : index
    %c1_91 = arith.constant 1 : index
    %c0_92 = arith.constant 0 : index
    %77 = vector.load %arg8[%c0_89, %c0_90, %c1_91, %c0_92] : memref<1x10x10x8xbf16, #tpu.memory_space<vmem>>, vector<1x8x8x8xbf16>
    %78 = vector.shape_cast %77 : vector<1x8x8x8xbf16> to vector<64x8xbf16>
    %c1_93 = arith.constant 1 : index
    %c0_94 = arith.constant 0 : index
    %c0_95 = arith.constant 0 : index
    %79 = vector.load %arg4[%c1_93, %c0_94, %c0_95] : memref<9x8x8xbf16, #tpu.memory_space<vmem>>, vector<1x8x8xbf16>
    %80 = vector.shape_cast %79 : vector<1x8x8xbf16> to vector<8x8xbf16>
    %cst_96 = arith.constant dense<0.000000e+00> : vector<64x8xf32>
    %81 = tpu.matmul %78, %80, %cst_96 {dimension_numbers = #tpu.dot_dimension_numbers<[1], [0], [0], [1], [0, 0, 1, 1], [], []>} : vector<64x8xbf16>, vector<8x8xbf16>, vector<64x8xf32> -> vector<64x8xf32>
    %82 = arith.addf %76, %81 : vector<64x8xf32>
    %c0_97 = arith.constant 0 : index
    %c0_98 = arith.constant 0 : index
    %c2_99 = arith.constant 2 : index
    %c0_100 = arith.constant 0 : index
    %83 = vector.load %arg8[%c0_97, %c0_98, %c2_99, %c0_100] : memref<1x10x10x8xbf16, #tpu.memory_space<vmem>>, vector<1x8x8x8xbf16>
    %84 = vector.shape_cast %83 : vector<1x8x8x8xbf16> to vector<64x8xbf16>
    %c2_101 = arith.constant 2 : index
    %c0_102 = arith.constant 0 : index
    %c0_103 = arith.constant 0 : index
    %85 = vector.load %arg4[%c2_101, %c0_102, %c0_103] : memref<9x8x8xbf16, #tpu.memory_space<vmem>>, vector<1x8x8xbf16>
    %86 = vector.shape_cast %85 : vector<1x8x8xbf16> to vector<8x8xbf16>
    %cst_104 = arith.constant dense<0.000000e+00> : vector<64x8xf32>
    %87 = tpu.matmul %84, %86, %cst_104 {dimension_numbers = #tpu.dot_dimension_numbers<[1], [0], [0], [1], [0, 0, 1, 1], [], []>} : vector<64x8xbf16>, vector<8x8xbf16>, vector<64x8xf32> -> vector<64x8xf32>
    %88 = arith.addf %82, %87 : vector<64x8xf32>
    %c0_105 = arith.constant 0 : index
    %c1_106 = arith.constant 1 : index
    %c0_107 = arith.constant 0 : index
    %c0_108 = arith.constant 0 : index
    %89 = vector.load %arg8[%c0_105, %c1_106, %c0_107, %c0_108] : memref<1x10x10x8xbf16, #tpu.memory_space<vmem>>, vector<1x8x8x8xbf16>
    %90 = vector.shape_cast %89 : vector<1x8x8x8xbf16> to vector<64x8xbf16>
    %c3_109 = arith.constant 3 : index
    %c0_110 = arith.constant 0 : index
    %c0_111 = arith.constant 0 : index
    %91 = vector.load %arg4[%c3_109, %c0_110, %c0_111] : memref<9x8x8xbf16, #tpu.memory_space<vmem>>, vector<1x8x8xbf16>
    %92 = vector.shape_cast %91 : vector<1x8x8xbf16> to vector<8x8xbf16>
    %cst_112 = arith.constant dense<0.000000e+00> : vector<64x8xf32>
    %93 = tpu.matmul %90, %92, %cst_112 {dimension_numbers = #tpu.dot_dimension_numbers<[1], [0], [0], [1], [0, 0, 1, 1], [], []>} : vector<64x8xbf16>, vector<8x8xbf16>, vector<64x8xf32> -> vector<64x8xf32>
    %94 = arith.addf %88, %93 : vector<64x8xf32>
    %c0_113 = arith.constant 0 : index
    %c1_114 = arith.constant 1 : index
    %c1_115 = arith.constant 1 : index
    %c0_116 = arith.constant 0 : index
    %95 = vector.load %arg8[%c0_113, %c1_114, %c1_115, %c0_116] : memref<1x10x10x8xbf16, #tpu.memory_space<vmem>>, vector<1x8x8x8xbf16>
    %96 = vector.shape_cast %95 : vector<1x8x8x8xbf16> to vector<64x8xbf16>
    %c4_117 = arith.constant 4 : index
    %c0_118 = arith.constant 0 : index
    %c0_119 = arith.constant 0 : index
    %97 = vector.load %arg4[%c4_117, %c0_118, %c0_119] : memref<9x8x8xbf16, #tpu.memory_space<vmem>>, vector<1x8x8xbf16>
    %98 = vector.shape_cast %97 : vector<1x8x8xbf16> to vector<8x8xbf16>
    %cst_120 = arith.constant dense<0.000000e+00> : vector<64x8xf32>
    %99 = tpu.matmul %96, %98, %cst_120 {dimension_numbers = #tpu.dot_dimension_numbers<[1], [0], [0], [1], [0, 0, 1, 1], [], []>} : vector<64x8xbf16>, vector<8x8xbf16>, vector<64x8xf32> -> vector<64x8xf32>
    %100 = arith.addf %94, %99 : vector<64x8xf32>
    %c0_121 = arith.constant 0 : index
    %c1_122 = arith.constant 1 : index
    %c2_123 = arith.constant 2 : index
    %c0_124 = arith.constant 0 : index
    %101 = vector.load %arg8[%c0_121, %c1_122, %c2_123, %c0_124] : memref<1x10x10x8xbf16, #tpu.memory_space<vmem>>, vector<1x8x8x8xbf16>
    %102 = vector.shape_cast %101 : vector<1x8x8x8xbf16> to vector<64x8xbf16>
    %c5_125 = arith.constant 5 : index
    %c0_126 = arith.constant 0 : index
    %c0_127 = arith.constant 0 : index
    %103 = vector.load %arg4[%c5_125, %c0_126, %c0_127] : memref<9x8x8xbf16, #tpu.memory_space<vmem>>, vector<1x8x8xbf16>
    %104 = vector.shape_cast %103 : vector<1x8x8xbf16> to vector<8x8xbf16>
    %cst_128 = arith.constant dense<0.000000e+00> : vector<64x8xf32>
    %105 = tpu.matmul %102, %104, %cst_128 {dimension_numbers = #tpu.dot_dimension_numbers<[1], [0], [0], [1], [0, 0, 1, 1], [], []>} : vector<64x8xbf16>, vector<8x8xbf16>, vector<64x8xf32> -> vector<64x8xf32>
    %106 = arith.addf %100, %105 : vector<64x8xf32>
    %c0_129 = arith.constant 0 : index
    %c2_130 = arith.constant 2 : index
    %c0_131 = arith.constant 0 : index
    %c0_132 = arith.constant 0 : index
    %107 = vector.load %arg8[%c0_129, %c2_130, %c0_131, %c0_132] : memref<1x10x10x8xbf16, #tpu.memory_space<vmem>>, vector<1x8x8x8xbf16>
    %108 = vector.shape_cast %107 : vector<1x8x8x8xbf16> to vector<64x8xbf16>
    %c6_133 = arith.constant 6 : index
    %c0_134 = arith.constant 0 : index
    %c0_135 = arith.constant 0 : index
    %109 = vector.load %arg4[%c6_133, %c0_134, %c0_135] : memref<9x8x8xbf16, #tpu.memory_space<vmem>>, vector<1x8x8xbf16>
    %110 = vector.shape_cast %109 : vector<1x8x8xbf16> to vector<8x8xbf16>
    %cst_136 = arith.constant dense<0.000000e+00> : vector<64x8xf32>
    %111 = tpu.matmul %108, %110, %cst_136 {dimension_numbers = #tpu.dot_dimension_numbers<[1], [0], [0], [1], [0, 0, 1, 1], [], []>} : vector<64x8xbf16>, vector<8x8xbf16>, vector<64x8xf32> -> vector<64x8xf32>
    %112 = arith.addf %106, %111 : vector<64x8xf32>
    %c0_137 = arith.constant 0 : index
    %c2_138 = arith.constant 2 : index
    %c1_139 = arith.constant 1 : index
    %c0_140 = arith.constant 0 : index
    %113 = vector.load %arg8[%c0_137, %c2_138, %c1_139, %c0_140] : memref<1x10x10x8xbf16, #tpu.memory_space<vmem>>, vector<1x8x8x8xbf16>
    %114 = vector.shape_cast %113 : vector<1x8x8x8xbf16> to vector<64x8xbf16>
    %c7_141 = arith.constant 7 : index
    %c0_142 = arith.constant 0 : index
    %c0_143 = arith.constant 0 : index
    %115 = vector.load %arg4[%c7_141, %c0_142, %c0_143] : memref<9x8x8xbf16, #tpu.memory_space<vmem>>, vector<1x8x8xbf16>
    %116 = vector.shape_cast %115 : vector<1x8x8xbf16> to vector<8x8xbf16>
    %cst_144 = arith.constant dense<0.000000e+00> : vector<64x8xf32>
    %117 = tpu.matmul %114, %116, %cst_144 {dimension_numbers = #tpu.dot_dimension_numbers<[1], [0], [0], [1], [0, 0, 1, 1], [], []>} : vector<64x8xbf16>, vector<8x8xbf16>, vector<64x8xf32> -> vector<64x8xf32>
    %118 = arith.addf %112, %117 : vector<64x8xf32>
    %c0_145 = arith.constant 0 : index
    %c2_146 = arith.constant 2 : index
    %c2_147 = arith.constant 2 : index
    %c0_148 = arith.constant 0 : index
    %119 = vector.load %arg8[%c0_145, %c2_146, %c2_147, %c0_148] : memref<1x10x10x8xbf16, #tpu.memory_space<vmem>>, vector<1x8x8x8xbf16>
    %120 = vector.shape_cast %119 : vector<1x8x8x8xbf16> to vector<64x8xbf16>
    %c8_149 = arith.constant 8 : index
    %c0_150 = arith.constant 0 : index
    %c0_151 = arith.constant 0 : index
    %121 = vector.load %arg4[%c8_149, %c0_150, %c0_151] : memref<9x8x8xbf16, #tpu.memory_space<vmem>>, vector<1x8x8xbf16>
    %122 = vector.shape_cast %121 : vector<1x8x8xbf16> to vector<8x8xbf16>
    %cst_152 = arith.constant dense<0.000000e+00> : vector<64x8xf32>
    %123 = tpu.matmul %120, %122, %cst_152 {dimension_numbers = #tpu.dot_dimension_numbers<[1], [0], [0], [1], [0, 0, 1, 1], [], []>} : vector<64x8xbf16>, vector<8x8xbf16>, vector<64x8xf32> -> vector<64x8xf32>
    %124 = arith.addf %118, %123 : vector<64x8xf32>
    %c0_153 = arith.constant 0 : index
    %c0_154 = arith.constant 0 : index
    %125 = vector.load %arg5[%c0_153, %c0_154] : memref<1x8xf32, #tpu.memory_space<vmem>>, vector<1x8xf32>
    %126 = vector.broadcast %125 : vector<1x8xf32> to vector<64x8xf32>
    %127 = arith.addf %124, %126 : vector<64x8xf32>
    %c0_155 = arith.constant 0 : index
    %c27_156 = arith.constant 27 : index
    %c0_157 = arith.constant 0 : index
    %c0_158 = arith.constant 0 : index
    %128 = vector.load %arg7[%c0_155, %c27_156, %c0_157, %c0_158] : memref<1x36x9x4xbf16, #tpu.memory_space<vmem>>, vector<1x8x8x4xbf16>
    %129 = vector.shape_cast %128 : vector<1x8x8x4xbf16> to vector<64x4xbf16>
    %130 = tpu.iota {dimensions = array<i32: 0>} : vector<4x8xi32>
    %131 = tpu.iota {dimensions = array<i32: 1>} : vector<4x8xi32>
    %c2_i32 = arith.constant 2 : i32
    %132 = vector.broadcast %c2_i32 : i32 to vector<4x8xi32>
    %133 = arith.addi %130, %132 : vector<4x8xi32>
    %134 = arith.cmpi eq, %131, %133 : vector<4x8xi32>
    %cst_159 = arith.constant 1.000000e+00 : f32
    %cst_160 = arith.constant 0.000000e+00 : f32
    %135 = vector.broadcast %cst_159 : f32 to vector<4x8xf32>
    %136 = vector.broadcast %cst_160 : f32 to vector<4x8xf32>
    %137 = arith.select %134, %135, %136 : vector<4x8xi1>, vector<4x8xf32>
    %138 = arith.truncf %137 : vector<4x8xf32> to vector<4x8xbf16>
    %cst_161 = arith.constant dense<0.000000e+00> : vector<64x8xf32>
    %139 = tpu.matmul %129, %138, %cst_161 {dimension_numbers = #tpu.dot_dimension_numbers<[1], [0], [0], [1], [0, 0, 1, 1], [], []>} : vector<64x4xbf16>, vector<4x8xbf16>, vector<64x8xf32> -> vector<64x8xf32>
    %140 = arith.addf %127, %139 : vector<64x8xf32>
    %141 = vector.shape_cast %140 : vector<64x8xf32> to vector<1x8x8x8xf32>
    %c0_162 = arith.constant 0 : index
    %c0_163 = arith.constant 0 : index
    %c0_164 = arith.constant 0 : index
    %c0_165 = arith.constant 0 : index
    %142 = vector.load %arg6[%c0_162, %c0_163, %c0_164, %c0_165] : memref<1x8x8x8xf32, #tpu.memory_space<vmem>>, vector<1x8x8x8xf32>
    tpu.vector_store %arg6[%c0_162, %c0_163, %c0_164, %c0_165], %141 {strides = array<i32>} : memref<1x8x8x8xf32, #tpu.memory_space<vmem>>, vector<1x8x8x8xf32>,
    return
  }
  func.func @transform_0(%arg0: i32) -> (i32, i32, i32, i32) {
    %c0_i32 = arith.constant 0 : i32
    %c0_i32_0 = arith.constant 0 : i32
    %c0_i32_1 = arith.constant 0 : i32
    %c0_i32_2 = arith.constant 0 : i32
    return %arg0, %c0_i32, %c0_i32_0, %c0_i32_1 : i32, i32, i32, i32
  }
  func.func @transform_1(%arg0: i32) -> (i32, i32, i32) {
    %c0_i32 = arith.constant 0 : i32
    %c0_i32_0 = arith.constant 0 : i32
    %c0_i32_1 = arith.constant 0 : i32
    %c0_i32_2 = arith.constant 0 : i32
    return %c0_i32, %c0_i32_0, %c0_i32_1 : i32, i32, i32
  }
  func.func @transform_2(%arg0: i32) -> (i32, i32) {
    %c0_i32 = arith.constant 0 : i32
    %c0_i32_0 = arith.constant 0 : i32
    %c0_i32_1 = arith.constant 0 : i32
    return %c0_i32, %c0_i32_0 : i32, i32
  }
  func.func @transform_3(%arg0: i32) -> (i32, i32, i32) {
    %c0_i32 = arith.constant 0 : i32
    %c0_i32_0 = arith.constant 0 : i32
    %c0_i32_1 = arith.constant 0 : i32
    %c0_i32_2 = arith.constant 0 : i32
    return %c0_i32, %c0_i32_0, %c0_i32_1 : i32, i32, i32
  }
  func.func @transform_4(%arg0: i32) -> (i32, i32) {
    %c0_i32 = arith.constant 0 : i32
    %c0_i32_0 = arith.constant 0 : i32
    %c0_i32_1 = arith.constant 0 : i32
    return %c0_i32, %c0_i32_0 : i32, i32
  }
  func.func @transform_5(%arg0: i32) -> (i32, i32, i32, i32) {
    %c0_i32 = arith.constant 0 : i32
    %c0_i32_0 = arith.constant 0 : i32
    %c0_i32_1 = arith.constant 0 : i32
    %c0_i32_2 = arith.constant 0 : i32
    return %arg0, %c0_i32, %c0_i32_0, %c0_i32_1 : i32, i32, i32, i32
  }
}

</mosaic_0001>

<bundles_post_ra>
// kernel: tpu_custom_call.1
= control target key start
LH: loop header
LB: loop body
LE: loop exit
PB: predicated region body
PF: predicated region fallthrough
CT: control target
= control target key end

     0   :  { %10 = vsyncpa [#allocation5], 0  ;;  %s6183_s0 = inlined_call_operand.vmem [shape: f32[2,36,9,4], index: 0, kind: input, shape index: {}]   ;;  %s6184_s1 = inlined_call_operand.vmem [shape: bf16[9,4,8], index: 1, kind: input, shape index: {}]   ;;  %s6185_s2 = inlined_call_operand.vmem [shape: f32[1,8], index: 2, kind: input, shape index: {}]   ;;  %s6186_s3 = inlined_call_operand.vmem [shape: bf16[9,8,8], index: 3, kind: input, shape index: {}]   ;;  %s6187_s4 = inlined_call_operand.vmem [shape: f32[1,8], index: 4, kind: input, shape index: {}]   ;;  %s6188_s5 = inlined_call_operand.hbm [shape: f32[2,8,8,8], index: 5, kind: output, shape index: {}]  }
   0x1   :  { %12 = vsyncpa [#allocation5 + $0x1], 0  ;;  %s4866_s18 = smov 0   ;;  %s4868_s19 = smov 0  }
   0x2   :  { %s4870_s20 = smov 0   ;;  %s4872_s21 = smov 0  }
   0x3 LB: > { %s4887_s22 = sadd.s32 4294967295, %s4829_s21   ;;  %s4084_s23 = sadd.s32 4294967294, %s4829_s21   ;;  %s4829_s21 = sphi %s4872_s21, %s6217_s21   ;;  %s4825_s20 = sphi %s4870_s20, %s6216_s20   ;;  %s4821_s19 = sphi %s4868_s19, %s6215_s19   ;;  %s4817_s18 = sphi %s4866_s18, %s6214_s18  }
   0x4   : > { %s4891_s24 = sadd.s32 1, %s4829_s21   ;;  %s135_s25 = sadd.s32 1, %s4825_s20 }
   0x5   : > { %s132_s26 = ssub.s32 %s4829_s21, %s4891_s24  ;;  %p145_p0 = scmp.ne.s32.totalorder %s4825_s20, %s4821_s19 }
   0x6   : > { %p133_p1 = scmp.eq.s32.totalorder %s132_s26, 0  ;;  %p146_p2 = scmp.eq.s32.totalorder %s4887_s22, 1 }
   0x7   : > { %p151_p3 = scmp.ne.s32.totalorder %s4821_s19, %s4817_s18  ;;  %p152_p4 = scmp.eq.s32.totalorder %s4084_s23, 1 }
   0x8   : > { %s4902_s27 = scalar_select %p133_p1, %s4825_s20, %s135_s25  }
   0x9   : > { %p4904_p5 = por %p146_p2, %p145_p0  ;;  %p4908_p6 = por %p152_p4, %p151_p3 }
   0xa   : > { %p4087_p7 = scmp.ge.s32.totalorder %s4829_s21, 1  ;;  %p190_p8 = scmp.lt.s32.totalorder %s4829_s21, 3 }
   0xc   : > { %p191_p9 = pnand %p4087_p7, %p190_p8 }
   0xe   : > { %194 = sbr.rel (%p191_p9) target bundleno = 680 (0x2a8), region = 40 }
  0x13   : > { %v4162_v0 = vld [vmem:[%s6184_s1 + $0x2] sm:$0x3]  ;;  %vm821_vm0 = vcmask 1041408   ;;  %p218_p10 = scmp.lt.s32.totalorder %s4887_s22, 1  ;;  %v776_v2 = vld [vmem:[%s6184_s1] sm:$0x3] }
  0x14   : > { %4666 = vmatprep.subr.msk.bf16.mxu1 %vm821_vm0, %v4162_v0  ;;  %4665 = vmatprep.subr.msk.bf16.mxu0 %vm821_vm0, %v4162_v0  ;;  %v823_v1 = vsel %vm821_vm0, %v4162_v0, 0  ;;  %v4179_v3 = vld [vmem:[%s6184_s1 + $0x4] sm:$0x3]  ;;  %vm623_vm1 = vsmask.f32 256  ;;  %vm620_vm2 = vcmask 27648  }
  0x15   : > { %4664 = vmatpush3.bf16.msra.mxu1 %v823_v1  ;;  %4474 = vmatpush3.bf16.msra.mxu0 %v823_v1  ;;  %s219_s7 = scalar_select %p218_p10, %s4887_s22, 1  ;;  %vm622_vm3 = vcmask 24576   ;;  %v4945_v16 = vsel %vm821_vm0, %v776_v2, 0  ;;  %v729_v17 = vld [vmem:[#allocation2 + $0xd4] sm:$0x1]  ;;  %v4831_v19 = vmov 0  }
  0x16   : > { %4667 = vmatprep.subr.msk.bf16.mxu1 %vm821_vm0, %v776_v2  ;;  %4668 = vmatprep.subr.msk.bf16.mxu0 %vm821_vm0, %v4179_v3  ;;  %v4952_v24 = vsel %vm821_vm0, %v4179_v3, 0  ;;  %v661_v27 = vld [vmem:[#allocation2 + $0x4c] sm:$0x1]  ;;  %v665_v35 = vld [vmem:[#allocation2 + $0x54] sm:$0x1]  ;;  %vm4963_vm4 = vmand %vm622_vm3, %vm623_vm1  ;;  %vm808_vm5 = vcmask 31744  }
  0x17   : > { %s4685_s8 = smul.u32 576, %s219_s7  ;;  %v765_v39 = vld [vmem:[#allocation2 + $0x11c] sm:$0x1]  ;;  %v677_v52 = vld [vmem:[#allocation2 + $0x6c] sm:$0x1]  ;;  %vm2182_vm9 = vcmask 60416  }
  0x18   : > { %v681_v59 = vld [vmem:[#allocation2 + $0x74] sm:$0x1]  ;;  %v669_v61 = vld [vmem:[#allocation2 + $0x5c] sm:$0x1]  ;;  %vm1006_vm6 = vsmask.f32 3328 }
  0x19   : > { %s4929_s13 = scalar_lea.vmem %s6183_s0, %s4685_s8  ;;  %vm1007_vm7 = vsmask.f32 7440  ;;  %vm2184_vm10 = vcmask 57344   ;;  %2190 = vst.msk [vmem:[#allocation3 + $0x18] sm:$0xf] %vm2182_vm9, %v4831_v19  ;;  %vm2518_vm11 = vcmask 1043456  }
  0x1a   : > { %v242_v4 = vld [vmem:[%s4929_s13 + $0x90] sm:$0xff]  ;;  %v243_v5 = vld [vmem:[%s4929_s13 + $0x98] sm:$0x1]  ;;  %v244_v6 = vld [vmem:[%s4929_s13 + $0xa0] sm:$0xff]  ;;  %2191 = vst.msk [vmem:[#allocation3 + $0x1c] sm:$0x1] %vm2184_vm10, %v4831_v19 }
  0x1b   : > { %v245_v7 = vld [vmem:[%s4929_s13 + $0xa8] sm:$0x1]  ;;  %v276_v8 = vld [vmem:[%s4929_s13 + $0x1a0] sm:$0xff]  ;;  %v305_v10 = vpack.c.bf16 %v243_v5, %v242_v4  ;;  %v294_v11 = vld [vmem:[%s4929_s13 + $0x230] sm:$0xff]  ;;  %2183 = vst.msk [vmem:[#allocation3] sm:$0xf] %vm2182_vm9, %v4831_v19 }
  0x1c   : > { %v277_v9 = vld [vmem:[%s4929_s13 + $0x1a8] sm:$0x1]  ;;  %v295_v12 = vld [vmem:[%s4929_s13 + $0x238] sm:$0x1]  ;;  %v306_v13 = vpack.c.bf16 %v245_v7, %v244_v6  ;;  %v250_v15 = vld [vmem:[%s4929_s13 + $0xd0] sm:$0xff]  ;;  %vm2711_vm12 = vcmask 1042432  }
  0x1d   : > { %v322_v14 = vpack.c.bf16 %v277_v9, %v276_v8  ;;  %v331_v18 = vpack.c.bf16 %v295_v12, %v294_v11  ;;  %v341_v20 = vmax.bf16 %v4831_v19, %v305_v10  ;;  %v251_v21 = vld [vmem:[%s4929_s13 + $0xd8] sm:$0x1]  ;;  %v252_v22 = vld [vmem:[%s4929_s13 + $0xe0] sm:$0xff]  ;;  %v253_v23 = vld [vmem:[%s4929_s13 + $0xe8] sm:$0x1]  ;;  %vm2712_vm13 = vcmask 1046532  }
  0x1e   : > { %v342_v25 = vmax.bf16 %v4831_v19, %v306_v13  ;;  %v309_v28 = vpack.c.bf16 %v251_v21, %v250_v15  ;;  %v310_v29 = vpack.c.bf16 %v253_v23, %v252_v22  ;;  %v246_v30 = vld [vmem:[%s4929_s13 + $0xb0] sm:$0xff]  ;;  %v247_v31 = vld [vmem:[%s4929_s13 + $0xb8] sm:$0x1]  ;;  %v248_v36 = vld [vmem:[%s4929_s13 + $0xc0] sm:$0xff]  ;;  %2185 = vst.msk [vmem:[#allocation3 + $0x4] sm:$0x1] %vm2184_vm10, %v4831_v19 }
  0x1f   : > { %v358_v26 = vmax.bf16 %v4831_v19, %v322_v14  ;;  %v367_v32 = vmax.bf16 %v4831_v19, %v331_v18  ;;  %v4108_v33 = vcombine.low %v341_v20, %v341_v20  ;;  %v4109_v34 = vcombine.high %v341_v20, %v341_v20  ;;  %v249_v37 = vld [vmem:[%s4929_s13 + $0xc8] sm:$0x1]  ;;  %v254_v47 = vld [vmem:[%s4929_s13 + $0xf0] sm:$0xff]  ;;  %v255_v48 = vld [vmem:[%s4929_s13 + $0xf8] sm:$0x1]  ;;  %s215_s16 = sand.u32 1, %s4821_s19  }
  0x20   : > { %v307_v38 = vpack.c.bf16 %v247_v31, %v246_v30  ;;  %v4110_v40 = vcombine.low %v342_v25, %v342_v25  ;;  %v4111_v41 = vcombine.high %v342_v25, %v342_v25  ;;  %v345_v46 = vmax.bf16 %v4831_v19, %v309_v28  ;;  %v256_v54 = vld [vmem:[%s4929_s13 + $0x100] sm:$0xff]  ;;  %v257_v55 = vld [vmem:[%s4929_s13 + $0x108] sm:$0x1]  ;;  %v226_v4 = vld [vmem:[%s4929_s13 + $0x10] sm:$0xff]  ;;  %2186 = vst.msk [vmem:[#allocation3 + $0x8] sm:$0xf] %vm2182_vm9, %v4831_v19 }
  0x21   : > { %v4143_v42 = vcombine.high %v358_v26, %v358_v26  ;;  %v4161_v44 = vcombine.high %v367_v32, %v367_v32  ;;  %660 = vst.msk [vmem:[#allocation2 + $0x48] sm:$0xf] %vm620_vm2, %v4108_v33  ;;  %v662_v45 = vsel %vm4963_vm4, %v4109_v34, %v661_v27  ;;  %v346_v51 = vmax.bf16 %v4831_v19, %v310_v29  ;;  %v224_v62 = vld [vmem:[%s4929_s13] sm:$0xff]  ;;  %v225_v3 = vld [vmem:[%s4929_s13 + $0x8] sm:$0x1]  ;;  %v230_v27 = vld [vmem:[%s4929_s13 + $0x30] sm:$0xff] }
  0x22   : > { %663 = vst [vmem:[#allocation2 + $0x4c] sm:$0x1] %v662_v45  ;;  %664 = vst.msk [vmem:[#allocation2 + $0x50] sm:$0xf] %vm620_vm2, %v4110_v40  ;;  %v666_v49 = vsel %vm4963_vm4, %v4111_v41, %v665_v35  ;;  %v308_v53 = vpack.c.bf16 %v249_v37, %v248_v36  ;;  %v4116_v57 = vcombine.low %v345_v46, %v345_v46  ;;  %v227_v5 = vld [vmem:[%s4929_s13 + $0x18] sm:$0x1] }
  0x23   : > { %v730_v50 = vsel %vm4963_vm4, %v4143_v42, %v729_v17  ;;  %667 = vst [vmem:[#allocation2 + $0x54] sm:$0x1] %v666_v49  ;;  %v766_v56 = vsel %vm4963_vm4, %v4161_v44, %v765_v39  ;;  %v4117_v58 = vcombine.high %v345_v46, %v345_v46  ;;  %v343_v60 = vmax.bf16 %v4831_v19, %v307_v38  ;;  %v673_v9 = vld [vmem:[#allocation2 + $0x64] sm:$0x1]  ;;  %v229_v12 = vld [vmem:[%s4929_s13 + $0x28] sm:$0x1]  ;;  %vm5147_vm8 = vmor %vm1006_vm6, %vm1007_vm7 }
  0x24   : > { %731 = vst [vmem:[#allocation2 + $0xd4] sm:$0x1] %v730_v50  ;;  %767 = vst [vmem:[#allocation2 + $0x11c] sm:$0x1] %v766_v56  ;;  %v4118_v63 = vcombine.low %v346_v51, %v346_v51  ;;  %v4119_v0 = vcombine.high %v346_v51, %v346_v51  ;;  %v344_v1 = vmax.bf16 %v4831_v19, %v308_v53  ;;  %v228_v11 = vld [vmem:[%s4929_s13 + $0x20] sm:$0xff]  ;;  %v234_v37 = vld [vmem:[%s4929_s13 + $0x50] sm:$0xff] }
  0x25   : > { %v311_v2 = vpack.c.bf16 %v255_v48, %v254_v47  ;;  %676 = vst.msk [vmem:[#allocation2 + $0x68] sm:$0xf] %vm620_vm2, %v4116_v57  ;;  %v678_v6 = vsel %vm4963_vm4, %v4117_v58, %v677_v52  ;;  %v4112_v7 = vcombine.low %v343_v60, %v343_v60  ;;  %v4113_v8 = vcombine.high %v343_v60, %v343_v60  ;;  %v685_v18 = vld [vmem:[#allocation2 + $0x7c] sm:$0x1]  ;;  %v689_v20 = vld [vmem:[#allocation2 + $0x84] sm:$0x1]  ;;  %vm5568_vm14 = vmor %vm2711_vm12, %vm2712_vm13 }
  0x26   : > { %v312_v10 = vpack.c.bf16 %v257_v55, %v256_v54  ;;  %679 = vst [vmem:[#allocation2 + $0x6c] sm:$0x1] %v678_v6  ;;  %680 = vst.msk [vmem:[#allocation2 + $0x70] sm:$0xf] %vm620_vm2, %v4118_v63  ;;  %v682_v13 = vsel %vm4963_vm4, %v4119_v0, %v681_v59  ;;  %v4114_v14 = vcombine.low %v344_v1, %v344_v1  ;;  %v5005_v26 = vld [vmem:[%s6184_s1 + $0x6] sm:$0x3] }
  0x27   : > { %v4115_v15 = vcombine.high %v344_v1, %v344_v1  ;;  %v347_v17 = vmax.bf16 %v4831_v19, %v311_v2  ;;  %683 = vst [vmem:[#allocation2 + $0x74] sm:$0x1] %v682_v13  ;;  %668 = vst.msk [vmem:[#allocation2 + $0x58] sm:$0xf] %vm620_vm2, %v4112_v7  ;;  %v670_v21 = vsel %vm4963_vm4, %v4113_v8, %v669_v61  ;;  %v231_v28 = vld [vmem:[%s4929_s13 + $0x38] sm:$0x1] }
  0x28   : > { %v348_v22 = vmax.bf16 %v4831_v19, %v312_v10  ;;  %v296_v23 = vpack.c.bf16 %v225_v3, %v224_v62  ;;  %v297_v25 = vpack.c.bf16 %v227_v5, %v226_v4  ;;  %671 = vst [vmem:[#allocation2 + $0x5c] sm:$0x1] %v670_v21  ;;  %672 = vst.msk [vmem:[#allocation2 + $0x60] sm:$0xf] %vm620_vm2, %v4114_v14  ;;  %v625_v33 = vld [vmem:[#allocation2 + $0x4] sm:$0x1] }
  0x29   : > { %v674_v29 = vsel %vm4963_vm4, %v4115_v15, %v673_v9  ;;  %v4120_v30 = vcombine.low %v347_v17, %v347_v17  ;;  %v4121_v31 = vcombine.high %v347_v17, %v347_v17  ;;  %v298_v32 = vpack.c.bf16 %v229_v12, %v228_v11  ;;  %v5015_v34 = vld [vmem:[%s6184_s1 + $0x8] sm:$0x3]  ;;  %v232_v35 = vld [vmem:[%s4929_s13 + $0x40] sm:$0xff]  ;;  %v629_v44 = vld [vmem:[#allocation2 + $0xc] sm:$0x1]  ;;  %s4088_s25 = sshll.u32 %s215_s16, 6 }
  0x2a   : > { %v233_v36 = vld [vmem:[%s4929_s13 + $0x48] sm:$0x1]  ;;  %675 = vst [vmem:[#allocation2 + $0x64] sm:$0x1] %v674_v29  ;;  %v4122_v39 = vcombine.low %v348_v22, %v348_v22  ;;  %v4123_v40 = vcombine.high %v348_v22, %v348_v22  ;;  %v332_v41 = vmax.bf16 %v4831_v19, %v296_v23  ;;  %v333_v42 = vmax.bf16 %v4831_v19, %v297_v25  ;;  %v633_v45 = vld [vmem:[#allocation2 + $0x14] sm:$0x1]  ;;  %vm5674_vm3 = vmand %vm2184_vm10, %vm623_vm1 }
  0x2b   : > { %v4729_v38 = vld [vmem:[#allocation2 + $0x48] ss:$8 sps:$4 sm:$0xff]   ;;  %v235_v46 = vld [vmem:[%s4929_s13 + $0x58] sm:$0x1]  ;;  %684 = vst.msk [vmem:[#allocation2 + $0x78] sm:$0xf] %vm620_vm2, %v4120_v30  ;;  %v686_v47 = vsel %vm4963_vm4, %v4121_v31, %v685_v18  ;;  %v299_v48 = vpack.c.bf16 %v231_v28, %v230_v27  ;;  %v334_v49 = vmax.bf16 %v4831_v19, %v298_v32  ;;  %v300_v7 = vpack.c.bf16 %v233_v36, %v232_v35 }
  0x2c   : > { %v5029_v50 = vsel %vm821_vm0, %v5005_v26, 0  ;;  %v5032_v51 = vld [vmem:[%s4929_s13 + $0x60] sm:$0xff]  ;;  %v5035_v52 = vld [vmem:[%s4929_s13 + $0x68] sm:$0x1]  ;;  %v5038_v53 = vld [vmem:[%s4929_s13 + $0x70] sm:$0xff]  ;;  %4475 = vmatprep.mubr.msk.bf16.mxu0 %vm808_vm5, %v4729_v38  ;;  %v690_v54 = vsel %vm4963_vm4, %v4123_v40, %v689_v20  ;;  %v4090_v55 = vcombine.low %v332_v41, %v332_v41  ;;  %v4091_v56 = vcombine.high %v332_v41, %v332_v41  ;;  %s6111_s26 = scalar_lea.vmem [#allocation4], %s4088_s25 }
  0x2d   : > { %687 = vst [vmem:[#allocation2 + $0x7c] sm:$0x1] %v686_v47  ;;  %688 = vst.msk [vmem:[#allocation2 + $0x80] sm:$0xf] %vm620_vm2, %v4122_v39  ;;  %v4092_v57 = vcombine.low %v333_v42, %v333_v42  ;;  %v637_v58 = vld [vmem:[#allocation2 + $0x1c] sm:$0x1]  ;;  %v4093_v62 = vcombine.high %v333_v42, %v333_v42  ;;  %v335_v63 = vmax.bf16 %v4831_v19, %v299_v48 }
  0x2e   : > { %v239_v59 = vld [vmem:[%s4929_s13 + $0x78] sm:$0x1]  ;;  %v260_v60 = vld [vmem:[%s4929_s13 + $0x120] sm:$0xff]  ;;  %v261_v61 = vld [vmem:[%s4929_s13 + $0x128] sm:$0x1]  ;;  %v4094_v0 = vcombine.low %v334_v49, %v334_v49  ;;  %v4095_v1 = vcombine.high %v334_v49, %v334_v49  ;;  %v626_v5 = vsel %vm4963_vm4, %v4091_v56, %v625_v33  ;;  %v5056_v6 = vsel %vm821_vm0, %v5015_v34, 0 }
  0x2f   : > { %691 = vst [vmem:[#allocation2 + $0x84] sm:$0x1] %v690_v54  ;;  %v262_v2 = vld [vmem:[%s4929_s13 + $0x130] sm:$0xff]  ;;  %v263_v3 = vld [vmem:[%s4929_s13 + $0x138] sm:$0x1]  ;;  %v301_v8 = vpack.c.bf16 %v235_v46, %v234_v37  ;;  %v264_v9 = vld [vmem:[%s4929_s13 + $0x140] sm:$0xff]  ;;  %v4096_v10 = vcombine.low %v335_v63, %v335_v63  ;;  %v4097_v11 = vcombine.high %v335_v63, %v335_v63  ;;  %v630_v12 = vsel %vm4963_vm4, %v4093_v62, %v629_v44 }
  0x30   : > { %v4730_v4 = vld [vmem:[#allocation2 + $0x68] ss:$8 sps:$4 sm:$0xff]   ;;  %621 = vst.msk [vmem:[#allocation2] sm:$0xf] %vm620_vm2, %v4090_v55  ;;  %628 = vst.msk [vmem:[#allocation2 + $0x8] sm:$0xf] %vm620_vm2, %v4092_v57  ;;  %v634_v13 = vsel %vm4963_vm4, %v4095_v1, %v633_v45  ;;  %v336_v17 = vmax.bf16 %v4831_v19, %v300_v7  ;;  %v302_v20 = vpack.c.bf16 %v5035_v52, %v5032_v51 }
  0x31   : > { %632 = vst.msk [vmem:[#allocation2 + $0x10] sm:$0xf] %vm620_vm2, %v4094_v0  ;;  %627 = vst [vmem:[#allocation2 + $0x4] sm:$0x1] %v626_v5  ;;  %v265_v14 = vld [vmem:[%s4929_s13 + $0x148] sm:$0x1]  ;;  %4479 = vmatprep.mubr.msk.bf16.mxu1 %vm808_vm5, %v4730_v4  ;;  %v337_v18 = vmax.bf16 %v4831_v19, %v301_v8  ;;  %v303_v21 = vpack.c.bf16 %v239_v59, %v5038_v53  ;;  %v638_v23 = vsel %vm4963_vm4, %v4097_v11, %v637_v58 }
  0x32   : > { %v4731_v15 = vld [vmem:[#allocation2 + $0x58] ss:$8 sps:$4 sm:$0xff]   ;;  %631 = vst [vmem:[#allocation2 + $0xc] sm:$0x1] %v630_v12  ;;  %635 = vst [vmem:[#allocation2 + $0x14] sm:$0x1] %v634_v13  ;;  %v314_v27 = vpack.c.bf16 %v261_v61, %v260_v60  ;;  %v315_v28 = vpack.c.bf16 %v263_v3, %v262_v2  ;;  %v316_v31 = vpack.c.bf16 %v265_v14, %v264_v9 }
  0x33   : > { %v641_v22 = vld [vmem:[#allocation2 + $0x24] sm:$0x1]  ;;  %636 = vst.msk [vmem:[#allocation2 + $0x18] sm:$0xf] %vm620_vm2, %v4096_v10  ;;  %v645_v25 = vld [vmem:[#allocation2 + $0x2c] sm:$0x1]  ;;  %4476 = vmatmul.mubr.msk.bf16.vlgmr.msra.gmra.mxu0 %vm808_vm5, %v4731_v15  ;;  %v4098_v32 = vcombine.low %v336_v17, %v336_v17  ;;  %v4099_v33 = vcombine.high %v336_v17, %v336_v17  ;;  %v4100_v35 = vcombine.low %v337_v18, %v337_v18 }
  0x34   : > { %v266_v29 = vld [vmem:[%s4929_s13 + $0x150] sm:$0xff]  ;;  %v267_v30 = vld [vmem:[%s4929_s13 + $0x158] sm:$0x1]  ;;  %639 = vst [vmem:[#allocation2 + $0x1c] sm:$0x1] %v638_v23  ;;  %v4101_v36 = vcombine.high %v337_v18, %v337_v18  ;;  %4494 = vmatpush3.bf16.msra.mxu0 %v4952_v24  ;;  %v338_v38 = vmax.bf16 %v4831_v19, %v302_v20  ;;  %v339_v39 = vmax.bf16 %v4831_v19, %v303_v21  ;;  %vm2505_vm1 = vcmask 64512  }
  0x35   : > { %v4732_v37 = vld [vmem:[#allocation2 + $0x78] ss:$8 sps:$4 sm:$0xff]   ;;  %v5081_v40 = vmax.bf16 %v4831_v19, %v314_v27  ;;  %v5084_v41 = vmax.bf16 %v4831_v19, %v315_v28  ;;  %4670 = vmatprep.subr.msk.bf16.mxu0 %vm821_vm0, %v5015_v34  ;;  %640 = vst.msk [vmem:[#allocation2 + $0x20] sm:$0xf] %vm620_vm2, %v4098_v32  ;;  %644 = vst.msk [vmem:[#allocation2 + $0x28] sm:$0xf] %vm620_vm2, %v4100_v35  ;;  %v642_v24 = vsel %vm4963_vm4, %v4099_v33, %v641_v22 }
  0x36   : > { %v646_v42 = vsel %vm4963_vm4, %v4101_v36, %v645_v25  ;;  %v649_v44 = vld [vmem:[#allocation2 + $0x34] sm:$0x1]  ;;  %v653_v45 = vld [vmem:[#allocation2 + $0x3c] sm:$0x1]  ;;  %v317_v46 = vpack.c.bf16 %v267_v30, %v266_v29  ;;  %v5095_v47 = vmax.bf16 %v4831_v19, %v316_v31  ;;  %4480 = vmatmul.mubr.msk.bf16.vlgmr.msra.gmra.mxu1 %vm808_vm5, %v4732_v37  ;;  %v4102_v34 = vcombine.low %v338_v38, %v338_v38  ;;  %v5126_v14 = vld [vmem:[%s6184_s1 + $0xa] sm:$0x3] }
  0x37   : > { %v4733_v48 = vld [vmem:[#allocation2] ss:$8 sps:$4 sm:$0xff]   ;;  %v4103_v49 = vcombine.high %v338_v38, %v338_v38  ;;  %v4104_v51 = vcombine.low %v339_v39, %v339_v39  ;;  %v4105_v52 = vcombine.high %v339_v39, %v339_v39  ;;  %643 = vst [vmem:[#allocation2 + $0x24] sm:$0x1] %v642_v24  ;;  %647 = vst [vmem:[#allocation2 + $0x2c] sm:$0x1] %v646_v42  ;;  %4484 = vmatpush3.bf16.msra.mxu1 %v4945_v16 }
  0x38   : > { %v990_v53 = vld [vmem:[#allocation2] sm:$0xf]  ;;  %v991_v54 = vld [vmem:[#allocation2 + $0x4] sm:$0x1]  ;;  %v4126_v55 = vcombine.low %v5081_v40, %v5081_v40  ;;  %v4127_v56 = vcombine.high %v5081_v40, %v5081_v40  ;;  %v4128_v57 = vcombine.low %v5084_v41, %v5084_v41  ;;  %v4129_v58 = vcombine.high %v5084_v41, %v5084_v41  ;;  %4485 = vmatprep.mubr.msk.bf16.mxu1 %vm808_vm5, %v4733_v48  ;;  %v992_v16 = vld [vmem:[#allocation2 + $0x8] sm:$0xf] }
  0x39   : > { %4669 = vmatprep.subr.msk.bf16.mxu1 %vm821_vm0, %v5005_v26  ;;  %v993_v59 = vld [vmem:[#allocation2 + $0xc] sm:$0x1]  ;;  %v1010_v60 = vshrl.u32 %v990_v53, 16  ;;  %v1013_v61 = vshll.u32 %v990_v53, 16  ;;  %648 = vst.msk [vmem:[#allocation2 + $0x30] sm:$0xf] %vm620_vm2, %v4102_v34  ;;  %v650_v62 = vsel %vm4963_vm4, %v4103_v49, %v649_v44  ;;  %v654_v63 = vsel %vm4963_vm4, %v4105_v52, %v653_v45 }
  0x3a   : > { %652 = vst.msk [vmem:[#allocation2 + $0x38] sm:$0xf] %vm620_vm2, %v4104_v51  ;;  %v4734_v0 = vld [vmem:[#allocation2 + $0x10] ss:$8 sps:$4 sm:$0xff]   ;;  %v1019_v1 = vshll.u32 %v991_v54, 16  ;;  %v1024_v2 = vshrl.u32 %v992_v16, 16  ;;  %v5119_v26 = vmax.bf16 %v4831_v19, %v317_v46  ;;  %v4130_v3 = vcombine.low %v5095_v47, %v5095_v47 }
  0x3b   : > { %651 = vst [vmem:[#allocation2 + $0x34] sm:$0x1] %v650_v62  ;;  %655 = vst [vmem:[#allocation2 + $0x3c] sm:$0x1] %v654_v63  ;;  %v1012_v4 = vrot.slane %v1010_v60, 4  ;;  %v1015_v5 = vrot.slane %v1013_v61, 5  ;;  %v4131_v15 = vcombine.high %v5095_v47, %v5095_v47 }
  0x3c   : > { %696 = vst.msk [vmem:[#allocation2 + $0x90] sm:$0xf] %vm620_vm2, %v4126_v55  ;;  %700 = vst.msk [vmem:[#allocation2 + $0x98] sm:$0xf] %vm620_vm2, %v4128_v57  ;;  %v1027_v7 = vshll.u32 %v992_v16, 16  ;;  %v1033_v8 = vshll.u32 %v993_v59, 16  ;;  %v4132_v17 = vcombine.low %v5119_v26, %v5119_v26  ;;  %v4133_v53 = vcombine.high %v5119_v26, %v5119_v26 }
  0x3d   : > { %v994_v9 = vld [vmem:[#allocation2 + $0x10] sm:$0xf]  ;;  %v1021_v10 = vrot.slane %v1019_v1, 5  ;;  %v1026_v11 = vrot.slane %v1024_v2, 4  ;;  %v995_v12 = vld [vmem:[#allocation2 + $0x14] sm:$0x1]  ;;  %v1016_v18 = vor.u32 %v1015_v5, %v1012_v4 }
  0x3e   : > { %v996_v13 = vld [vmem:[#allocation2 + $0x18] sm:$0xf]  ;;  %704 = vst.msk [vmem:[#allocation2 + $0xa0] sm:$0xf] %vm620_vm2, %v4130_v3  ;;  %v1029_v20 = vrot.slane %v1027_v7, 5  ;;  %v1035_v21 = vrot.slane %v1033_v8, 5  ;;  %4486 = vmatmul.mubr.msk.bf16.vlgmr.msra.gmra.mxu1 %vm808_vm5, %v4734_v0 }
  0x3f   : > { %v997_v22 = vld [vmem:[#allocation2 + $0x1c] sm:$0x1]  ;;  %v1038_v23 = vshrl.u32 %v994_v9, 16  ;;  %v5134_v25 = vld [vmem:[%s4929_s13 + $0x1b0] sm:$0xff]  ;;  %v5137_v27 = vld [vmem:[%s4929_s13 + $0x1b8] sm:$0x1]  ;;  %4504 = vmatpush3.bf16.msra.mxu1 %v5029_v50 }
  0x40   : > { %v5140_v28 = vld [vmem:[%s4929_s13 + $0x1c0] sm:$0xff]  ;;  %v5143_v29 = vld [vmem:[%s4929_s13 + $0x1c8] sm:$0x1]  ;;  %v1041_v31 = vshll.u32 %v994_v9, 16  ;;  %v1047_v32 = vshll.u32 %v995_v12, 16  ;;  %v1052_v33 = vshrl.u32 %v996_v13, 16  ;;  %v1030_v38 = vor.u32 %v1029_v20, %v1026_v11  ;;  %4671 = vmatprep.subr.msk.bf16.mxu1 %vm821_vm0, %v5126_v14 }
  0x41   : > { %v1055_v35 = vshll.u32 %v996_v13, 16  ;;  %708 = vst.msk [vmem:[#allocation2 + $0xa8] sm:$0xf] %vm620_vm2, %v4132_v17  ;;  %v5153_v36 = vld [vmem:[%s4929_s13 + $0x1d8] sm:$0x1]  ;;  %v1017_v37 = vrot.slane %v1016_v18, 4  ;;  %v323_v59 = vpack.c.bf16 %v5137_v27, %v5134_v25  ;;  %v324_v60 = vpack.c.bf16 %v5143_v29, %v5140_v28 }
  0x42   : > { %v1040_v39 = vrot.slane %v1038_v23, 4  ;;  %v1061_v24 = vshll.u32 %v997_v22, 16  ;;  %v5157_v42 = vld [vmem:[%s4929_s13 + $0x1d0] sm:$0xff]  ;;  %v1043_v44 = vrot.slane %v1041_v31, 5  ;;  %v1049_v45 = vrot.slane %v1047_v32, 5  ;;  %s4377_s30 = sshll.u32 %s4887_s22, 10 }
  0x43   : > { %v1054_v46 = vrot.slane %v1052_v33, 4  ;;  %v1057_v48 = vrot.slane %v1055_v35, 5  ;;  %v4735_v34 = vld [vmem:[#allocation2 + $0x20] ss:$8 sps:$4 sm:$0xff]   ;;  %v1022_v49 = vsel %vm5147_vm8, %v1017_v37, %v1021_v10  ;;  %v1031_v51 = vrot.slane %v1030_v38, 4  ;;  %s4022_s6 = sshll.u32 %s6111_s26, 4  ;;  %s6133_s9 = scalar_lea.hbm %s6188_s5, %s4377_s30  ;;  %s6135_s6 = int_to_ptr.vmem [resolvable:$true] %s4022_s6 }
  0x44   : > { %v1063_v52 = vrot.slane %v1061_v24, 5  ;;  %v1044_v54 = vor.u32 %v1043_v44, %v1040_v39  ;;  %4489 = vmatprep.mubr.msk.bf16.mxu1 %vm808_vm5, %v4735_v34  ;;  %v4736_v50 = vld [vmem:[#allocation2 + $0x30] ss:$8 sps:$4 sm:$0xff]   ;;  %v998_v57 = vld [vmem:[#allocation2 + $0x20] sm:$0xf]  ;;  %v325_v2 = vpack.c.bf16 %v5153_v36, %v5157_v42  ;;  %s6143_s22 = scalar_lea.sflag [#allocation5], %s215_s16 }
  0x45   : > { %v1058_v55 = vor.u32 %v1057_v48, %v1054_v46  ;;  %v999_v16 = vld [vmem:[#allocation2 + $0x24] sm:$0x1]  ;;  %v1036_v61 = vsel %vm5147_vm8, %v1031_v51, %v1035_v21  ;;  %v1000_v62 = vld [vmem:[#allocation2 + $0x28] sm:$0xf]  ;;  %v1001_v63 = vld [vmem:[#allocation2 + $0x2c] sm:$0x1] }
  0x46   : > { %v1066_v0 = vshrl.u32 %v998_v57, 16  ;;  %v1069_v1 = vshll.u32 %v998_v57, 16  ;;  %v4180_v3 = vcombine.low %v1022_v49, %v1036_v61  ;;  %v1045_v4 = vrot.slane %v1044_v54, 4  ;;  %v1002_v8 = vld [vmem:[#allocation2 + $0x30] sm:$0xf]  ;;  %4490 = vmatmul.mubr.msk.bf16.gmra.mxu1 %vm808_vm5, %v4736_v50  ;;  %v284_v46 = vld [vmem:[%s4929_s13 + $0x1e0] sm:$0xff] }
  0x47   : > { %v1059_v5 = vrot.slane %v1058_v55, 4  ;;  %v1075_v7 = vshll.u32 %v999_v16, 16  ;;  %v1080_v11 = vshrl.u32 %v1000_v62, 16  ;;  %v1083_v12 = vshll.u32 %v1000_v62, 16  ;;  %v1003_v13 = vld [vmem:[#allocation2 + $0x34] sm:$0x1] }
  0x48   : > { %v1068_v9 = vrot.slane %v1066_v0, 4  ;;  %v1071_v10 = vrot.slane %v1069_v1, 5  ;;  %4495 = vmatprep.mubr.msk.bf16.mxu0 %vm808_vm5, %v4180_v3  ;;  %v1050_v17 = vsel %vm5147_vm8, %v1045_v4, %v1049_v45  ;;  %v1089_v21 = vshll.u32 %v1001_v63, 16  ;;  %v1004_v22 = vld [vmem:[#allocation2 + $0x38] sm:$0xf]  ;;  %s4769_s10 = scalar_lea.vmem %s6135_s6, 1024 }
  0x49   : > { %v1064_v18 = vsel %vm5147_vm8, %v1059_v5, %v1063_v52  ;;  %v1077_v20 = vrot.slane %v1075_v7, 5  ;;  %v1005_v23 = vld [vmem:[#allocation2 + $0x3c] sm:$0x1]  ;;  %v1082_v28 = vrot.slane %v1080_v11, 4  ;;  %v1085_v29 = vrot.slane %v1083_v12, 5  ;;  %v270_v12 = vld [vmem:[%s4929_s13 + $0x170] sm:$0xff]  ;;  %p4770_p11 = scmp.ne.s32.totalorder %s6135_s6, %s4769_s10 }
  0x4a   : > { %v4181_v25 = vcombine.low %v1050_v17, %v1064_v18  ;;  %v1072_v27 = vor.u32 %v1071_v10, %v1068_v9  ;;  %v1091_v31 = vrot.slane %v1089_v21, 5  ;;  %v1094_v32 = vshrl.u32 %v1002_v8, 16  ;;  %v4737_v37 = vld [vmem:[#allocation2 + $0x90] ss:$8 sps:$4 sm:$0xff]   ;;  %v285_v38 = vld [vmem:[%s4929_s13 + $0x1e8] sm:$0x1] }
  0x4b   : > { %v1097_v33 = vshll.u32 %v1002_v8, 16  ;;  %v1103_v35 = vshll.u32 %v1003_v13, 16  ;;  %v1086_v24 = vor.u32 %v1085_v29, %v1082_v28  ;;  %v1108_v44 = vshrl.u32 %v1004_v22, 16  ;;  %4505 = vmatprep.mubr.msk.bf16.mxu1 %vm808_vm5, %v4737_v37  ;;  %v4738_v57 = vld [vmem:[#allocation2 + $0xa0] ss:$8 sps:$4 sm:$0xff]   ;;  %p4771_p12 = pnand %p4770_p11, %p4904_p5  ;;  %s4833_s11 = smov [#allocation4]  }
  0x4c   : > { %4496 = vmatmul.mubr.msk.bf16.vlgmr.msra.gmra.mxu0 %vm808_vm5, %v4181_v25  ;;  %v1073_v39 = vrot.slane %v1072_v27, 4  ;;  %v1111_v45 = vshll.u32 %v1004_v22, 16  ;;  %v1096_v48 = vrot.slane %v1094_v32, 4  ;;  %v1117_v51 = vshll.u32 %v1005_v23, 16  ;;  %v733_v63 = vld [vmem:[#allocation2 + $0xdc] sm:$0x1] }
  0x4d   : > { %4514 = vmatpush3.bf16.msra.mxu0 %v5056_v6  ;;  %v1099_v34 = vrot.slane %v1097_v33, 5  ;;  %v1105_v49 = vrot.slane %v1103_v35, 5  ;;  %v1087_v54 = vrot.slane %v1086_v24, 4  ;;  %v1110_v55 = vrot.slane %v1108_v44, 4  ;;  %v737_v3 = vld [vmem:[#allocation2 + $0xe4] sm:$0x1]  ;;  %p4772_p13 = pneg %p4771_p12 }
  0x4e   : > { %v1078_v52 = vsel %vm5147_vm8, %v1073_v39, %v1077_v20  ;;  %v1113_v50 = vrot.slane %v1111_v45, 5  ;;  %v1119_v61 = vrot.slane %v1117_v51, 5  ;;  %v359_v62 = vmax.bf16 %v4831_v19, %v323_v59  ;;  %v4215_v7 = vld [vmem:[%s6184_s1 + $0xc] sm:$0x3]  ;;  %v268_v59 = vld [vmem:[%s4929_s13 + $0x160] sm:$0xff]  ;;  %4506 = vmatmul.mubr.msk.bf16.vlgmr.msra.gmra.mxu1 %vm808_vm5, %v4738_v57  ;;  %v274_v25 = vld [vmem:[%s4929_s13 + $0x190] sm:$0xff] }
  0x4f   : > { %v1100_v16 = vor.u32 %v1099_v34, %v1096_v48  ;;  %v360_v6 = vmax.bf16 %v4831_v19, %v324_v60  ;;  %v1092_v0 = vsel %vm5147_vm8, %v1087_v54, %v1091_v31  ;;  %v1616_v4 = vsel %vm821_vm0, %v5126_v14, 0  ;;  %v741_v11 = vld [vmem:[#allocation2 + $0xec] sm:$0x1]  ;;  %4672 = vmatprep.subr.msk.bf16.mxu0 %vm821_vm0, %v4215_v7  ;;  %v272_v13 = vld [vmem:[%s4929_s13 + $0x180] sm:$0xff]  ;;  %v745_v21 = vld [vmem:[#allocation2 + $0xf4] sm:$0x1] }
  0x50   : > { %v1114_v1 = vor.u32 %v1113_v50, %v1110_v55  ;;  %v326_v5 = vpack.c.bf16 %v285_v38, %v284_v46  ;;  %v4182_v8 = vcombine.low %v1078_v52, %v1092_v0  ;;  %v4144_v9 = vcombine.low %v359_v62, %v359_v62  ;;  %v269_v22 = vld [vmem:[%s4929_s13 + $0x168] sm:$0x1]  ;;  %v271_v23 = vld [vmem:[%s4929_s13 + $0x178] sm:$0x1]  ;;  %4524 = vmatpush3.bf16.msra.mxu1 %v1616_v4  ;;  %v286_v31 = vld [vmem:[%s4929_s13 + $0x1f0] sm:$0xff]  ;;  %s4773_s12 = sshll.u32 %s4833_s11, 4  ;;  %s4774_s12 = int_to_ptr.vmem [resolvable:$false] %s4773_s12 }
  0x51   : > { %v1101_v60 = vrot.slane %v1100_v16, 4  ;;  %v4145_v10 = vcombine.high %v359_v62, %v359_v62  ;;  %v4146_v14 = vcombine.low %v360_v6, %v360_v6  ;;  %v4147_v18 = vcombine.high %v360_v6, %v360_v6  ;;  %v275_v29 = vld [vmem:[%s4929_s13 + $0x198] sm:$0x1]  ;;  %v288_v39 = vld [vmem:[%s4929_s13 + $0x200] sm:$0xff]  ;;  %v289_v24 = vld [vmem:[%s4929_s13 + $0x208] sm:$0x1]  ;;  %p4776_p0 = scmp.lt.s32.totalorder %s6135_s6, %s4774_s12 }
  0x52   : > { %v1115_v17 = vrot.slane %v1114_v1, 4  ;;  %v361_v20 = vmax.bf16 %v4831_v19, %v325_v2  ;;  %4499 = vmatprep.mubr.msk.bf16.mxu0 %vm808_vm5, %v4182_v8  ;;  %732 = vst.msk [vmem:[#allocation2 + $0xd8] sm:$0xf] %vm620_vm2, %v4144_v9  ;;  %v362_v36 = vmax.bf16 %v4831_v19, %v326_v5  ;;  %v5217_v42 = vsel %vm821_vm0, %v4215_v7, 0  ;;  %v273_v2 = vld [vmem:[%s4929_s13 + $0x188] sm:$0x1] }
  0x53   : > { %v1106_v27 = vsel %vm5147_vm8, %v1101_v60, %v1105_v49  ;;  %v734_v28 = vsel %vm4963_vm4, %v4145_v10, %v733_v63  ;;  %736 = vst.msk [vmem:[#allocation2 + $0xe0] sm:$0xf] %vm620_vm2, %v4146_v14  ;;  %v738_v33 = vsel %vm4963_vm4, %v4147_v18, %v737_v3  ;;  %v287_v38 = vld [vmem:[%s4929_s13 + $0x1f8] sm:$0x1]  ;;  %v318_v48 = vpack.c.bf16 %v269_v22, %v268_v59  ;;  %v290_v34 = vld [vmem:[%s4929_s13 + $0x210] sm:$0xff]  ;;  %v292_v62 = vld [vmem:[%s4929_s13 + $0x220] sm:$0xff] }
  0x54   : > { %v1120_v32 = vsel %vm5147_vm8, %v1115_v17, %v1119_v61  ;;  %735 = vst [vmem:[#allocation2 + $0xdc] sm:$0x1] %v734_v28  ;;  %v4148_v35 = vcombine.low %v361_v20, %v361_v20  ;;  %v4149_v37 = vcombine.high %v361_v20, %v361_v20  ;;  %739 = vst [vmem:[#allocation2 + $0xe4] sm:$0x1] %v738_v33  ;;  %v291_v49 = vld [vmem:[%s4929_s13 + $0x218] sm:$0x1] }
  0x55   : > { %v4183_v44 = vcombine.low %v1106_v27, %v1120_v32  ;;  %v4150_v45 = vcombine.low %v362_v36, %v362_v36  ;;  %v4151_v46 = vcombine.high %v362_v36, %v362_v36  ;;  %v319_v52 = vpack.c.bf16 %v271_v23, %v270_v12  ;;  %v5246_v6 = vld [vmem:[%s6184_s1 + $0xe] sm:$0x3]  ;;  %v749_v3 = vld [vmem:[#allocation2 + $0xfc] sm:$0x1]  ;;  %v293_v4 = vld [vmem:[%s4929_s13 + $0x228] sm:$0x1] }
  0x56   : > { %740 = vst.msk [vmem:[#allocation2 + $0xe8] sm:$0xf] %vm620_vm2, %v4148_v35  ;;  %v742_v51 = vsel %vm4963_vm4, %v4149_v37, %v741_v11  ;;  %v320_v54 = vpack.c.bf16 %v273_v2, %v272_v13  ;;  %v321_v55 = vpack.c.bf16 %v275_v29, %v274_v25  ;;  %v5240_v57 = vmax.bf16 %v4831_v19, %v318_v48  ;;  %v697_v7 = vld [vmem:[#allocation2 + $0x94] sm:$0x1]  ;;  %v753_v10 = vld [vmem:[#allocation2 + $0x104] sm:$0x1] }
  0x57   : > { %4500 = vmatmul.mubr.msk.bf16.gmra.mxu0 %vm808_vm5, %v4183_v44  ;;  %743 = vst [vmem:[#allocation2 + $0xec] sm:$0x1] %v742_v51  ;;  %744 = vst.msk [vmem:[#allocation2 + $0xf0] sm:$0xf] %vm620_vm2, %v4150_v45  ;;  %v746_v50 = vsel %vm4963_vm4, %v4151_v46, %v745_v21  ;;  %v327_v16 = vpack.c.bf16 %v287_v38, %v286_v31  ;;  %v328_v61 = vpack.c.bf16 %v289_v24, %v288_v39  ;;  %v701_v11 = vld [vmem:[#allocation2 + $0x9c] sm:$0x1] }
  0x58   : > { %747 = vst [vmem:[#allocation2 + $0xf4] sm:$0x1] %v746_v50  ;;  %v5249_v63 = vmax.bf16 %v4831_v19, %v319_v52  ;;  %v5252_v0 = vmax.bf16 %v4831_v19, %v320_v54  ;;  %v5255_v1 = vmax.bf16 %v4831_v19, %v321_v55  ;;  %v329_v5 = vpack.c.bf16 %v291_v49, %v290_v34  ;;  %v1461_v18 = vld [vmem:[#allocation2 + $0x90] sm:$0xf]  ;;  %v757_v27 = vld [vmem:[#allocation2 + $0x10c] sm:$0x1] }
  0x59   : > { %4673 = vmatprep.subr.msk.bf16.mxu1 %vm821_vm0, %v5246_v6  ;;  %v4134_v59 = vcombine.low %v5240_v57, %v5240_v57  ;;  %v4135_v8 = vcombine.high %v5240_v57, %v5240_v57  ;;  %v363_v60 = vmax.bf16 %v4831_v19, %v327_v16  ;;  %v364_v9 = vmax.bf16 %v4831_v19, %v328_v61  ;;  %v1463_v31 = vld [vmem:[#allocation2 + $0x98] sm:$0xf]  ;;  %v705_v32 = vld [vmem:[#allocation2 + $0xa4] sm:$0x1]  ;;  %v709_v33 = vld [vmem:[#allocation2 + $0xac] sm:$0x1] }
  0x5a   : > { %v4136_v12 = vcombine.low %v5249_v63, %v5249_v63  ;;  %v4137_v13 = vcombine.high %v5249_v63, %v5249_v63  ;;  %v4138_v17 = vcombine.low %v5252_v0, %v5252_v0  ;;  %v4139_v14 = vcombine.high %v5252_v0, %v5252_v0  ;;  %v4739_v20 = vld [vmem:[#allocation2 + $0xd8] ss:$8 sps:$4 sm:$0xff]   ;;  %v761_v37 = vld [vmem:[#allocation2 + $0x114] sm:$0x1]  ;;  %v5299_v45 = vld [vmem:[#allocation2 + $0xa8] sm:$0xf] }
  0x5b   : > { %712 = vst.msk [vmem:[#allocation2 + $0xb0] sm:$0xf] %vm620_vm2, %v4134_v59  ;;  %v4140_v21 = vcombine.low %v5255_v1, %v5255_v1  ;;  %v4141_v22 = vcombine.high %v5255_v1, %v5255_v1  ;;  %v4152_v23 = vcombine.low %v363_v60, %v363_v60  ;;  %v4153_v25 = vcombine.high %v363_v60, %v363_v60  ;;  %v5297_v44 = vld [vmem:[#allocation2 + $0xa0] sm:$0xf]  ;;  %v5304_v46 = vld [vmem:[%s6184_s1 + $0x10] sm:$0x3] }
  0x5c   : > { %716 = vst.msk [vmem:[#allocation2 + $0xb8] sm:$0xf] %vm620_vm2, %v4136_v12  ;;  %720 = vst.msk [vmem:[#allocation2 + $0xc0] sm:$0xf] %vm620_vm2, %v4138_v17  ;;  %v4154_v28 = vcombine.low %v364_v9, %v364_v9  ;;  %v4155_v36 = vcombine.high %v364_v9, %v364_v9  ;;  %v330_v2 = vpack.c.bf16 %v293_v4, %v292_v62  ;;  %4515 = vmatprep.mubr.msk.bf16.mxu0 %vm808_vm5, %v4739_v20  ;;  %v713_v34 = vld [vmem:[#allocation2 + $0xb4] sm:$0x1] }
  0x5d   : > { %v365_v29 = vmax.bf16 %v4831_v19, %v329_v5  ;;  %724 = vst.msk [vmem:[#allocation2 + $0xc8] sm:$0xf] %vm620_vm2, %v4140_v21  ;;  %748 = vst.msk [vmem:[#allocation2 + $0xf8] sm:$0xf] %vm620_vm2, %v4152_v23  ;;  %v750_v35 = vsel %vm4963_vm4, %v4153_v25, %v749_v3  ;;  %v698_v38 = vsel %vm4963_vm4, %v4127_v56, %v697_v7  ;;  %v1478_v24 = vshrl.u32 %v1461_v18, 16 }
  0x5e   : > { %v702_v39 = vsel %vm4963_vm4, %v4129_v58, %v701_v11  ;;  %v4740_v40 = vld [vmem:[#allocation2 + $0xe8] ss:$8 sps:$4 sm:$0xff]   ;;  %751 = vst [vmem:[#allocation2 + $0xfc] sm:$0x1] %v750_v35  ;;  %752 = vst.msk [vmem:[#allocation2 + $0x100] sm:$0xf] %vm620_vm2, %v4154_v28  ;;  %v754_v41 = vsel %vm4963_vm4, %v4155_v36, %v753_v10  ;;  %v366_v56 = vmax.bf16 %v4831_v19, %v330_v2 }
  0x5f   : > { %v4156_v58 = vcombine.low %v365_v29, %v365_v29  ;;  %v4157_v48 = vcombine.high %v365_v29, %v365_v29  ;;  %699 = vst [vmem:[#allocation2 + $0x94] sm:$0x1] %v698_v38  ;;  %703 = vst [vmem:[#allocation2 + $0x9c] sm:$0x1] %v702_v39  ;;  %v717_v49 = vld [vmem:[#allocation2 + $0xbc] sm:$0x1]  ;;  %4516 = vmatmul.mubr.msk.bf16.vlgmr.msra.gmra.mxu0 %vm808_vm5, %v4740_v40  ;;  %v706_v3 = vsel %vm4963_vm4, %v4131_v15, %v705_v32 }
  0x60   : > { %755 = vst [vmem:[#allocation2 + $0x104] sm:$0x1] %v754_v41  ;;  %v1480_v51 = vrot.slane %v1478_v24, 4  ;;  %v1481_v52 = vshll.u32 %v1461_v18, 16  ;;  %v1492_v54 = vshrl.u32 %v1463_v31, 16  ;;  %v1495_v55 = vshll.u32 %v1463_v31, 16  ;;  %4534 = vmatpush3.bf16.msra.mxu0 %v5217_v42 }
  0x61   : > { %v721_v50 = vld [vmem:[#allocation2 + $0xc4] sm:$0x1]  ;;  %v4158_v16 = vcombine.low %v366_v56, %v366_v56  ;;  %v4159_v61 = vcombine.high %v366_v56, %v366_v56  ;;  %756 = vst.msk [vmem:[#allocation2 + $0x108] sm:$0xf] %vm620_vm2, %v4156_v58  ;;  %v758_v62 = vsel %vm4963_vm4, %v4157_v48, %v757_v27  ;;  %v725_v4 = vld [vmem:[#allocation2 + $0xcc] sm:$0x1]  ;;  %v710_v9 = vsel %vm4963_vm4, %v4133_v53, %v709_v33 }
  0x62   : > { %v241_v5 = vld [vmem:[%s4929_s13 + $0x88] sm:$0x1]  ;;  %759 = vst [vmem:[#allocation2 + $0x10c] sm:$0x1] %v758_v62  ;;  %v1483_v7 = vrot.slane %v1481_v52, 5  ;;  %v1494_v59 = vrot.slane %v1492_v54, 4  ;;  %4674 = vmatprep.subr.msk.bf16.mxu0 %vm821_vm0, %v5304_v46  ;;  %v714_v17 = vsel %vm4963_vm4, %v4135_v8, %v713_v34  ;;  %v718_v18 = vsel %vm4963_vm4, %v4137_v13, %v717_v49 }
  0x63   : > { %v1497_v60 = vrot.slane %v1495_v55, 5  ;;  %707 = vst [vmem:[#allocation2 + $0xa4] sm:$0x1] %v706_v3  ;;  %v240_v10 = vld [vmem:[%s4929_s13 + $0x80] sm:$0xff]  ;;  %760 = vst.msk [vmem:[#allocation2 + $0x110] sm:$0xf] %vm620_vm2, %v4158_v16  ;;  %v762_v47 = vsel %vm4963_vm4, %v4159_v61, %v761_v37  ;;  %v722_v21 = vsel %vm4963_vm4, %v4139_v14, %v721_v50  ;;  %v726_v57 = vsel %vm4963_vm4, %v4141_v22, %v725_v4 }
  0x64   : > { %711 = vst [vmem:[#allocation2 + $0xac] sm:$0x1] %v710_v9  ;;  %v1506_v15 = vshrl.u32 %v5297_v44, 16  ;;  %v1509_v42 = vshll.u32 %v5297_v44, 16  ;;  %v1520_v11 = vshrl.u32 %v5299_v45, 16  ;;  %v1484_v12 = vor.u32 %v1483_v7, %v1480_v51 }
  0x65   : > { %v4741_v26 = vld [vmem:[#allocation2 + $0xb0] ss:$8 sps:$4 sm:$0xff]   ;;  %763 = vst [vmem:[#allocation2 + $0x114] sm:$0x1] %v762_v47  ;;  %v1498_v53 = vor.u32 %v1497_v60, %v1494_v59  ;;  %v4742_v20 = vld [vmem:[#allocation2 + $0xc0] ss:$8 sps:$4 sm:$0xff]   ;;  %v304_v8 = vpack.c.bf16 %v241_v5, %v240_v10 }
  0x66   : > { %715 = vst [vmem:[#allocation2 + $0xb4] sm:$0x1] %v714_v17  ;;  %719 = vst [vmem:[#allocation2 + $0xbc] sm:$0x1] %v718_v18  ;;  %4509 = vmatprep.mubr.msk.bf16.mxu1 %vm808_vm5, %v4741_v26  ;;  %v4743_v63 = vld [vmem:[#allocation2 + $0xf8] ss:$8 sps:$4 sm:$0xff]  }
  0x67   : > { %v1462_v13 = vld [vmem:[#allocation2 + $0x94] sm:$0x1]  ;;  %723 = vst [vmem:[#allocation2 + $0xc4] sm:$0x1] %v722_v21  ;;  %727 = vst [vmem:[#allocation2 + $0xcc] sm:$0x1] %v726_v57  ;;  %4510 = vmatmul.mubr.msk.bf16.gmra.mxu1 %vm808_vm5, %v4742_v20  ;;  %4519 = vmatprep.mubr.msk.bf16.mxu0 %vm808_vm5, %v4743_v63  ;;  %v5362_v33 = vmax.bf16 %v4831_v19, %v304_v8 }
  0x68   : > { %v1464_v23 = vld [vmem:[#allocation2 + $0x9c] sm:$0x1]  ;;  %v1485_v0 = vrot.slane %v1484_v12, 4  ;;  %v1487_v25 = vshll.u32 %v1462_v13, 16  ;;  %v1508_v27 = vrot.slane %v1506_v15, 4  ;;  %v1499_v1 = vrot.slane %v1498_v53, 4 }
  0x69   : > { %v4745_v14 = vld [vmem:[#allocation2 + $0x8] ss:$8 sps:$4 sm:$0xff]   ;;  %v1501_v28 = vshll.u32 %v1464_v23, 16  ;;  %v1511_v36 = vrot.slane %v1509_v42, 5  ;;  %v1523_v22 = vshll.u32 %v5299_v45, 16  ;;  %v1522_v31 = vrot.slane %v1520_v11, 4 }
  0x6a   : > { %v1489_v2 = vrot.slane %v1487_v25, 5  ;;  %v1466_v29 = vld [vmem:[#allocation2 + $0xa4] sm:$0x1]  ;;  %v1854_v32 = vsel %vm821_vm0, %v5246_v6, 0  ;;  %v4744_v35 = vld [vmem:[#allocation2 + $0x108] ss:$8 sps:$4 sm:$0xff]   ;;  %v4106_v56 = vcombine.low %v5362_v33, %v5362_v33 }
  0x6b   : > { %v1503_v37 = vrot.slane %v1501_v28, 5  ;;  %v1512_v38 = vor.u32 %v1511_v36, %v1508_v27  ;;  %v1515_v39 = vshll.u32 %v1466_v29, 16  ;;  %v1468_v44 = vld [vmem:[#allocation2 + $0xac] sm:$0x1]  ;;  %v1525_v40 = vrot.slane %v1523_v22, 5  ;;  %4520 = vmatmul.mubr.msk.bf16.gmra.mxu0 %vm808_vm5, %v4744_v35 }
  0x6c   : > { %v1490_v24 = vsel %vm5147_vm8, %v1485_v0, %v1489_v2  ;;  %v2084_v45 = vsel %vm821_vm0, %v5304_v46, 0  ;;  %v1469_v41 = vld [vmem:[#allocation2 + $0xb0] sm:$0xf]  ;;  %v1529_v34 = vshll.u32 %v1468_v44, 16  ;;  %4535 = vmatprep.mubr.msk.bf16.mxu0 %vm808_vm5, %v4745_v14  ;;  %v1471_v54 = vld [vmem:[#allocation2 + $0xb8] sm:$0xf] }
  0x6d   : > { %v1504_v6 = vsel %vm5147_vm8, %v1499_v1, %v1503_v37  ;;  %v1513_v58 = vrot.slane %v1512_v38, 4  ;;  %v1517_v48 = vrot.slane %v1515_v39, 5  ;;  %v1470_v49 = vld [vmem:[#allocation2 + $0xb4] sm:$0x1]  ;;  %v1526_v52 = vor.u32 %v1525_v40, %v1522_v31  ;;  %v1472_v55 = vld [vmem:[#allocation2 + $0xbc] sm:$0x1] }
  0x6e   : > { %v4207_v51 = vcombine.low %v1490_v24, %v1504_v6  ;;  %v1534_v46 = vshrl.u32 %v1469_v41, 16  ;;  %v1537_v50 = vshll.u32 %v1469_v41, 16  ;;  %656 = vst.msk [vmem:[#allocation2 + $0x40] sm:$0xf] %vm620_vm2, %v4106_v56  ;;  %v1531_v61 = vrot.slane %v1529_v34, 5 }
  0x6f   : > { %v1518_v16 = vsel %vm5147_vm8, %v1513_v58, %v1517_v48  ;;  %v4746_v62 = vld [vmem:[#allocation2 + $0x18] ss:$8 sps:$4 sm:$0xff]   ;;  %v1543_v3 = vshll.u32 %v1470_v49, 16  ;;  %v1548_v4 = vshrl.u32 %v1471_v54, 16  ;;  %v1527_v7 = vrot.slane %v1526_v52, 4 }
  0x70   : > { %v1473_v5 = vld [vmem:[#allocation2 + $0xc0] sm:$0xf]  ;;  %4525 = vmatprep.mubr.msk.bf16.mxu1 %vm808_vm5, %v4207_v51  ;;  %v1536_v59 = vrot.slane %v1534_v46, 4  ;;  %v1539_v60 = vrot.slane %v1537_v50, 5  ;;  %v1551_v9 = vshll.u32 %v1471_v54, 16  ;;  %v1557_v42 = vshll.u32 %v1472_v55, 16 }
  0x71   : > { %v1474_v10 = vld [vmem:[#allocation2 + $0xc4] sm:$0x1]  ;;  %v1545_v47 = vrot.slane %v1543_v3, 5  ;;  %v1550_v15 = vrot.slane %v1548_v4, 4  ;;  %v1475_v11 = vld [vmem:[#allocation2 + $0xc8] sm:$0xf]  ;;  %v1532_v12 = vsel %vm5147_vm8, %v1527_v7, %v1531_v61 }
  0x72   : > { %v1562_v26 = vshrl.u32 %v1473_v5, 16  ;;  %v1540_v53 = vor.u32 %v1539_v60, %v1536_v59  ;;  %v1553_v17 = vrot.slane %v1551_v9, 5  ;;  %v1476_v18 = vld [vmem:[#allocation2 + $0xcc] sm:$0x1]  ;;  %v1565_v20 = vshll.u32 %v1473_v5, 16  ;;  %v258_v3 = vld [vmem:[%s4929_s13 + $0x110] sm:$0xff] }
  0x73   : > { %v4208_v21 = vcombine.low %v1518_v16, %v1532_v12  ;;  %v1559_v57 = vrot.slane %v1557_v42, 5  ;;  %v1571_v63 = vshll.u32 %v1474_v10, 16  ;;  %v4747_v13 = vld [vmem:[#allocation2 + $0x28] ss:$8 sps:$4 sm:$0xff]   ;;  %v1576_v27 = vshrl.u32 %v1475_v11, 16  ;;  %4536 = vmatmul.mubr.msk.bf16.vlgmr.msra.gmra.mxu0 %vm808_vm5, %v4746_v62 }
  0x74   : > { %v1564_v8 = vrot.slane %v1562_v26, 4  ;;  %v1541_v23 = vrot.slane %v1540_v53, 4  ;;  %v1554_v0 = vor.u32 %v1553_v17, %v1550_v15  ;;  %v1567_v25 = vrot.slane %v1565_v20, 5  ;;  %4554 = vmatpush3.bf16.msra.mxu0 %v2084_v45  ;;  %4539 = vmatprep.mubr.msk.bf16.mxu0 %vm808_vm5, %v4747_v13  ;;  %v1929_v38 = vld [vmem:[#allocation2 + $0x8] sm:$0xf] }
  0x75   : > { %4526 = vmatmul.mubr.msk.bf16.vlgmr.msra.gmra.mxu1 %vm808_vm5, %v4208_v21  ;;  %v1573_v14 = vrot.slane %v1571_v63, 5  ;;  %v1579_v1 = vshll.u32 %v1475_v11, 16  ;;  %v1585_v28 = vshll.u32 %v1476_v18, 16  ;;  %v1578_v29 = vrot.slane %v1576_v27, 4  ;;  %v4748_v37 = vld [vmem:[#allocation2 + $0x38] ss:$8 sps:$4 sm:$0xff]  }
  0x76   : > { %4544 = vmatpush3.bf16.msra.mxu1 %v1854_v32  ;;  %v1546_v36 = vsel %vm5147_vm8, %v1541_v23, %v1545_v47  ;;  %v1555_v22 = vrot.slane %v1554_v0, 4  ;;  %v1568_v2 = vor.u32 %v1567_v25, %v1564_v8  ;;  %v1930_v44 = vld [vmem:[#allocation2 + $0xc] sm:$0x1]  ;;  %v1931_v40 = vld [vmem:[#allocation2 + $0x10] sm:$0xf]  ;;  %v1946_v32 = vshrl.u32 %v1929_v38, 16 }
  0x77   : > { %v1581_v31 = vrot.slane %v1579_v1, 5  ;;  %v1587_v35 = vrot.slane %v1585_v28, 5  ;;  %v1932_v56 = vld [vmem:[#allocation2 + $0x14] sm:$0x1]  ;;  %v1949_v6 = vshll.u32 %v1929_v38, 16  ;;  %v1955_v58 = vshll.u32 %v1930_v44, 16 }
  0x78   : > { %v1560_v39 = vsel %vm5147_vm8, %v1555_v22, %v1559_v57  ;;  %v1569_v24 = vrot.slane %v1568_v2, 4  ;;  %v1933_v48 = vld [vmem:[#allocation2 + $0x18] sm:$0xf]  ;;  %v1948_v49 = vrot.slane %v1946_v32, 4  ;;  %v1960_v51 = vshrl.u32 %v1931_v40, 16 }
  0x79   : > { %v4209_v45 = vcombine.low %v1546_v36, %v1560_v39  ;;  %v1582_v41 = vor.u32 %v1581_v31, %v1578_v29  ;;  %v1963_v52 = vshll.u32 %v1931_v40, 16  ;;  %v1934_v54 = vld [vmem:[#allocation2 + $0x1c] sm:$0x1]  ;;  %v4749_v46 = vld [vmem:[#allocation2 + $0x50] ss:$8 sps:$4 sm:$0xff]   ;;  %v1951_v50 = vrot.slane %v1949_v6, 5 }
  0x7a   : > { %v1574_v34 = vsel %vm5147_vm8, %v1569_v24, %v1573_v14  ;;  %v1957_v16 = vrot.slane %v1955_v58, 5  ;;  %v1969_v61 = vshll.u32 %v1932_v56, 16  ;;  %v1935_v62 = vld [vmem:[#allocation2 + $0x20] sm:$0xf]  ;;  %v1962_v4 = vrot.slane %v1960_v51, 4 }
  0x7b   : > { %4529 = vmatprep.mubr.msk.bf16.mxu1 %vm808_vm5, %v4209_v45  ;;  %v1583_v55 = vrot.slane %v1582_v41, 4  ;;  %v1965_v5 = vrot.slane %v1963_v52, 5  ;;  %v1936_v7 = vld [vmem:[#allocation2 + $0x24] sm:$0x1]  ;;  %v1974_v59 = vshrl.u32 %v1933_v48, 16  ;;  %v1977_v60 = vshll.u32 %v1933_v48, 16  ;;  %4540 = vmatmul.mubr.msk.bf16.gmra.mxu0 %vm808_vm5, %v4748_v37 }
  0x7c   : > { %v1952_v10 = vor.u32 %v1951_v50, %v1948_v49  ;;  %v1971_v47 = vrot.slane %v1969_v61, 5  ;;  %v1983_v15 = vshll.u32 %v1934_v54, 16  ;;  %v259_v53 = vld [vmem:[%s4929_s13 + $0x118] sm:$0x1]  ;;  %v1988_v20 = vshrl.u32 %v1935_v62, 16  ;;  %s4775_s13 = scalar_lea.vmem %s4774_s12, 2048 }
  0x7d   : > { %v1588_v9 = vsel %vm5147_vm8, %v1583_v55, %v1587_v35  ;;  %v1966_v11 = vor.u32 %v1965_v5, %v1962_v4  ;;  %v1976_v26 = vrot.slane %v1974_v59, 4  ;;  %v1979_v12 = vrot.slane %v1977_v60, 5  ;;  %v1937_v23 = vld [vmem:[#allocation2 + $0x28] sm:$0xf]  ;;  %v1938_v1 = vld [vmem:[#allocation2 + $0x2c] sm:$0x1]  ;;  %p4777_p1 = scmp.lt.s32.totalorder %s4775_s13, %s4769_s10 }
  0x7e   : > { %v4210_v42 = vcombine.low %v1574_v34, %v1588_v9  ;;  %v1953_v17 = vrot.slane %v1952_v10, 4  ;;  %v1985_v18 = vrot.slane %v1983_v15, 5  ;;  %v1991_v21 = vshll.u32 %v1935_v62, 16  ;;  %v4750_v28 = vld [vmem:[#allocation2 + $0x60] ss:$8 sps:$4 sm:$0xff]  }
  0x7f   : > { %v1967_v57 = vrot.slane %v1966_v11, 4  ;;  %v1980_v8 = vor.u32 %v1979_v12, %v1976_v26  ;;  %v1997_v63 = vshll.u32 %v1936_v7, 16  ;;  %v313_v13 = vpack.c.bf16 %v259_v53, %v258_v3  ;;  %v693_v31 = vld [vmem:[#allocation2 + $0x8c] sm:$0x1]  ;;  %v1939_v35 = vld [vmem:[#allocation2 + $0x30] sm:$0xf]  ;;  %p4778_p2 = por %p4777_p1, %p4776_p0 }
  0x80   : > { %4530 = vmatmul.mubr.msk.bf16.gmra.mxu1 %vm808_vm5, %v4210_v42  ;;  %v4107_v0 = vcombine.high %v5362_v33, %v5362_v33  ;;  %v1958_v25 = vsel %vm5147_vm8, %v1953_v17, %v1957_v16  ;;  %v1990_v27 = vrot.slane %v1988_v20, 4  ;;  %v1993_v14 = vrot.slane %v1991_v21, 5  ;;  %v4751_v38 = vld [vmem:[#allocation2 + $0x70] ss:$8 sps:$4 sm:$0xff]   ;;  %v1940_v39 = vld [vmem:[#allocation2 + $0x34] sm:$0x1] }
  0x81   : > { %4545 = vmatprep.mubr.msk.bf16.mxu1 %vm808_vm5, %v4749_v46  ;;  %v1972_v36 = vsel %vm5147_vm8, %v1967_v57, %v1971_v47  ;;  %v1981_v22 = vrot.slane %v1980_v8, 4  ;;  %v1999_v2 = vrot.slane %v1997_v63, 5  ;;  %v349_v29 = vmax.bf16 %v4831_v19, %v313_v13  ;;  %v657_v40 = vld [vmem:[#allocation2 + $0x44] sm:$0x1]  ;;  %v1941_v6 = vld [vmem:[#allocation2 + $0x38] sm:$0xf]  ;;  %p4779_p3 = pnand %p4778_p2, %p4772_p13 }
  0x82   : > { %v4234_v37 = vcombine.low %v1958_v25, %v1972_v36  ;;  %v1994_v33 = vor.u32 %v1993_v14, %v1990_v27  ;;  %v2002_v24 = vshrl.u32 %v1937_v23, 16  ;;  %v2005_v44 = vshll.u32 %v1937_v23, 16  ;;  %v1942_v51 = vld [vmem:[#allocation2 + $0x3c] sm:$0x1]  ;;  %v1943_v46 = vld [vmem:[#allocation2 + $0x40] sm:$0xf] }
  0x83   : > { %v1986_v32 = vsel %vm5147_vm8, %v1981_v22, %v1985_v18  ;;  %v4124_v45 = vcombine.low %v349_v29, %v349_v29  ;;  %v4125_v41 = vcombine.high %v349_v29, %v349_v29  ;;  %v2011_v56 = vshll.u32 %v1938_v1, 16  ;;  %2187 = vst.msk [vmem:[#allocation3 + $0xc] sm:$0x1] %vm2184_vm10, %v4831_v19  ;;  %2189 = vst.msk [vmem:[#allocation3 + $0x14] sm:$0x1] %vm2184_vm10, %v4831_v19 }
  0x84   : > { %4555 = vmatprep.mubr.msk.bf16.mxu0 %vm808_vm5, %v4234_v37  ;;  %v1995_v58 = vrot.slane %v1994_v33, 4  ;;  %v2004_v48 = vrot.slane %v2002_v24, 4  ;;  %v2007_v34 = vrot.slane %v2005_v44, 5  ;;  %v2016_v49 = vshrl.u32 %v1939_v35, 16  ;;  %2188 = vst.msk [vmem:[#allocation3 + $0x10] sm:$0xf] %vm2182_vm9, %v4831_v19 }
  0x85   : > { %692 = vst.msk [vmem:[#allocation2 + $0x88] sm:$0xf] %vm620_vm2, %v4124_v45  ;;  %v694_v52 = vsel %vm4963_vm4, %v4125_v41, %v693_v31  ;;  %v2019_v54 = vshll.u32 %v1939_v35, 16  ;;  %v2025_v55 = vshll.u32 %v1940_v39, 16  ;;  %v658_v62 = vsel %vm4963_vm4, %v4107_v0, %v657_v40  ;;  %v2370_v36 = vld [vmem:[%s6186_s3] sm:$0xf] }
  0x86   : > { %v2000_v50 = vsel %vm5147_vm8, %v1995_v58, %v1999_v2  ;;  %695 = vst [vmem:[#allocation2 + $0x8c] sm:$0x1] %v694_v52  ;;  %v2008_v16 = vor.u32 %v2007_v34, %v2004_v48  ;;  %v2018_v61 = vrot.slane %v2016_v49, 4  ;;  %v2013_v4 = vrot.slane %v2011_v56, 5  ;;  %659 = vst [vmem:[#allocation2 + $0x44] sm:$0x1] %v658_v62  ;;  %4676 = vmatprep.subr.msk.bf16.mxu0 %vm2518_vm11, %v2370_v36 }
  0x87   : > { %v4235_v3 = vcombine.low %v1986_v32, %v2000_v50  ;;  %v2021_v5 = vrot.slane %v2019_v54, 5  ;;  %v2030_v7 = vshrl.u32 %v1941_v6, 16  ;;  %v2027_v60 = vrot.slane %v2025_v55, 5  ;;  %2192 = vst.msk [vmem:[#allocation3 + $0x20] sm:$0xf] %vm2182_vm9, %v4831_v19 }
  0x88   : > { %4546 = vmatmul.mubr.msk.bf16.vlgmr.msra.gmra.mxu1 %vm808_vm5, %v4750_v28  ;;  %v2009_v59 = vrot.slane %v2008_v16, 4  ;;  %v2033_v9 = vshll.u32 %v1941_v6, 16  ;;  %v2044_v10 = vshrl.u32 %v1943_v46, 16  ;;  %v2039_v42 = vshll.u32 %v1942_v51, 16  ;;  %2193 = vst.msk [vmem:[#allocation3 + $0x24] sm:$0x1] %vm2184_vm10, %v4831_v19 }
  0x89   : > { %4549 = vmatprep.mubr.msk.bf16.mxu1 %vm808_vm5, %v4751_v38  ;;  %4556 = vmatmul.mubr.msk.bf16.vlgmr.msra.gmra.mxu0 %vm808_vm5, %v4235_v3  ;;  %v2022_v47 = vor.u32 %v2021_v5, %v2018_v61  ;;  %v2032_v15 = vrot.slane %v2030_v7, 4  ;;  %v2047_v43 = vshll.u32 %v1943_v46, 16  ;;  %2194 = vst.msk [vmem:[#allocation3 + $0x28] sm:$0xf] %vm2182_vm9, %v4831_v19  ;;  %2196 = vst.msk [vmem:[#allocation3 + $0x30] sm:$0xf] %vm2182_vm9, %v4831_v19 }
  0x8a   : > { %v2035_v11 = vrot.slane %v2033_v9, 5  ;;  %v2046_v26 = vrot.slane %v2044_v10, 4  ;;  %v2014_v12 = vsel %vm5147_vm8, %v2009_v59, %v2013_v4  ;;  %v2041_v57 = vrot.slane %v2039_v42, 5  ;;  %2195 = vst.msk [vmem:[#allocation3 + $0x2c] sm:$0x1] %vm2184_vm10, %v4831_v19 }
  0x8b   : > { %v2023_v53 = vrot.slane %v2022_v47, 4  ;;  %v2049_v17 = vrot.slane %v2047_v43, 5  ;;  %2197 = vst.msk [vmem:[#allocation3 + $0x34] sm:$0x1] %vm2184_vm10, %v4831_v19  ;;  %2199 = vst.msk [vmem:[#allocation3 + $0x3c] sm:$0x1] %vm2184_vm10, %v4831_v19 }
  0x8c   : > { %v4752_v18 = vld [vmem:[#allocation2 + $0x80] ss:$8 sps:$4 sm:$0xff]   ;;  %v2036_v20 = vor.u32 %v2035_v11, %v2032_v15  ;;  %2198 = vst.msk [vmem:[#allocation3 + $0x38] sm:$0xf] %vm2182_vm9, %v4831_v19  ;;  %2200 = vst.msk [vmem:[#allocation3 + $0x40] sm:$0xf] %vm2182_vm9, %v4831_v19 }
  0x8d   : > { %v2028_v21 = vsel %vm5147_vm8, %v2023_v53, %v2027_v60  ;;  %v2050_v8 = vor.u32 %v2049_v17, %v2046_v26  ;;  %v1944_v13 = vld [vmem:[#allocation2 + $0x44] sm:$0x1]  ;;  %2201 = vst.msk [vmem:[#allocation3 + $0x44] sm:$0x1] %vm2184_vm10, %v4831_v19  ;;  %2203 = vst.msk [vmem:[#allocation3 + $0x4c] sm:$0x1] %vm2184_vm10, %v4831_v19 }
  0x8e   : > { %v4236_v63 = vcombine.low %v2014_v12, %v2028_v21  ;;  %v2037_v23 = vrot.slane %v2036_v20, 4  ;;  %v2053_v25 = vshll.u32 %v1944_v13, 16  ;;  %2202 = vst.msk [vmem:[#allocation3 + $0x48] sm:$0xf] %vm2182_vm9, %v4831_v19  ;;  %v2620_v22 = vsel %vm2518_vm11, %v2370_v36, 0 }
  0x8f   : > { %v2051_v0 = vrot.slane %v2050_v8, 4  ;;  %v4251_v2 = vld [vmem:[%s6186_s3 + $0x4] sm:$0xf]  ;;  %4574 = vmatpush3.bf16.msra.mxu0 %v2620_v22  ;;  %v5481_v19 = vld [vmem:[%s6186_s3 + $0x8] sm:$0xf] }
  0x90   : > { %4550 = vmatmul.mubr.msk.bf16.gmra.mxu1 %vm808_vm5, %v4752_v18  ;;  %4559 = vmatprep.mubr.msk.bf16.mxu0 %vm808_vm5, %v4236_v63  ;;  %v2042_v27 = vsel %vm5147_vm8, %v2037_v23, %v2041_v57  ;;  %v2055_v14 = vrot.slane %v2053_v25, 5  ;;  %v2520_v29 = vsel %vm2518_vm11, %v4251_v2, 0  ;;  %v5488_v31 = vld [vmem:[%s6186_s3 + $0xc] sm:$0xf]  ;;  %v5528_v43 = vld [vmem:[#allocation3] sm:$0xf] }
  0x91   : > { %4675 = vmatprep.subr.msk.bf16.mxu1 %vm2518_vm11, %v4251_v2  ;;  %4678 = vmatprep.subr.msk.bf16.mxu0 %vm2518_vm11, %v5488_v31  ;;  %6196 = vst [vmem:[#allocation7_spill] sm:$0xff] %v5528_v43  ;;  %v2380_v53 = vshrl.u32 %v5528_v43, 16  ;;  %v2383_v17 = vshll.u32 %v5528_v43, 16  ;;  %vm2310_vm15 = vsmask.f32 7938 }
  0x92   : > { %v2056_v1 = vsel %vm5147_vm8, %v2051_v0, %v2055_v14  ;;  %4564 = vmatpush3.bf16.msra.mxu1 %v2520_v29  ;;  %vm5681_vm4 = vmand %vm2182_vm9, %vm2310_vm15 }
  0x93   : > { %v4237_v28 = vcombine.low %v2042_v27, %v2056_v1  ;;  %4677 = vmatprep.subr.msk.bf16.mxu1 %vm2518_vm11, %v5481_v19  ;;  %v2382_v63 = vrot.slane %v2380_v53, 4  ;;  %v2385_v13 = vrot.slane %v2383_v17, 5 }
  0x95   : > { %4560 = vmatmul.mubr.msk.bf16.gmra.mxu0 %vm808_vm5, %v4237_v28  ;;  %v2371_v28 = vld [vmem:[#allocation3 + $0x4] sm:$0x1]  ;;  %v2386_v36 = vor.u32 %v2385_v13, %v2382_v63 }
  0x96   : > { %v2389_v2 = vshll.u32 %v2371_v28, 16 }
  0xf3   : > { %v4477_v33 = vpop.f32.mrf.mxu0 }
  0xf5   : > { %v859_v24 = vpop.f32.mrf.mxu0 }
  0xf6   : > { %v5492_v35 = vpop.f32.mrf.mxu1 }
  0xf7   : > { %v4478_v32 = vpop.f32.mrf.mxu0 }
  0xf8   : > { %v5494_v37 = vpop.f32.mrf.mxu1 }
  0xf9   : > { %v862_v56 = vpop.f32.mrf.mxu0 }
  0xfa   : > { %v5496_v38 = vpop.f32.mrf.mxu1 }
  0xfc   : > { %v5498_v39 = vpop.f32.mrf.mxu1 }
  0xfe   : > { %v4487_v44 = vpop.f32.mrf.mxu1 }
  0xff   : > { %v968_v21 = vadd.f32 %v4487_v44, %v4477_v33 }
 0x100   : > { %v959_v40 = vpop.f32.mrf.mxu1 }
 0x101   : > { %v960_v23 = vadd.f32 %v959_v40, %v859_v24  ;;  %v5548_v40 = vrot.slane %v2386_v36, 4 }
 0x102   : > { %v4488_v45 = vpop.f32.mrf.mxu1 }
 0x103   : > { %v971_v14 = vadd.f32 %v4488_v45, %v4478_v32  ;;  %v5552_v32 = vrot.slane %v2389_v2, 5 }
 0x104   : > { %v962_v41 = vpop.f32.mrf.mxu1 }
 0x105   : > { %v963_v43 = vadd.f32 %v962_v41, %v862_v56  ;;  %v2716_v56 = vrot.slane %v2371_v28, 5 }
 0x106   : > { %v5500_v6 = vpop.f32.mrf.mxu1 }
 0x108   : > { %v5502_v48 = vpop.f32.mrf.mxu1 }
 0x10a   : > { %v5504_v49 = vpop.f32.mrf.mxu1 }
 0x10c   : > { %v4497_v58 = vpop.f32.mrf.mxu0  ;;  %v5506_v52 = vpop.f32.mrf.mxu1 }
 0x10d   : > { %v1217_v27 = vadd.f32 %v4497_v58, %v968_v21 }
 0x10e   : > { %v1184_v34 = vpop.f32.mrf.mxu0  ;;  %v4507_v55 = vpop.f32.mrf.mxu1 }
 0x10f   : > { %v1215_v29 = vadd.f32 %v1184_v34, %v960_v23  ;;  %v1336_v33 = vadd.f32 %v4507_v55, %v1217_v27  ;;  %v984_v55 = vadd.f32 %v5500_v6, %v5492_v35  ;;  %v2392_v6 = vsel %vm5147_vm8, %v5548_v40, %v5552_v32 }
 0x110   : > { %v4498_v51 = vpop.f32.mrf.mxu0  ;;  %v1303_v16 = vpop.f32.mrf.mxu1 }
 0x111   : > { %v1218_v53 = vadd.f32 %v4498_v51, %v971_v14  ;;  %v1334_v17 = vadd.f32 %v1303_v16, %v1215_v29  ;;  %v976_v51 = vadd.f32 %v5502_v48, %v5494_v37 }
 0x112   : > { %v1187_v54 = vpop.f32.mrf.mxu0  ;;  %v4508_v3 = vpop.f32.mrf.mxu1 }
 0x113   : > { %v1216_v21 = vadd.f32 %v1187_v54, %v963_v43  ;;  %v1337_v41 = vadd.f32 %v4508_v3, %v1218_v53  ;;  %v3884_v43 = vlaneseq }
 0x114   : > { %v1306_v7 = vpop.f32.mrf.mxu1 }
 0x115   : > { %v1335_v23 = vadd.f32 %v1306_v7, %v1216_v21  ;;  %v3885_v53 = vshrl.u32 %v3884_v43, 7 }
 0x117   : > { %v5508_v46 = vpop.f32.mrf.mxu0 }
 0x119   : > { %v5510_v50 = vpop.f32.mrf.mxu0 }
 0x11b   : > { %v5512_v61 = vpop.f32.mrf.mxu0 }
 0x11d   : > { %v5514_v62 = vpop.f32.mrf.mxu0 }
 0x11f   : > { %v4517_v4 = vpop.f32.mrf.mxu0 }
 0x120   : > { %v1455_v34 = vadd.f32 %v4517_v4, %v1336_v33  ;;  %v979_v4 = vadd.f32 %v5506_v52, %v5498_v39  ;;  %v5601_v39 = vld [vmem:[%s6186_s3 + $0x14] sm:$0xf] }
 0x121   : > { %v1422_v5 = vpop.f32.mrf.mxu0  ;;  %v5634_v33 = vsel %vm2518_vm11, %v5601_v39, 0 }
 0x122   : > { %v1453_v13 = vadd.f32 %v1422_v5, %v1334_v17 }
 0x123   : > { %v4518_v59 = vpop.f32.mrf.mxu0 }
 0x124   : > { %v1456_v35 = vadd.f32 %v4518_v59, %v1337_v41  ;;  %v5591_v59 = vld [vmem:[%s6186_s3 + $0x10] sm:$0xf] }
 0x125   : > { %v5518_v9 = vpop.f32.mrf.mxu0 }
 0x127   : > { %v5516_v60 = vpop.f32.mrf.mxu1 }
 0x129   : > { %v5520_v10 = vpop.f32.mrf.mxu1 }
 0x12b   : > { %v5522_v47 = vpop.f32.mrf.mxu0  ;;  %v5524_v15 = vpop.f32.mrf.mxu1 }
 0x12d   : > { %v5526_v42 = vpop.f32.mrf.mxu0  ;;  %v5532_v26 = vpop.f32.mrf.mxu1 }
 0x12f   : > { %v5530_v11 = vpop.f32.mrf.mxu0 }
 0x131   : > { %v5534_v12 = vpop.f32.mrf.mxu0 }
 0x132   : > { %6197 = vst [vmem:[#allocation8_spill] sm:$0xff] %v5534_v12  ;;  %v2687_v12 = vld [vmem:[#allocation3] sm:$0xe] }
 0x133   : > { %v4537_v20 = vpop.f32.mrf.mxu0  ;;  %v4268_v45 = vrot.slane %v2687_v12, 9  ;;  %v987_v12 = vadd.f32 %v5504_v49, %v5496_v38  ;;  %v1221_v38 = vadd.f32 %v5508_v46, %v984_v55  ;;  %v1219_v49 = vadd.f32 %v5510_v50, %v976_v51 }
 0x134   : > { %v5596_v46 = vsel %vm2518_vm11, %v5481_v19, 0  ;;  %v5613_v19 = vld [vmem:[%s6186_s3 + $0x18] sm:$0xf] }
 0x135   : > { %v4527_v18 = vpop.f32.mrf.mxu1  ;;  %v5538_v8 = vpop.f32.mrf.mxu0  ;;  %v5578_v48 = vsel %vm5568_vm14, %v4268_v45, %v2716_v56  ;;  %v1222_v52 = vadd.f32 %v5512_v61, %v987_v12  ;;  %v1340_v50 = vadd.f32 %v5516_v60, %v1221_v38  ;;  %v1338_v28 = vadd.f32 %v5520_v10, %v1219_v49  ;;  %v5623_v60 = vld [vmem:[%s6186_s3 + $0x1c] sm:$0xf]  ;;  %v5650_v12 = vld [vmem:[#allocation3 + $0x48] sm:$0xf] }
 0x136   : > { %v1685_v27 = vadd.f32 %v4527_v18, %v1455_v34  ;;  %v1454_v18 = vadd.f32 %v5518_v9, %v1335_v23  ;;  %v5608_v9 = vsel %vm2518_vm11, %v5488_v31, 0  ;;  %v5618_v61 = vsel %vm2518_vm11, %v5591_v59, 0 }
 0x137   : > { %v1652_v57 = vpop.f32.mrf.mxu1  ;;  %v5540_v25 = vpop.f32.mrf.mxu0  ;;  %v1220_v31 = vadd.f32 %v5514_v62, %v979_v4  ;;  %v1341_v10 = vadd.f32 %v5524_v15, %v1222_v52  ;;  %v5639_v62 = vsel %vm2518_vm11, %v5613_v19, 0  ;;  %v1459_v15 = vadd.f32 %v5522_v47, %v1340_v50 }
 0x138   : > { %v1683_v37 = vadd.f32 %v1652_v57, %v1453_v13  ;;  %v1804_v57 = vadd.f32 %v4537_v20, %v1685_v27  ;;  %v1457_v34 = vadd.f32 %v5526_v42, %v1338_v28  ;;  %v5646_v51 = vsel %vm2518_vm11, %v5623_v60, 0 }
 0x139   : > { %v4528_v0 = vpop.f32.mrf.mxu1  ;;  %v5542_v1 = vpop.f32.mrf.mxu0  ;;  %v1339_v41 = vadd.f32 %v5532_v26, %v1220_v31  ;;  %v1460_v47 = vadd.f32 %v5530_v11, %v1341_v10  ;;  %v5656_v38 = vadd.s32 2, %v3885_v53 }
 0x13a   : > { %v1686_v14 = vadd.f32 %v4528_v0, %v1456_v35  ;;  %v1802_v20 = vadd.f32 %v5538_v8, %v1683_v37  ;;  %v5630_v8 = vld [vmem:[%s6185_s2] ss:$0 sm:$0xff]  ;;  %v5654_v37 = vand.u32 127, %v3884_v43 }
 0x13b   : > { %v1655_v22 = vpop.f32.mrf.mxu1  ;;  %v5544_v44 = vpop.f32.mrf.mxu0 }
 0x13c   : > { %v1684_v0 = vadd.f32 %v1655_v22, %v1454_v18  ;;  %v1805_v17 = vadd.f32 %v5540_v25, %v1686_v14  ;;  %vm3889_vm2 = vcmp.eq.s32.totalorder %v5654_v37, %v5656_v38 }
 0x13d   : > { %v5546_v24 = vpop.f32.mrf.mxu0 }
 0x13e   : > { %v1803_v25 = vadd.f32 %v5542_v1, %v1684_v0 }
 0x13f   : > { %v5560_v63 = vpop.f32.mrf.mxu0 }
 0x140   : > { %v5550_v58 = vpop.f32.mrf.mxu1 }
 0x141   : > { %v5586_v7 = vpop.f32.mrf.mxu0  ;;  %v1689_v42 = vadd.f32 %v5550_v58, %v1459_v15  ;;  %v3588_v58 = vshrl.u32 %v5650_v12, 16 }
 0x142   : > { %v5558_v16 = vpop.f32.mrf.mxu1 }
 0x143   : > { %v1687_v52 = vadd.f32 %v5558_v16, %v1457_v34 }
 0x144   : > { %v5564_v54 = vpop.f32.mrf.mxu1 }
 0x145   : > { %v1690_v50 = vadd.f32 %v5564_v54, %v1460_v47  ;;  %v1806_v54 = vadd.f32 %v5546_v24, %v1687_v52 }
 0x146   : > { %v5584_v5 = vpop.f32.mrf.mxu1 }
 0x148   : > { %v4547_v36 = vpop.f32.mrf.mxu1 }
 0x149   : > { %v1923_v2 = vadd.f32 %v4547_v36, %v1804_v57  ;;  %v4557_v29 = vpop.f32.mrf.mxu0  ;;  %v6200_v57 = vld [vmem:[#allocation8_spill] sm:$0xff] }
 0x14a   : > { %v1890_v22 = vpop.f32.mrf.mxu1  ;;  %v1458_v14 = vadd.f32 %v6200_v57, %v1339_v41 }
 0x14b   : > { %v2153_v45 = vadd.f32 %v4557_v29, %v1923_v2  ;;  %v1921_v21 = vadd.f32 %v1890_v22, %v1802_v20  ;;  %v2120_v56 = vpop.f32.mrf.mxu0  ;;  %v1808_v2 = vadd.f32 %v5544_v44, %v1689_v42  ;;  %v3591_v29 = vshll.u32 %v5650_v12, 16 }
 0x14c   : > { %v4548_v55 = vpop.f32.mrf.mxu1  ;;  %v1688_v31 = vadd.f32 %v5584_v5, %v1458_v14 }
 0x14d   : > { %v2168_v13 = vadd.f32 %v5630_v8, %v2153_v45  ;;  %v2151_v23 = vadd.f32 %v2120_v56, %v1921_v21  ;;  %v1924_v27 = vadd.f32 %v4548_v55, %v1805_v17  ;;  %v4558_v35 = vpop.f32.mrf.mxu0  ;;  %v1809_v17 = vadd.f32 %v5560_v63, %v1690_v50  ;;  %v2326_v63 = vld [vmem:[#allocation3 + $0x18] sm:$0xf] }
 0x14e   : > { %v1893_v26 = vpop.f32.mrf.mxu1  ;;  %v1807_v55 = vadd.f32 %v5586_v7, %v1688_v31 }
 0x14f   : > { %v2176_v49 = vmax.f32 %v2168_v13, 0.0  ;;  %v2166_v4 = vadd.f32 %v5630_v8, %v2151_v23  ;;  %v2154_v1 = vadd.f32 %v4558_v35, %v1924_v27  ;;  %v1922_v18 = vadd.f32 %v1893_v26, %v1803_v25  ;;  %v2123_v11 = vpop.f32.mrf.mxu0  ;;  %v2329_v25 = vld [vmem:[#allocation3 + $0x1c] sm:$0x1] }
 0x150   : > { %v4551_v28 = vpop.f32.mrf.mxu1 }
 0x151   : > { %v4371_v36 = vpack.c.bf16 %v2176_v49, %v2176_v49  ;;  %v2174_v43 = vmax.f32 %v2166_v4, 0.0  ;;  %v2169_v20 = vadd.f32 %v5630_v8, %v2154_v1  ;;  %v2152_v0 = vadd.f32 %v2123_v11, %v1922_v18  ;;  %v2312_v1 = vld [vmem:[#allocation3 + $0x8] sm:$0xf]  ;;  %v2317_v18 = vld [vmem:[#allocation3 + $0xc] sm:$0x1] }
 0x152   : > { %v1906_v10 = vpop.f32.mrf.mxu1  ;;  %v1927_v21 = vadd.f32 %v4551_v28, %v1808_v2 }
 0x153   : > { %v2245_v22 = vshrl.u32 %v4371_v36, 16  ;;  %v4369_v16 = vpack.c.bf16 %v2174_v43, %v2174_v43  ;;  %v2177_v53 = vmax.f32 %v2169_v20, 0.0  ;;  %v2167_v45 = vadd.f32 %v5630_v8, %v2152_v0 }
 0x154   : > { %v4552_v15 = vpop.f32.mrf.mxu1  ;;  %v2248_v34 = vshll.u32 %v4371_v36, 16  ;;  %v1925_v27 = vadd.f32 %v1906_v10, %v1806_v54 }
 0x155   : > { %v2247_v44 = vrot.slane %v2245_v22, 7  ;;  %v2229_v41 = vshrl.u32 %v4369_v16, 16  ;;  %v4372_v56 = vpack.c.bf16 %v2177_v53, %v2177_v53  ;;  %v2232_v13 = vshll.u32 %v4369_v16, 16  ;;  %v4561_v49 = vpop.f32.mrf.mxu0  ;;  %v2332_v16 = vld [vmem:[#allocation3 + $0x20] sm:$0xf] }
 0x156   : > { %v2175_v23 = vmax.f32 %v2167_v45, 0.0  ;;  %v1909_v4 = vpop.f32.mrf.mxu1  ;;  %v2157_v14 = vadd.f32 %v4561_v49, %v1927_v21  ;;  %v1928_v52 = vadd.f32 %v4552_v15, %v1809_v17  ;;  %v2335_v53 = vld [vmem:[#allocation3 + $0x24] sm:$0x1] }
 0x157   : > { %v2250_v47 = vor.u32 %v2248_v34, %v2247_v44  ;;  %v2251_v42 = vrot.slane %v2247_v44, 4  ;;  %v2231_v35 = vrot.slane %v2229_v41, 7  ;;  %v2253_v26 = vshrl.u32 %v4372_v56, 16  ;;  %v2136_v43 = vpop.f32.mrf.mxu0  ;;  %v2320_v41 = vld [vmem:[#allocation3 + $0x10] sm:$0xf] }
 0x158   : > { %v2256_v7 = vshll.u32 %v4372_v56, 16  ;;  %v4370_v57 = vpack.c.bf16 %v2175_v23, %v2175_v23  ;;  %v2172_v2 = vadd.f32 %v5630_v8, %v2157_v14  ;;  %v1926_v31 = vadd.f32 %v1909_v4, %v1807_v55  ;;  %v2323_v56 = vld [vmem:[#allocation3 + $0x14] sm:$0x1] }
 0x159   : > { %v2327_v50 = vsel %vm5681_vm4, %v2250_v47, %v2326_v63  ;;  %v2330_v11 = vsel %vm5674_vm3, %v2251_v42, %v2329_v25  ;;  %v2234_v28 = vor.u32 %v2232_v13, %v2231_v35  ;;  %v2235_v36 = vrot.slane %v2231_v35, 4  ;;  %v4562_v45 = vpop.f32.mrf.mxu0 }
 0x15a   : > { %2328 = vst [vmem:[#allocation3 + $0x18] sm:$0xf] %v2327_v50  ;;  %2331 = vst [vmem:[#allocation3 + $0x1c] sm:$0x1] %v2330_v11  ;;  %v2255_v20 = vrot.slane %v2253_v26, 7  ;;  %v2237_v0 = vshrl.u32 %v4370_v57, 16  ;;  %v2155_v17 = vadd.f32 %v2136_v43, %v1925_v27  ;;  %v2158_v63 = vadd.f32 %v4562_v45, %v1928_v52 }
 0x15b   : > { %v2313_v10 = vsel %vm5681_vm4, %v2234_v28, %v2312_v1  ;;  %v2318_v22 = vsel %vm5674_vm3, %v2235_v36, %v2317_v18  ;;  %v2240_v54 = vshll.u32 %v4370_v57, 16  ;;  %v2180_v34 = vmax.f32 %v2172_v2, 0.0  ;;  %v2139_v25 = vpop.f32.mrf.mxu0  ;;  %v5707_v18 = vld [vmem:[#allocation3 + $0x4c] sm:$0x1]  ;;  %v2350_v43 = vld [vmem:[#allocation3 + $0x38] sm:$0xf] }
 0x15c   : > { %2314 = vst [vmem:[#allocation3 + $0x8] sm:$0xf] %v2313_v10  ;;  %2319 = vst [vmem:[#allocation3 + $0xc] sm:$0x1] %v2318_v22  ;;  %v2258_v21 = vor.u32 %v2256_v7, %v2255_v20  ;;  %v2259_v15 = vrot.slane %v2255_v20, 4  ;;  %v2239_v44 = vrot.slane %v2237_v0, 7  ;;  %v2170_v55 = vadd.f32 %v5630_v8, %v2155_v17 }
 0x15d   : > { %v5697_v13 = vrot.slane %v3588_v58, 4  ;;  %v4832_v23 = vmov 0.0   ;;  %v4375_v49 = vpack.c.bf16 %v2180_v34, %v2180_v34  ;;  %v2173_v58 = vadd.f32 %v5630_v8, %v2158_v63  ;;  %v2353_v20 = vld [vmem:[#allocation3 + $0x3c] sm:$0x1] }
 0x15e   : > { %v3890_v27 = vsel %vm3889_vm2, 1.0, %v4832_v23  ;;  %v2333_v47 = vsel %vm5681_vm4, %v2258_v21, %v2332_v16  ;;  %v2336_v42 = vsel %vm5674_vm3, %v2259_v15, %v2335_v53  ;;  %v2242_v35 = vor.u32 %v2240_v54, %v2239_v44  ;;  %v2338_v53 = vld [vmem:[#allocation3 + $0x28] sm:$0xf]  ;;  %v6205_v21 = vld [vmem:[#allocation7_spill] sm:$0xff] }
 0x15f   : > { %v2243_v26 = vrot.slane %v2239_v44, 4  ;;  %2334 = vst [vmem:[#allocation3 + $0x20] sm:$0xf] %v2333_v47  ;;  %2337 = vst [vmem:[#allocation3 + $0x24] sm:$0x1] %v2336_v42  ;;  %v2178_v4 = vmax.f32 %v2170_v55, 0.0  ;;  %v2156_v1 = vadd.f32 %v2139_v25, %v1926_v31  ;;  %v5720_v28 = vpack.c.bf16 %v3890_v27, %v3890_v27 }
 0x160   : > { %v2321_v37 = vsel %vm5681_vm4, %v2242_v35, %v2320_v41  ;;  %v5715_v7 = vrot.slane %v3591_v29, 5  ;;  %v3597_v57 = vshll.u32 %v5707_v18, 16  ;;  %v2277_v14 = vshrl.u32 %v4375_v49, 16 }
 0x161   : > { %v2324_v38 = vsel %vm5674_vm3, %v2243_v26, %v2323_v56  ;;  %2322 = vst [vmem:[#allocation3 + $0x10] sm:$0xf] %v2321_v37  ;;  %v4373_v52 = vpack.c.bf16 %v2178_v4, %v2178_v4  ;;  %v2181_v50 = vmax.f32 %v2173_v58, 0.0  ;;  %v5718_v11 = vld [vmem:[#allocation3 + $0x18] sm:$0xf]  ;;  %v2280_v36 = vshll.u32 %v4375_v49, 16 }
 0x162   : > { %2325 = vst [vmem:[#allocation3 + $0x14] sm:$0x1] %v2324_v38  ;;  %v2171_v0 = vadd.f32 %v5630_v8, %v2156_v1  ;;  %v2422_v12 = vshrl.u32 %v5718_v11, 16  ;;  %v2425_v29 = vshll.u32 %v5718_v11, 16  ;;  %v2279_v2 = vrot.slane %v2277_v14, 7 }
 0x163   : > { %v2261_v31 = vshrl.u32 %v4373_v52, 16  ;;  %v2264_v10 = vshll.u32 %v4373_v52, 16  ;;  %v4376_v22 = vpack.c.bf16 %v2181_v50, %v2181_v50  ;;  %v2363_v16 = vld [vmem:[#allocation3 + $0x8] sm:$0xf]  ;;  %v2341_v8 = vld [vmem:[#allocation3 + $0x2c] sm:$0x1] }
 0x164   : > { %v2179_v54 = vmax.f32 %v2171_v0, 0.0  ;;  %v2394_v17 = vshrl.u32 %v2363_v16, 16  ;;  %v2397_v45 = vshll.u32 %v2363_v16, 16  ;;  %v4260_v15 = vcombine.low %v6205_v21, %v2363_v16  ;;  %v2356_v26 = vld [vmem:[#allocation3 + $0x40] sm:$0xf] }
 0x165   : > { %v2282_v44 = vor.u32 %v2280_v36, %v2279_v2  ;;  %v2283_v34 = vrot.slane %v2279_v2, 4  ;;  %v2263_v41 = vrot.slane %v2261_v31, 7  ;;  %v2285_v56 = vshrl.u32 %v4376_v22, 16  ;;  %v2359_v49 = vld [vmem:[#allocation3 + $0x44] sm:$0x1] }
 0x166   : > { %v2288_v55 = vshll.u32 %v4376_v22, 16  ;;  %v4374_v63 = vpack.c.bf16 %v2179_v54, %v2179_v54  ;;  %v2396_v25 = vrot.slane %v2394_v17, 4  ;;  %v2399_v23 = vrot.slane %v2397_v45, 5  ;;  %4575 = vmatprep.mubr.msk.bf16.mxu0 %vm2505_vm1, %v4260_v15  ;;  %v5731_v4 = vld [vmem:[#allocation3 + $0x20] sm:$0xf] }
 0x167   : > { %v2351_v27 = vsel %vm5681_vm4, %v2282_v44, %v2350_v43  ;;  %v2354_v47 = vsel %vm5674_vm3, %v2283_v34, %v2353_v20  ;;  %v2266_v42 = vor.u32 %v2264_v10, %v2263_v41  ;;  %v2267_v35 = vrot.slane %v2263_v41, 4  ;;  %v2344_v36 = vld [vmem:[#allocation3 + $0x30] sm:$0xf]  ;;  %v2347_v43 = vld [vmem:[#allocation3 + $0x34] sm:$0x1] }
 0x168   : > { %2352 = vst [vmem:[#allocation3 + $0x38] sm:$0xf] %v2351_v27  ;;  %2355 = vst [vmem:[#allocation3 + $0x3c] sm:$0x1] %v2354_v47  ;;  %v2287_v58 = vrot.slane %v2285_v56, 7  ;;  %v2269_v1 = vshrl.u32 %v4374_v63, 16 }
 0x169   : > { %v2272_v37 = vshll.u32 %v4374_v63, 16  ;;  %v2364_v38 = vld [vmem:[#allocation3 + $0x10] sm:$0xf]  ;;  %v2424_v14 = vrot.slane %v2422_v12, 4  ;;  %v2339_v52 = vsel %vm5681_vm4, %v2266_v42, %v2338_v53  ;;  %v2342_v50 = vsel %vm5674_vm3, %v2267_v35, %v2341_v8  ;;  %v5737_v16 = vld [vmem:[#allocation3 + $0xc] sm:$0x1] }
 0x16a   : > { %v2408_v20 = vshrl.u32 %v2364_v38, 16  ;;  %v2411_v0 = vshll.u32 %v2364_v38, 16  ;;  %2340 = vst [vmem:[#allocation3 + $0x28] sm:$0xf] %v2339_v52  ;;  %2343 = vst [vmem:[#allocation3 + $0x2c] sm:$0x1] %v2342_v50  ;;  %v2290_v2 = vor.u32 %v2288_v55, %v2287_v58  ;;  %v4261_v17 = vcombine.low %v2364_v38, %v5718_v11 }
 0x16b   : > { %v2291_v31 = vrot.slane %v2287_v58, 4  ;;  %v2271_v10 = vrot.slane %v2269_v1, 7  ;;  %v2427_v22 = vrot.slane %v2425_v29, 5  ;;  %v2436_v53 = vshrl.u32 %v5731_v4, 16  ;;  %v5741_v45 = vld [vmem:[#allocation3 + $0x14] sm:$0x1] }
 0x16c   : > { %v2410_v54 = vrot.slane %v2408_v20, 4  ;;  %v2413_v12 = vrot.slane %v2411_v0, 5  ;;  %v2357_v21 = vsel %vm5681_vm4, %v2290_v2, %v2356_v26  ;;  %4576 = vmatmul.mubr.msk.bf16.vlgmr.msra.gmra.mxu0 %vm2505_vm1, %v4261_v17  ;;  %v2439_v41 = vshll.u32 %v5731_v4, 16  ;;  %v5754_v63 = vld [vmem:[#allocation3 + $0x1c] sm:$0x1] }
 0x16d   : > { %v2360_v15 = vsel %vm5674_vm3, %v2291_v31, %v2359_v49  ;;  %v2274_v44 = vor.u32 %v2272_v37, %v2271_v10  ;;  %v2275_v34 = vrot.slane %v2271_v10, 4  ;;  %2358 = vst [vmem:[#allocation3 + $0x40] sm:$0xf] %v2357_v21  ;;  %v2438_v29 = vrot.slane %v2436_v53, 4  ;;  %4594 = vmatpush3.bf16.msra.mxu0 %v5608_v9  ;;  %v5758_v49 = vld [vmem:[#allocation3 + $0x24] sm:$0x1] }
 0x16e   : > { %2361 = vst [vmem:[#allocation3 + $0x44] sm:$0x1] %v2360_v15  ;;  %v2400_v11 = vor.u32 %v2399_v23, %v2396_v25  ;;  %v2403_v56 = vshll.u32 %v5737_v16, 16  ;;  %v2414_v27 = vor.u32 %v2413_v12, %v2410_v54  ;;  %v2417_v47 = vshll.u32 %v5741_v45, 16  ;;  %4680 = vmatprep.subr.msk.bf16.mxu0 %vm2518_vm11, %v5601_v39  ;;  %v2688_v54 = vld [vmem:[#allocation3 + $0x8] sm:$0xe] }
 0x16f   : > { %v2345_v8 = vsel %vm5681_vm4, %v2274_v44, %v2344_v36  ;;  %v2348_v55 = vsel %vm5674_vm3, %v2275_v34, %v2347_v43  ;;  %v2441_v42 = vrot.slane %v2439_v41, 5  ;;  %v2369_v23 = vld [vmem:[#allocation3 + $0x38] sm:$0xf]  ;;  %v2428_v26 = vor.u32 %v2427_v22, %v2424_v14  ;;  %v5762_v37 = vld [vmem:[#allocation3 + $0x3c] sm:$0x1] }
 0x170   : > { %2346 = vst [vmem:[#allocation3 + $0x30] sm:$0xf] %v2345_v8  ;;  %2349 = vst [vmem:[#allocation3 + $0x34] sm:$0x1] %v2348_v55  ;;  %v2401_v35 = vrot.slane %v2400_v11, 4  ;;  %v2405_v25 = vrot.slane %v2403_v56, 5 }
 0x171   : > { %v2478_v5 = vshrl.u32 %v2369_v23, 16  ;;  %v2481_v24 = vshll.u32 %v2369_v23, 16  ;;  %v2415_v58 = vrot.slane %v2414_v27, 4  ;;  %v2419_v1 = vrot.slane %v2417_v47, 5  ;;  %v2367_v38 = vld [vmem:[#allocation3 + $0x28] sm:$0xf] }
 0x172   : > { %v2406_v9 = vsel %vm5147_vm8, %v2401_v35, %v2405_v25  ;;  %v2429_v52 = vrot.slane %v2428_v26, 4  ;;  %v2431_v50 = vshll.u32 %v5754_v63, 16  ;;  %v5767_v36 = vld [vmem:[#allocation3 + $0x2c] sm:$0x1]  ;;  %v2442_v14 = vor.u32 %v2441_v42, %v2438_v29  ;;  %v2689_v15 = vld [vmem:[#allocation3 + $0x10] sm:$0xe] }
 0x173   : > { %v2450_v43 = vshrl.u32 %v2367_v38, 16  ;;  %v2453_v20 = vshll.u32 %v2367_v38, 16  ;;  %v4262_v39 = vcombine.low %v5731_v4, %v2367_v38  ;;  %v4252_v0 = vcombine.low %v2392_v6, %v2406_v9  ;;  %v4757_v29 = vld [vmem:[#allocation3 + $0x8] ss:$8 sps:$4 sm:$0xff]  }
 0x174   : > { %v2480_v2 = vrot.slane %v2478_v5, 4  ;;  %v2483_v31 = vrot.slane %v2481_v24, 5  ;;  %v2420_v10 = vsel %vm5147_vm8, %v2415_v58, %v2419_v1  ;;  %v2433_v22 = vrot.slane %v2431_v50, 5  ;;  %v2690_v24 = vld [vmem:[#allocation3 + $0x18] sm:$0xe] }
 0x175   : > { %v2452_v12 = vrot.slane %v2450_v43, 4  ;;  %v2455_v17 = vrot.slane %v2453_v20, 5  ;;  %4579 = vmatprep.mubr.msk.bf16.mxu0 %vm2505_vm1, %v4262_v39  ;;  %4565 = vmatprep.mubr.msk.bf16.mxu1 %vm2505_vm1, %v4252_v0  ;;  %v2445_v4 = vshll.u32 %v5758_v49, 16  ;;  %v5782_v53 = vsel %vm821_vm0, %v5720_v28, 0  ;;  %v3197_v20 = vld [vmem:[#allocation3 + $0x10] sm:$0xe] }
 0x176   : > { %v2434_v40 = vsel %vm5147_vm8, %v2429_v52, %v2433_v22  ;;  %v2459_v32 = vshll.u32 %v5767_v36, 16  ;;  %v2484_v6 = vor.u32 %v2483_v31, %v2480_v2  ;;  %v2487_v21 = vshll.u32 %v5762_v37, 16  ;;  %v5795_v52 = vld [vmem:[#allocation3 + $0xc] sm:$0x1]  ;;  %v5807_v31 = vld [vmem:[#allocation3 + $0x14] sm:$0x1] }
 0x177   : > { %v2368_v44 = vld [vmem:[#allocation3 + $0x30] sm:$0xf]  ;;  %v4253_v34 = vcombine.low %v2420_v10, %v2434_v40  ;;  %v2443_v41 = vrot.slane %v2442_v14, 4  ;;  %v2447_v11 = vrot.slane %v2445_v4, 5  ;;  %v2456_v56 = vor.u32 %v2455_v17, %v2452_v12  ;;  %v5788_v8 = vld [vmem:[#allocation3 + $0x34] sm:$0x1] }
 0x178   : > { %v2464_v55 = vshrl.u32 %v2368_v44, 16  ;;  %v2467_v27 = vshll.u32 %v2368_v44, 16  ;;  %v4263_v47 = vcombine.low %v2368_v44, %v2369_v23  ;;  %v4269_v42 = vrot.slane %v2688_v54, 9  ;;  %v2691_v10 = vld [vmem:[#allocation3 + $0x20] sm:$0xe] }
 0x179   : > { %4566 = vmatmul.mubr.msk.bf16.vlgmr.msra.gmra.mxu1 %vm2505_vm1, %v4253_v34  ;;  %v2457_v35 = vrot.slane %v2456_v56, 4  ;;  %v2461_v25 = vrot.slane %v2459_v32, 5  ;;  %v2473_v26 = vshll.u32 %v5788_v8, 16  ;;  %v2485_v5 = vrot.slane %v2484_v6, 4  ;;  %v2692_v12 = vld [vmem:[#allocation3 + $0x28] sm:$0xe] }
 0x17a   : > { %v2466_v58 = vrot.slane %v2464_v55, 4  ;;  %v2469_v1 = vrot.slane %v2467_v27, 5  ;;  %4580 = vmatmul.mubr.msk.bf16.gmra.mxu0 %vm2505_vm1, %v4263_v47  ;;  %4584 = vmatpush3.bf16.msra.mxu1 %v5596_v46  ;;  %v2489_v38 = vrot.slane %v2487_v21, 5  ;;  %v2720_v9 = vrot.slane %v5737_v16, 5  ;;  %v3196_v46 = vld [vmem:[#allocation3 + $0x8] sm:$0xe] }
 0x17b   : > { %4595 = vmatprep.mubr.msk.bf16.mxu0 %vm2505_vm1, %v4757_v29  ;;  %v2448_v23 = vsel %vm5147_vm8, %v2443_v41, %v2447_v11  ;;  %v2462_v50 = vsel %vm5147_vm8, %v2457_v35, %v2461_v25  ;;  %4679 = vmatprep.subr.msk.bf16.mxu1 %vm2518_vm11, %v5591_v59  ;;  %v4270_v14 = vrot.slane %v2689_v15, 9  ;;  %v2724_v43 = vrot.slane %v5741_v45, 5  ;;  %v5816_v17 = vld [vmem:[#allocation3 + $0x1c] sm:$0x1]  ;;  %v4758_v4 = vld [vmem:[#allocation3 + $0x18] ss:$8 sps:$4 sm:$0xff]  }
 0x17c   : > { %v4254_v39 = vcombine.low %v2448_v23, %v2462_v50  ;;  %v2470_v16 = vor.u32 %v2469_v1, %v2466_v58  ;;  %v2475_v0 = vrot.slane %v2473_v26, 5  ;;  %v2490_v2 = vsel %vm5147_vm8, %v2485_v5, %v2489_v38  ;;  %v5820_v15 = vld [vmem:[#allocation3 + $0x24] sm:$0x1]  ;;  %v3198_v44 = vld [vmem:[#allocation3 + $0x18] sm:$0xe] }
 0x17d   : > { %v2721_v22 = vsel %vm5568_vm14, %v4269_v42, %v2720_v9  ;;  %v5813_v59 = vsel %vm5568_vm14, %v4270_v14, %v2724_v43  ;;  %v4271_v54 = vrot.slane %v2690_v24, 9  ;;  %v2728_v45 = vrot.slane %v5754_v63, 5  ;;  %v4759_v34 = vld [vmem:[#allocation3 + $0x28] ss:$8 sps:$4 sm:$0xff]   ;;  %v3199_v56 = vld [vmem:[#allocation3 + $0x20] sm:$0xe] }
 0x17e   : > { %4569 = vmatprep.mubr.msk.bf16.mxu1 %vm2505_vm1, %v4254_v39  ;;  %v2471_v40 = vrot.slane %v2470_v16, 4  ;;  %v4303_v32 = vrot.slane %v3196_v46, 9  ;;  %v3222_v6 = vrot.slane %v5795_v52, 5  ;;  %v4304_v21 = vrot.slane %v3197_v20, 9  ;;  %v2693_v35 = vld [vmem:[#allocation3 + $0x30] sm:$0xe] }
 0x17f   : > { %v5824_v29 = vsel %vm5568_vm14, %v4271_v54, %v2728_v45  ;;  %v3226_v63 = vrot.slane %v5807_v31, 5  ;;  %v4272_v41 = vrot.slane %v2691_v10, 9  ;;  %v2732_v11 = vrot.slane %v5758_v49, 5  ;;  %v2694_v25 = vld [vmem:[#allocation3 + $0x38] sm:$0xe] }
 0x180   : > { %v2476_v55 = vsel %vm5147_vm8, %v2471_v40, %v2475_v0  ;;  %v4277_v27 = vcombine.low %v5578_v48, %v2721_v22  ;;  %v4278_v47 = vcombine.low %v5813_v59, %v5824_v29  ;;  %v4273_v42 = vrot.slane %v2692_v12, 9  ;;  %v5838_v58 = vld [vmem:[#allocation3 + $0x2c] sm:$0x1]  ;;  %v5840_v1 = vld [vmem:[#allocation3 + $0x34] sm:$0x1] }
 0x181   : > { %v4255_v26 = vcombine.low %v2476_v55, %v2490_v2  ;;  %v3223_v5 = vsel %vm5568_vm14, %v4303_v32, %v3222_v6  ;;  %v3227_v24 = vsel %vm5568_vm14, %v4304_v21, %v3226_v63  ;;  %v2736_v49 = vrot.slane %v5767_v36, 5  ;;  %v3200_v50 = vld [vmem:[#allocation3 + $0x28] sm:$0xe]  ;;  %v3201_v20 = vld [vmem:[#allocation3 + $0x30] sm:$0xe] }
 0x182   : > { %4596 = vmatmul.mubr.msk.bf16.vlgmr.msra.gmra.mxu0 %vm2505_vm1, %v4758_v4  ;;  %v2733_v48 = vsel %vm5568_vm14, %v4272_v41, %v2732_v11  ;;  %v4305_v38 = vrot.slane %v3198_v44, 9  ;;  %v3230_v9 = vrot.slane %v5816_v17, 5  ;;  %v4306_v23 = vrot.slane %v3199_v56, 9  ;;  %v2966_v10 = vld [vmem:[#allocation3 + $0x8] sm:$0xf] }
 0x183   : > { %4570 = vmatmul.mubr.msk.bf16.gmra.mxu1 %vm2505_vm1, %v4255_v26  ;;  %4599 = vmatprep.mubr.msk.bf16.mxu0 %vm2505_vm1, %v4759_v34  ;;  %v2737_v36 = vsel %vm5568_vm14, %v4273_v42, %v2736_v49  ;;  %v3234_v14 = vrot.slane %v5820_v15, 5  ;;  %v4274_v43 = vrot.slane %v2693_v35, 9  ;;  %v2740_v46 = vrot.slane %v5788_v8, 5  ;;  %v2968_v12 = vld [vmem:[#allocation3 + $0x10] sm:$0xf] }
 0x184   : > { %4585 = vmatprep.mubr.msk.bf16.mxu1 %vm2505_vm1, %v4277_v27  ;;  %v4312_v39 = vcombine.low %v3223_v5, %v3227_v24  ;;  %v4279_v16 = vcombine.low %v2733_v48, %v2737_v36  ;;  %4614 = vmatpush3.bf16.msra.mxu0 %v5634_v33  ;;  %v4275_v0 = vrot.slane %v2694_v25, 9  ;;  %v2744_v2 = vrot.slane %v5762_v37, 5  ;;  %v4760_v33 = vld [vmem:[#allocation3 + $0x38] ss:$8 sps:$4 sm:$0xff]   ;;  %v5875_v6 = vld [vmem:[#allocation3 + $0x3c] sm:$0x1] }
 0x185   : > { %v5857_v22 = vsel %vm5568_vm14, %v4306_v23, %v3234_v14  ;;  %v5861_v54 = vsel %vm5568_vm14, %v4274_v43, %v2740_v46  ;;  %v4307_v8 = vrot.slane %v3200_v50, 9  ;;  %v3238_v45 = vrot.slane %v5838_v58, 5  ;;  %4682 = vmatprep.subr.msk.bf16.mxu0 %vm2518_vm11, %v5623_v60  ;;  %v5881_v63 = vld [vmem:[#allocation3 + $0x44] sm:$0x1]  ;;  %v3202_v41 = vld [vmem:[#allocation3 + $0x38] sm:$0xe] }
 0x186   : > { %v5868_v37 = vsel %vm5568_vm14, %v4305_v38, %v3230_v9  ;;  %v5872_v4 = vsel %vm5568_vm14, %v4275_v0, %v2744_v2  ;;  %v4308_v40 = vrot.slane %v3201_v20, 9  ;;  %v3242_v32 = vrot.slane %v5840_v1, 5  ;;  %v3203_v42 = vld [vmem:[#allocation3 + $0x40] sm:$0xe]  ;;  %v2970_v24 = vld [vmem:[#allocation3 + $0x18] sm:$0xf] }
 0x187   : > { %v4313_v21 = vcombine.low %v5868_v37, %v5857_v22  ;;  %v4280_v60 = vcombine.low %v5861_v54, %v5872_v4  ;;  %v2983_v44 = vshrl.u32 %v2966_v10, 16  ;;  %v2986_v34 = vshll.u32 %v2966_v10, 16  ;;  %v2972_v23 = vld [vmem:[#allocation3 + $0x20] sm:$0xf]  ;;  %v5910_v22 = vld [vmem:[#allocation3 + $0x14] sm:$0x1] }
 0x188   : > { %v3239_v11 = vsel %vm5568_vm14, %v4307_v8, %v3238_v45  ;;  %v2992_v56 = vshll.u32 %v5795_v52, 16  ;;  %v2997_v55 = vshrl.u32 %v2968_v12, 16  ;;  %v3000_v27 = vshll.u32 %v2968_v12, 16 }
 0x189   : > { %v3243_v35 = vsel %vm5568_vm14, %v4308_v40, %v3242_v32  ;;  %v2985_v25 = vrot.slane %v2983_v44, 4  ;;  %v2988_v26 = vrot.slane %v2986_v34, 5  ;;  %v3006_v5 = vshll.u32 %v5807_v31, 16  ;;  %v5919_v44 = vld [vmem:[#allocation3 + $0x1c] sm:$0x1] }
 0x18a   : > { %4600 = vmatmul.mubr.msk.bf16.gmra.mxu0 %vm2505_vm1, %v4760_v33  ;;  %v2994_v49 = vrot.slane %v2992_v56, 5  ;;  %v2999_v48 = vrot.slane %v2997_v55, 4  ;;  %v3002_v38 = vrot.slane %v3000_v27, 5  ;;  %v4309_v9 = vrot.slane %v3202_v41, 9  ;;  %v2974_v55 = vld [vmem:[#allocation3 + $0x28] sm:$0xf] }
 0x18b   : > { %4586 = vmatmul.mubr.msk.bf16.vlgmr.msra.gmra.mxu1 %vm2505_vm1, %v4278_v47  ;;  %4615 = vmatprep.mubr.msk.bf16.mxu0 %vm2505_vm1, %v4312_v39  ;;  %v2989_v52 = vor.u32 %v2988_v26, %v2985_v25  ;;  %v3008_v50 = vrot.slane %v3006_v5, 5  ;;  %v3246_v36 = vrot.slane %v5875_v6, 5  ;;  %v4310_v31 = vrot.slane %v3203_v42, 9  ;;  %v3473_v39 = vld [vmem:[#allocation3 + $0x10] sm:$0xf] }
 0x18c   : > { %4604 = vmatpush3.bf16.msra.mxu1 %v5618_v61  ;;  %4589 = vmatprep.mubr.msk.bf16.mxu1 %vm2505_vm1, %v4279_v16  ;;  %v3003_v14 = vor.u32 %v3002_v38, %v2999_v48  ;;  %v3250_v43 = vrot.slane %v5881_v63, 5  ;;  %v3011_v46 = vshrl.u32 %v2970_v24, 16  ;;  %v3014_v20 = vshll.u32 %v2970_v24, 16  ;;  %v2976_v26 = vld [vmem:[#allocation3 + $0x30] sm:$0xf] }
 0x18d   : > { %v2990_v0 = vrot.slane %v2989_v52, 4  ;;  %v5901_v59 = vsel %vm5568_vm14, %v4309_v9, %v3246_v36  ;;  %4681 = vmatprep.subr.msk.bf16.mxu1 %vm2518_vm11, %v5613_v19  ;;  %v3020_v29 = vshll.u32 %v5816_v17, 16  ;;  %v3025_v47 = vshrl.u32 %v2972_v23, 16  ;;  %v3475_v17 = vld [vmem:[#allocation3 + $0x18] sm:$0xf] }
 0x18e   : > { %v3004_v61 = vrot.slane %v3003_v14, 4  ;;  %v5908_v16 = vsel %vm5568_vm14, %v4310_v31, %v3250_v43  ;;  %v3013_v2 = vrot.slane %v3011_v46, 4  ;;  %v3016_v10 = vrot.slane %v3014_v20, 5  ;;  %v3479_v43 = vld [vmem:[#allocation3 + $0x28] sm:$0xf] }
 0x18f   : > { %v4314_v8 = vcombine.low %v3239_v11, %v3243_v35  ;;  %v2995_v45 = vsel %vm5147_vm8, %v2990_v0, %v2994_v49  ;;  %v4315_v19 = vcombine.low %v5901_v59, %v5908_v16  ;;  %v3027_v12 = vrot.slane %v3025_v47, 4 }
 0x190   : > { %v3009_v33 = vsel %vm5147_vm8, %v3004_v61, %v3008_v50  ;;  %v3017_v37 = vor.u32 %v3016_v10, %v3013_v2  ;;  %v3028_v40 = vshll.u32 %v2972_v23, 16  ;;  %v3034_v32 = vshll.u32 %v5820_v15, 16 }
 0x191   : > { %v3022_v34 = vrot.slane %v3020_v29, 5  ;;  %v3490_v41 = vshrl.u32 %v3473_v39, 16  ;;  %v3493_v11 = vshll.u32 %v3473_v39, 16  ;;  %v3499_v56 = vshll.u32 %v5910_v22, 16 }
 0x192   : > { %4616 = vmatmul.mubr.msk.bf16.vlgmr.msra.gmra.mxu0 %vm2505_vm1, %v4313_v21  ;;  %v4295_v27 = vcombine.low %v2995_v45, %v3009_v33  ;;  %v3018_v42 = vrot.slane %v3017_v37, 4  ;;  %v3030_v35 = vrot.slane %v3028_v40, 5  ;;  %v3504_v25 = vshrl.u32 %v3475_v17, 16  ;;  %v5952_v40 = vld [vmem:[#allocation3 + $0x2c] sm:$0x1] }
 0x193   : > { %4590 = vmatmul.mubr.msk.bf16.gmra.mxu1 %vm2505_vm1, %v4280_v60  ;;  %4619 = vmatprep.mubr.msk.bf16.mxu0 %vm2505_vm1, %v4314_v8  ;;  %v3036_v15 = vrot.slane %v3034_v32, 5  ;;  %v3492_v5 = vrot.slane %v3490_v41, 4  ;;  %v3495_v24 = vrot.slane %v3493_v11, 5  ;;  %v3507_v49 = vshll.u32 %v3475_v17, 16  ;;  %v3477_v60 = vld [vmem:[#allocation3 + $0x20] sm:$0xf] }
 0x194   : > { %4605 = vmatprep.mubr.msk.bf16.mxu1 %vm2505_vm1, %v4295_v27  ;;  %v3031_v48 = vor.u32 %v3030_v35, %v3027_v12  ;;  %v3501_v21 = vrot.slane %v3499_v56, 5  ;;  %v3506_v38 = vrot.slane %v3504_v25, 4  ;;  %v3513_v9 = vshll.u32 %v5919_v44, 16  ;;  %4634 = vmatpush3.bf16.msra.mxu0 %v5646_v51  ;;  %v5945_v8 = vld [vmem:[#allocation3 + $0x24] sm:$0x1] }
 0x195   : > { %v3496_v23 = vor.u32 %v3495_v24, %v3492_v5  ;;  %v3509_v52 = vrot.slane %v3507_v49, 5  ;;  %v3039_v54 = vshrl.u32 %v2974_v55, 16  ;;  %v3042_v4 = vshll.u32 %v2974_v55, 16  ;;  %4684 = vmatprep.subr.msk.bf16.mxu0 %vm821_vm0, %v5720_v28  ;;  %v5941_v28 = vld [vmem:[%s6186_s3 + $0x20] sm:$0xf] }
 0x196   : > { %v3023_v50 = vsel %vm5147_vm8, %v3018_v42, %v3022_v34  ;;  %v3032_v36 = vrot.slane %v3031_v48, 4  ;;  %v3515_v31 = vrot.slane %v3513_v9, 5  ;;  %v3053_v14 = vshrl.u32 %v2976_v26, 16  ;;  %v2978_v34 = vld [vmem:[#allocation3 + $0x38] sm:$0xf] }
 0x197   : > { %v3497_v46 = vrot.slane %v3496_v23, 4  ;;  %v3510_v20 = vor.u32 %v3509_v52, %v3506_v38  ;;  %v3041_v0 = vrot.slane %v3039_v54, 4  ;;  %v3044_v59 = vrot.slane %v3042_v4, 5  ;;  %v2980_v55 = vld [vmem:[#allocation3 + $0x40] sm:$0xf] }
 0x198   : > { %v3037_v51 = vsel %vm5147_vm8, %v3032_v36, %v3036_v15  ;;  %v3048_v29 = vshll.u32 %v5838_v58, 16  ;;  %v3055_v47 = vrot.slane %v3053_v14, 4  ;;  %v3056_v39 = vshll.u32 %v2976_v26, 16  ;;  %v3481_v54 = vld [vmem:[#allocation3 + $0x30] sm:$0xf] }
 0x199   : > { %v4296_v61 = vcombine.low %v3023_v50, %v3037_v51  ;;  %v3502_v16 = vsel %vm5147_vm8, %v3497_v46, %v3501_v21  ;;  %v3511_v2 = vrot.slane %v3510_v20, 4  ;;  %v3045_v10 = vor.u32 %v3044_v59, %v3041_v0  ;;  %v3483_v0 = vld [vmem:[#allocation3 + $0x38] sm:$0xf] }
 0x19a   : > { %4620 = vmatmul.mubr.msk.bf16.gmra.mxu0 %vm2505_vm1, %v4315_v19  ;;  %v3058_v45 = vrot.slane %v3056_v39, 5  ;;  %v3062_v58 = vshll.u32 %v5840_v1, 16  ;;  %v3518_v12 = vshrl.u32 %v3477_v60, 16  ;;  %v3521_v17 = vshll.u32 %v3477_v60, 16 }
 0x19b   : > { %4606 = vmatmul.mubr.msk.bf16.vlgmr.msra.gmra.mxu1 %vm2505_vm1, %v4296_v61  ;;  %v3516_v33 = vsel %vm5147_vm8, %v3511_v2, %v3515_v31  ;;  %v3046_v37 = vrot.slane %v3045_v10, 4  ;;  %v3532_v32 = vshrl.u32 %v3479_v43, 16  ;;  %v3594_v41 = vor.u32 %v5715_v7, %v5697_v13  ;;  %v5967_v31 = vld [vmem:[#allocation3 + $0x34] sm:$0x1]  ;;  %v5973_v2 = vld [vmem:[#allocation3 + $0x3c] sm:$0x1] }
 0x19c   : > { %4624 = vmatpush3.bf16.msra.mxu1 %v5639_v62  ;;  %v4330_v19 = vcombine.low %v3502_v16, %v3516_v33  ;;  %v3050_v11 = vrot.slane %v3048_v29, 5  ;;  %v3059_v1 = vor.u32 %v3058_v45, %v3055_v47  ;;  %v3520_v56 = vrot.slane %v3518_v12, 4 }
 0x19d   : > { %v3064_v27 = vrot.slane %v3062_v58, 5  ;;  %v3523_v42 = vrot.slane %v3521_v17, 5  ;;  %v3527_v35 = vshll.u32 %v5945_v8, 16  ;;  %v3534_v25 = vrot.slane %v3532_v32, 4  ;;  %4683 = vmatprep.subr.msk.bf16.mxu1 %vm2518_vm11, %v5941_v28  ;;  %v3485_v17 = vld [vmem:[#allocation3 + $0x40] sm:$0xf] }
 0x19e   : > { %4635 = vmatprep.mubr.msk.bf16.mxu0 %vm2505_vm1, %v4330_v19  ;;  %v3060_v26 = vrot.slane %v3059_v1, 4  ;;  %v3535_v15 = vshll.u32 %v3479_v43, 16  ;;  %v3541_v5 = vshll.u32 %v5952_v40, 16  ;;  %v3067_v62 = vshrl.u32 %v2978_v34, 16 }
 0x19f   : > { %v3051_v24 = vsel %vm5147_vm8, %v3046_v37, %v3050_v11  ;;  %v3524_v49 = vor.u32 %v3523_v42, %v3520_v56  ;;  %v3070_v48 = vshll.u32 %v2978_v34, 16  ;;  %v3081_v21 = vshrl.u32 %v2980_v55, 16  ;;  %v5979_v42 = vld [vmem:[#allocation3 + $0x44] sm:$0x1] }
 0x1a0   : > { %v3065_v38 = vsel %vm5147_vm8, %v3060_v26, %v3064_v27  ;;  %v3537_v9 = vrot.slane %v3535_v15, 5  ;;  %v3069_v23 = vrot.slane %v3067_v62, 4  ;;  %v3076_v52 = vshll.u32 %v5875_v6, 16 }
 0x1a1   : > { %v4297_v4 = vcombine.low %v3051_v24, %v3065_v38  ;;  %v3525_v60 = vrot.slane %v3524_v49, 4  ;;  %v3529_v50 = vrot.slane %v3527_v35, 5  ;;  %v3072_v36 = vrot.slane %v3070_v48, 5 }
 0x1a2   : > { %v3538_v14 = vor.u32 %v3537_v9, %v3534_v25  ;;  %v3543_v43 = vrot.slane %v3541_v5, 5  ;;  %v3083_v46 = vrot.slane %v3081_v21, 4  ;;  %v3084_v20 = vshll.u32 %v2980_v55, 16 }
 0x1a3   : > { %4609 = vmatprep.mubr.msk.bf16.mxu1 %vm2505_vm1, %v4297_v4  ;;  %v3073_v59 = vor.u32 %v3072_v36, %v3069_v23  ;;  %v3090_v51 = vshll.u32 %v5881_v63, 16  ;;  %v3546_v29 = vshrl.u32 %v3481_v54, 16  ;;  %v3549_v47 = vshll.u32 %v3481_v54, 16 }
 0x1a4   : > { %v3530_v6 = vsel %vm5147_vm8, %v3525_v60, %v3529_v50  ;;  %v3539_v39 = vrot.slane %v3538_v14, 4  ;;  %v3078_v61 = vrot.slane %v3076_v52, 5  ;;  %v3086_v16 = vrot.slane %v3084_v20, 5  ;;  %v4761_v52 = vld [vmem:[#allocation3 + $0x10] ss:$8 sps:$4 sm:$0xff]  }
 0x1a5   : > { %v3548_v10 = vrot.slane %v3546_v29, 4  ;;  %v3551_v45 = vrot.slane %v3549_v47, 5  ;;  %v3555_v58 = vshll.u32 %v5967_v31, 16  ;;  %v3560_v12 = vshrl.u32 %v3483_v0, 16  ;;  %v4765_v14 = vld [vmem:[#allocation2 + $0xd8] ss:$8 sps:$4 sm:$0xff]  }
 0x1a6   : > { %v3544_v33 = vsel %vm5147_vm8, %v3539_v39, %v3543_v43  ;;  %v3074_v63 = vrot.slane %v3073_v59, 4  ;;  %v3087_v37 = vor.u32 %v3086_v16, %v3083_v46  ;;  %v3563_v32 = vshll.u32 %v3483_v0, 16  ;;  %v3703_v46 = vld [vmem:[#allocation3 + $0x10] sm:$0xe]  ;;  %v4762_v20 = vld [vmem:[#allocation3 + $0x20] ss:$8 sps:$4 sm:$0xff]  }
 0x1a7   : > { %v4331_v34 = vcombine.low %v3530_v6, %v3544_v33  ;;  %v3092_v19 = vrot.slane %v3090_v51, 5  ;;  %v3552_v11 = vor.u32 %v3551_v45, %v3548_v10  ;;  %v3562_v1 = vrot.slane %v3560_v12, 4  ;;  %v4763_v59 = vld [vmem:[#allocation3 + $0x30] ss:$8 sps:$4 sm:$0xff]   ;;  %v4764_v45 = vld [vmem:[#allocation3 + $0x40] ss:$8 sps:$4 sm:$0xff]  }
 0x1a8   : > { %v3088_v56 = vrot.slane %v3087_v37, 4  ;;  %v3565_v55 = vrot.slane %v3563_v32, 5  ;;  %v3569_v27 = vshll.u32 %v5973_v2, 16  ;;  %v3574_v35 = vshrl.u32 %v3485_v17, 16  ;;  %v3704_v51 = vld [vmem:[#allocation3 + $0x18] sm:$0xe] }
 0x1a9   : > { %4636 = vmatmul.mubr.msk.bf16.vlgmr.msra.gmra.mxu0 %vm2505_vm1, %v4331_v34  ;;  %v3553_v25 = vrot.slane %v3552_v11, 4  ;;  %v3557_v26 = vrot.slane %v3555_v58, 5  ;;  %v3577_v15 = vshll.u32 %v3485_v17, 16  ;;  %v3595_v5 = vrot.slane %v3594_v41, 4  ;;  %v4766_v39 = vld [vmem:[#allocation2 + $0xe8] ss:$8 sps:$4 sm:$0xff]  }
 0x1aa   : > { %v3079_v62 = vsel %vm5147_vm8, %v3074_v63, %v3078_v61  ;;  %v3093_v24 = vsel %vm5147_vm8, %v3088_v56, %v3092_v19  ;;  %v3566_v49 = vor.u32 %v3565_v55, %v3562_v1  ;;  %v3576_v48 = vrot.slane %v3574_v35, 4  ;;  %4654 = vmatpush3.bf16.msra.mxu0 %v5782_v53  ;;  %v3706_v61 = vld [vmem:[#allocation3 + $0x28] sm:$0xe]  ;;  %v4767_v16 = vld [vmem:[#allocation2 + $0xf8] ss:$8 sps:$4 sm:$0xff]  }
 0x1ab   : > { %v4298_v21 = vcombine.low %v3079_v62, %v3093_v24  ;;  %v3579_v38 = vrot.slane %v3577_v15, 5  ;;  %v3583_v9 = vshll.u32 %v5979_v42, 16  ;;  %v3599_v23 = vrot.slane %v3597_v57, 5  ;;  %v3707_v10 = vld [vmem:[#allocation3 + $0x30] sm:$0xe] }
 0x1ac   : > { %v3558_v13 = vsel %vm5147_vm8, %v3553_v25, %v3557_v26  ;;  %v3567_v7 = vrot.slane %v3566_v49, 4  ;;  %v3571_v41 = vrot.slane %v3569_v27, 5  ;;  %v3786_v0 = vsel %vm2518_vm11, %v5941_v28, 0  ;;  %v3708_v63 = vld [vmem:[#allocation3 + $0x38] sm:$0xe] }
 0x1ad   : > { %4610 = vmatmul.mubr.msk.bf16.gmra.mxu1 %vm2505_vm1, %v4298_v21  ;;  %v3580_v54 = vor.u32 %v3579_v38, %v3576_v48  ;;  %v3585_v50 = vrot.slane %v3583_v9, 5  ;;  %v3600_v57 = vsel %vm5147_vm8, %v3595_v5, %v3599_v23  ;;  %v4338_v29 = vrot.slane %v3703_v46, 9  ;;  %v3710_v56 = vld [vmem:[#allocation3 + $0x48] sm:$0xe]  ;;  %v3709_v27 = vld [vmem:[#allocation3 + $0x40] sm:$0xe] }
 0x1ae   : > { %v3572_v4 = vsel %vm5147_vm8, %v3567_v7, %v3571_v41  ;;  %4625 = vmatprep.mubr.msk.bf16.mxu1 %vm2505_vm1, %v4761_v52  ;;  %v3729_v47 = vrot.slane %v5910_v22, 5  ;;  %v4339_v30 = vrot.slane %v3704_v51, 9  ;;  %v3733_v6 = vrot.slane %v5919_v44, 5  ;;  %v3705_v22 = vld [vmem:[#allocation3 + $0x20] sm:$0xe] }
 0x1af   : > { %v4332_v53 = vcombine.low %v3558_v13, %v3572_v4  ;;  %v3581_v60 = vrot.slane %v3580_v54, 4  ;;  %v4341_v17 = vrot.slane %v3706_v61, 9  ;;  %v3741_v33 = vrot.slane %v5952_v40, 5  ;;  %v4768_v40 = vld [vmem:[#allocation2 + $0x108] ss:$8 sps:$4 sm:$0xff]  }
 0x1b0   : > { %v3730_v28 = vsel %vm5568_vm14, %v4338_v29, %v3729_v47  ;;  %v3734_v58 = vsel %vm5568_vm14, %v4339_v30, %v3733_v6  ;;  %v4342_v44 = vrot.slane %v3707_v10, 9  ;;  %v3745_v37 = vrot.slane %v5967_v31, 5 }
 0x1b1   : > { %4639 = vmatprep.mubr.msk.bf16.mxu0 %vm2505_vm1, %v4332_v53  ;;  %v3586_v36 = vsel %vm5147_vm8, %v3581_v60, %v3585_v50  ;;  %v4347_v12 = vcombine.low %v3730_v28, %v3734_v58  ;;  %v4340_v32 = vrot.slane %v3705_v22, 9  ;;  %v3737_v34 = vrot.slane %v5945_v8, 5 }
 0x1b2   : > { %v4333_v43 = vcombine.low %v3586_v36, %v3600_v57  ;;  %v4343_v19 = vrot.slane %v3708_v63, 9  ;;  %v3749_v11 = vrot.slane %v5973_v2, 5  ;;  %v3742_v1 = vsel %vm5568_vm14, %v4341_v17, %v3741_v33 }
 0x1b3   : > { %v3746_v55 = vsel %vm5568_vm14, %v4342_v44, %v3745_v37  ;;  %v3738_v31 = vsel %vm5568_vm14, %v4340_v32, %v3737_v34  ;;  %v4345_v8 = vrot.slane %v3710_v56, 9  ;;  %v4344_v2 = vrot.slane %v3709_v27, 9 }
 0x1b4   : > { %4640 = vmatmul.mubr.msk.bf16.gmra.mxu0 %vm2505_vm1, %v4333_v43  ;;  %v4348_v35 = vcombine.low %v3738_v31, %v3742_v1  ;;  %v3750_v25 = vsel %vm5568_vm14, %v4343_v19, %v3749_v11  ;;  %v3753_v15 = vrot.slane %v5979_v42, 5  ;;  %v3757_v5 = vrot.slane %v5707_v18, 5 }
 0x1b5   : > { %4626 = vmatmul.mubr.msk.bf16.vlgmr.msra.gmra.mxu1 %vm2505_vm1, %v4762_v20  ;;  %4655 = vmatprep.mubr.msk.bf16.mxu0 %vm808_vm5, %v4765_v14  ;;  %v4349_v26 = vcombine.low %v3746_v55, %v3750_v25 }
 0x1b6   : > { %4644 = vmatpush3.bf16.msra.mxu1 %v3786_v0  ;;  %4629 = vmatprep.mubr.msk.bf16.mxu1 %vm2505_vm1, %v4763_v59  ;;  %v3754_v62 = vsel %vm5568_vm14, %v4344_v2, %v3753_v15  ;;  %v3758_v24 = vsel %vm5568_vm14, %v4345_v8, %v3757_v5 }
 0x1b7   : > { %v4350_v49 = vcombine.low %v3754_v62, %v3758_v24 }
 0x1bc   : > { %4656 = vmatmul.mubr.msk.bf16.vlgmr.msra.gmra.mxu0 %vm808_vm5, %v4766_v39 }
 0x1bd   : > { %4630 = vmatmul.mubr.msk.bf16.gmra.mxu1 %vm2505_vm1, %v4764_v45  ;;  %4659 = vmatprep.mubr.msk.bf16.mxu0 %vm808_vm5, %v4767_v16 }
 0x1be   : > { %4645 = vmatprep.mubr.msk.bf16.mxu1 %vm2505_vm1, %v4347_v12 }
 0x1c4   : > { %4660 = vmatmul.mubr.msk.bf16.gmra.mxu0 %vm808_vm5, %v4768_v40 }
 0x1c5   : > { %4646 = vmatmul.mubr.msk.bf16.vlgmr.msra.gmra.mxu1 %vm2505_vm1, %v4348_v35 }
 0x1c6   : > { %4649 = vmatprep.mubr.msk.bf16.mxu1 %vm2505_vm1, %v4349_v26 }
 0x1cd   : > { %4650 = vmatmul.mubr.msk.bf16.gmra.mxu1 %vm2505_vm1, %v4350_v49 }
 0x22c   : > { %v4577_v48 = vpop.f32.mrf.mxu0 }
 0x22e   : > { %v2656_v21 = vpop.f32.mrf.mxu0 }
 0x230   : > { %v4578_v38 = vpop.f32.mrf.mxu0 }
 0x232   : > { %v2659_v9 = vpop.f32.mrf.mxu0 }
 0x239   : > { %v4567_v42 = vpop.f32.mrf.mxu1 }
 0x23a   : > { %v4581_v23 = vpop.f32.mrf.mxu0  ;;  %v2665_v55 = vadd.f32 %v4577_v48, %v4567_v42 }
 0x23b   : > { %v2556_v18 = vpop.f32.mrf.mxu1 }
 0x23c   : > { %v6042_v13 = vpop.f32.mrf.mxu0  ;;  %v2657_v31 = vadd.f32 %v2656_v21, %v2556_v18 }
 0x23d   : > { %v4568_v7 = vpop.f32.mrf.mxu1 }
 0x23e   : > { %v6044_v41 = vpop.f32.mrf.mxu0  ;;  %v2668_v26 = vadd.f32 %v4578_v38, %v4568_v7 }
 0x23f   : > { %v2559_v52 = vpop.f32.mrf.mxu1 }
 0x240   : > { %v6046_v54 = vpop.f32.mrf.mxu0  ;;  %v2660_v62 = vadd.f32 %v2659_v9, %v2559_v52 }
 0x242   : > { %v4597_v3 = vpop.f32.mrf.mxu0 }
 0x243   : > { %v4571_v4 = vpop.f32.mrf.mxu1 }
 0x244   : > { %v2927_v53 = vpop.f32.mrf.mxu0 }
 0x245   : > { %v2572_v60 = vpop.f32.mrf.mxu1 }
 0x246   : > { %v4598_v50 = vpop.f32.mrf.mxu0  ;;  %v2673_v18 = vadd.f32 %v6042_v13, %v2572_v60 }
 0x247   : > { %v4572_v57 = vpop.f32.mrf.mxu1 }
 0x248   : > { %v6048_v36 = vpop.f32.mrf.mxu0  ;;  %v2684_v9 = vadd.f32 %v6044_v41, %v4572_v57 }
 0x249   : > { %v6050_v14 = vpop.f32.mrf.mxu1 }
 0x24a   : > { %v6052_v43 = vpop.f32.mrf.mxu0 }
 0x24b   : > { %v4587_v46 = vpop.f32.mrf.mxu1 }
 0x24c   : > { %v6054_v20 = vpop.f32.mrf.mxu0  ;;  %v2842_v35 = vadd.f32 %v4587_v46, %v2665_v55 }
 0x24d   : > { %v2809_v0 = vpop.f32.mrf.mxu1 }
 0x24e   : > { %v6056_v59 = vpop.f32.mrf.mxu0  ;;  %v2840_v2 = vadd.f32 %v2809_v0, %v2657_v31  ;;  %v2960_v49 = vadd.f32 %v4597_v3, %v2842_v35 }
 0x24f   : > { %v4588_v51 = vpop.f32.mrf.mxu1 }
 0x250   : > { %v6058_v29 = vpop.f32.mrf.mxu0  ;;  %v2843_v24 = vadd.f32 %v4588_v51, %v2668_v26  ;;  %v2958_v42 = vadd.f32 %v2927_v53, %v2840_v2  ;;  %v2676_v53 = vadd.f32 %v6046_v54, %v6050_v14 }
 0x251   : > { %v2812_v47 = vpop.f32.mrf.mxu1 }
 0x252   : > { %v4617_v30 = vpop.f32.mrf.mxu0  ;;  %v2961_v0 = vadd.f32 %v4598_v50, %v2843_v24 }
 0x253   : > { %v4591_v6 = vpop.f32.mrf.mxu1 }
 0x254   : > { %v3315_v39 = vpop.f32.mrf.mxu0 }
 0x255   : > { %v2825_v28 = vpop.f32.mrf.mxu1 }
 0x256   : > { %v6060_v61 = vpop.f32.mrf.mxu0  ;;  %v2844_v52 = vadd.f32 %v2825_v28, %v2673_v18 }
 0x257   : > { %v4592_v16 = vpop.f32.mrf.mxu1 }
 0x258   : > { %v6062_v10 = vpop.f32.mrf.mxu0  ;;  %v2962_v57 = vadd.f32 %v6054_v20, %v2844_v52 }
 0x259   : > { %v2828_v45 = vpop.f32.mrf.mxu1 }
 0x25a   : > { %v6064_v58 = vpop.f32.mrf.mxu0 }
 0x25b   : > { %v4607_v22 = vpop.f32.mrf.mxu1 }
 0x25c   : > { %v6066_v12 = vpop.f32.mrf.mxu0  ;;  %v3190_v48 = vadd.f32 %v4607_v22, %v2960_v49 }
 0x25d   : > { %v3157_v17 = vpop.f32.mrf.mxu1 }
 0x25e   : > { %v6068_v33 = vpop.f32.mrf.mxu0  ;;  %v3188_v7 = vadd.f32 %v3157_v17, %v2958_v42 }
 0x25f   : > { %6206 = vst [vmem:[#allocation8_spill] sm:$0xff] %v6068_v33  ;;  %v4608_v63 = vpop.f32.mrf.mxu1  ;;  %v2681_v33 = vadd.f32 %v4581_v23, %v4571_v4  ;;  %v3348_v4 = vadd.f32 %v4617_v30, %v3190_v48 }
 0x260   : > { %v6070_v44 = vpop.f32.mrf.mxu0  ;;  %v3191_v51 = vadd.f32 %v4608_v63, %v2961_v0  ;;  %v3346_v17 = vadd.f32 %v3315_v39, %v3188_v7 }
 0x261   : > { %6207 = vst [vmem:[#allocation7_spill] sm:$0xff] %v6070_v44  ;;  %v3160_v37 = vpop.f32.mrf.mxu1  ;;  %v2846_v46 = vadd.f32 %v4591_v6, %v2681_v33  ;;  %v2845_v33 = vadd.f32 %v2828_v45, %v2676_v53 }
 0x263   : > { %v2964_v13 = vadd.f32 %v6052_v43, %v2846_v46  ;;  %v2963_v45 = vadd.f32 %v6058_v29, %v2845_v33 }
 0x269   : > { %v4637_v32 = vpop.f32.mrf.mxu0 }
 0x26b   : > { %v6072_v34 = vpop.f32.mrf.mxu0 }
 0x26d   : > { %v4611_v19 = vpop.f32.mrf.mxu1  ;;  %v6074_v11 = vpop.f32.mrf.mxu0 }
 0x26e   : > { %6208 = vst [vmem:[#allocation9_spill] sm:$0xff] %v6074_v11  ;;  %v2841_v11 = vadd.f32 %v2812_v47, %v2660_v62  ;;  %v2847_v47 = vadd.f32 %v4592_v16, %v2684_v9  ;;  %v3194_v41 = vadd.f32 %v4611_v19, %v2964_v13 }
 0x26f   : > { %v3173_v1 = vpop.f32.mrf.mxu1  ;;  %v6076_v40 = vpop.f32.mrf.mxu0 }
 0x270   : > { %6209 = vst [vmem:[#allocation10_spill] sm:$0xff] %v6076_v40  ;;  %v2959_v23 = vadd.f32 %v6048_v36, %v2841_v11  ;;  %v3349_v36 = vadd.f32 %v6060_v61, %v3191_v51  ;;  %v3192_v30 = vadd.f32 %v3173_v1, %v2962_v57  ;;  %v2965_v54 = vadd.f32 %v6056_v59, %v2847_v47  ;;  %v4355_v61 = vld [vmem:[%s6187_s4] ss:$0 sm:$0xff] }
 0x271   : > { %v4612_v56 = vpop.f32.mrf.mxu1  ;;  %v3352_v20 = vadd.f32 %v6064_v58, %v3194_v41 }
 0x272   : > { %v3189_v22 = vadd.f32 %v3160_v37, %v2959_v23  ;;  %v3195_v39 = vadd.f32 %v4612_v56, %v2965_v54 }
 0x273   : > { %v3176_v27 = vpop.f32.mrf.mxu1 }
 0x274   : > { %v6078_v25 = vpop.f32.mrf.mxu0  ;;  %v3347_v37 = vadd.f32 %v6062_v10, %v3189_v22  ;;  %v3350_v10 = vadd.f32 %v6066_v12, %v3192_v30 }
 0x275   : > { %v4627_v8 = vpop.f32.mrf.mxu1  ;;  %v6210_v58 = vld [vmem:[#allocation9_spill] sm:$0xff] }
 0x276   : > { %v6080_v15 = vpop.f32.mrf.mxu0  ;;  %v3467_v50 = vadd.f32 %v4627_v8, %v3348_v4 }
 0x277   : > { %v3434_v5 = vpop.f32.mrf.mxu1  ;;  %v6212_v18 = vld [vmem:[#allocation10_spill] sm:$0xff] }
 0x278   : > { %v6082_v44 = vpop.f32.mrf.mxu0  ;;  %v3465_v63 = vadd.f32 %v3434_v5, %v3346_v17  ;;  %v3697_v11 = vadd.f32 %v4637_v32, %v3467_v50  ;;  %v6211_v5 = vld [vmem:[#allocation8_spill] sm:$0xff] }
 0x279   : > { %v4628_v40 = vpop.f32.mrf.mxu1  ;;  %v3353_v62 = vadd.f32 %v6211_v5, %v3195_v39 }
 0x27a   : > { %v6084_v21 = vpop.f32.mrf.mxu0  ;;  %v3468_v16 = vadd.f32 %v4628_v40, %v3349_v36  ;;  %v3695_v31 = vadd.f32 %v6072_v34, %v3465_v63  ;;  %v3193_v40 = vadd.f32 %v3176_v27, %v2963_v45  ;;  %v6213_v34 = vld [vmem:[#allocation7_spill] sm:$0xff] }
 0x27b   : > { %v3437_v38 = vpop.f32.mrf.mxu1 }
 0x27c   : > { %v4657_v55 = vpop.f32.mrf.mxu0  ;;  %v3466_v1 = vadd.f32 %v3437_v38, %v3347_v37  ;;  %v3698_v26 = vadd.f32 %v6210_v58, %v3468_v16  ;;  %v3351_v27 = vadd.f32 %v6213_v34, %v3193_v40 }
 0x27d   : > { %v4631_v3 = vpop.f32.mrf.mxu1 }
 0x27e   : > { %v3961_v6 = vpop.f32.mrf.mxu0  ;;  %v3471_v35 = vadd.f32 %v4631_v3, %v3352_v20  ;;  %v3696_v46 = vadd.f32 %v6212_v18, %v3466_v1 }
 0x27f   : > { %v3450_v60 = vpop.f32.mrf.mxu1 }
 0x280   : > { %v4658_v43 = vpop.f32.mrf.mxu0  ;;  %v3469_v2 = vadd.f32 %v3450_v60, %v3350_v10  ;;  %v3701_v12 = vadd.f32 %v6078_v25, %v3471_v35 }
 0x281   : > { %v4632_v28 = vpop.f32.mrf.mxu1 }
 0x282   : > { %v3964_v56 = vpop.f32.mrf.mxu0  ;;  %v3472_v0 = vadd.f32 %v4632_v28, %v3353_v62  ;;  %v3699_v51 = vadd.f32 %v6080_v15, %v3469_v2 }
 0x283   : > { %v3453_v14 = vpop.f32.mrf.mxu1 }
 0x284   : > { %v4661_v7 = vpop.f32.mrf.mxu0  ;;  %v3470_v23 = vadd.f32 %v3453_v14, %v3351_v27  ;;  %v3702_v50 = vadd.f32 %v6082_v44, %v3472_v0 }
 0x285   : > { %v4647_v19 = vpop.f32.mrf.mxu1 }
 0x286   : > { %v3855_v59 = vadd.f32 %v4647_v19, %v3697_v11  ;;  %v3977_v47 = vpop.f32.mrf.mxu0  ;;  %v3700_v57 = vadd.f32 %v6084_v21, %v3470_v23 }
 0x287   : > { %v3822_v32 = vpop.f32.mrf.mxu1 }
 0x288   : > { %v3870_v29 = vadd.f32 %v4355_v61, %v3855_v59  ;;  %v3853_v8 = vadd.f32 %v3822_v32, %v3695_v31  ;;  %v4662_v28 = vpop.f32.mrf.mxu0 }
 0x289   : > { %v4648_v24 = vpop.f32.mrf.mxu1 }
 0x28a   : > { %v3994_v49 = vadd.f32 %v4657_v55, %v3870_v29  ;;  %v3868_v48 = vadd.f32 %v4355_v61, %v3853_v8  ;;  %v3856_v42 = vadd.f32 %v4648_v24, %v3698_v26 }
 0x28b   : > { %v3825_v38 = vpop.f32.mrf.mxu1 }
 0x28c   : > { %4002 = vst.msk [vmem:[%s6111_s26 + $0x10] sm:$0xff] %vm2505_vm1, %v3994_v49  ;;  %v3992_v9 = vadd.f32 %v3961_v6, %v3868_v48  ;;  %v3871_v55 = vadd.f32 %v4355_v61, %v3856_v42  ;;  %v3854_v52 = vadd.f32 %v3825_v38, %v3696_v46 }
 0x28d   : > { %v4651_v3 = vpop.f32.mrf.mxu1 }
 0x28e   : > { %4000 = vst.msk [vmem:[%s6111_s26] sm:$0xff] %vm2505_vm1, %v3992_v9  ;;  %v3995_v4 = vadd.f32 %v4658_v43, %v3871_v55  ;;  %v3869_v25 = vadd.f32 %v4355_v61, %v3854_v52  ;;  %v3859_v53 = vadd.f32 %v4651_v3, %v3701_v12  ;;  %v3980_v43 = vpop.f32.mrf.mxu0 }
 0x28f   : > { %v3838_v13 = vpop.f32.mrf.mxu1 }
 0x290   : > { %4003 = vst.msk [vmem:[%s6111_s26 + $0x18] sm:$0xff] %vm2505_vm1, %v3995_v4  ;;  %v3993_v60 = vadd.f32 %v3964_v56, %v3869_v25  ;;  %v3874_v6 = vadd.f32 %v4355_v61, %v3859_v53  ;;  %v3857_v22 = vadd.f32 %v3838_v13, %v3699_v51 }
 0x291   : > { %v4652_v15 = vpop.f32.mrf.mxu1 }
 0x292   : > { %4001 = vst.msk [vmem:[%s6111_s26 + $0x8] sm:$0xff] %vm2505_vm1, %v3993_v60  ;;  %v3998_v17 = vadd.f32 %v4661_v7, %v3874_v6  ;;  %v3872_v33 = vadd.f32 %v4355_v61, %v3857_v22  ;;  %v3860_v41 = vadd.f32 %v4652_v15, %v3702_v50 }
 0x293   : > { %v3841_v63 = vpop.f32.mrf.mxu1 }
 0x294   : > { %4006 = vst.msk [vmem:[%s6111_s26 + $0x30] sm:$0xff] %vm2505_vm1, %v3998_v17  ;;  %v3996_v36 = vadd.f32 %v3977_v47, %v3872_v33  ;;  %v3875_v30 = vadd.f32 %v4355_v61, %v3860_v41  ;;  %v3858_v54 = vadd.f32 %v3841_v63, %v3700_v57 }
 0x296   : > { %4004 = vst.msk [vmem:[%s6111_s26 + $0x20] sm:$0xff] %vm2505_vm1, %v3996_v36  ;;  %v3999_v44 = vadd.f32 %v4662_v28, %v3875_v30  ;;  %v3873_v14 = vadd.f32 %v4355_v61, %v3858_v54 }
 0x298   : > { %4007 = vst.msk [vmem:[%s6111_s26 + $0x38] sm:$0xff] %vm2505_vm1, %v3999_v44  ;;  %v3997_v21 = vadd.f32 %v3980_v43, %v3873_v14 }
 0x29a   : > { %4005 = vst.msk [vmem:[%s6111_s26 + $0x28] sm:$0xff] %vm2505_vm1, %v3997_v21 }
 0x29b   : > { %4782 = shalt.err (!%p4779_p3)
}
 0x29c   : > { %s4783_s14 = scalar_lea.hbm %s6133_s9, 1024  ;;  %s4787_s17 = scalar_lea.hbm %s6188_s5, 2048 }
 0x29d   : > { %p4784_p4 = scmp.ne.s32.totalorder %s6133_s9, %s4783_s14  ;;  %p4788_p9 = scmp.lt.s32.totalorder %s6133_s9, %s6188_s5 }
 0x29e   : > { %p4789_p10 = scmp.lt.s32.totalorder %s4787_s17, %s4783_s14 }
 0x29f   : > { %p4785_p7 = pnand %p4784_p4, %p4904_p5 }
 0x2a0   : > { %p4790_p11 = por %p4789_p10, %p4788_p9 }
 0x2a1   : > { %p4786_p8 = pneg %p4785_p7 }
 0x2a3   : > { %p4791_p12 = pnand %p4790_p11, %p4786_p8 }
 0x2a5   : > { %4794 = shalt.err (!%p4791_p12)
}
 0x2a6   : > { %s4834_s26 = smov 128   ;;  %s4835_s30 = smov 8  }
 0x2a7   : > { %4686 = dma.vmem_to_hbm [thread:$0]  (%p4904_p5), %s6135_s6, 1024, %s6133_s9, %s6143_s22, %s4834_s26, %s4834_s26, %s4835_s30  }
 0x2a8 PF: > { %p4692_p13 = scmp.ge.s32.totalorder %s4829_s21, 2  ;;  %s4037_s7 = sand.u32 1, %s4817_s18  }
 0x2a9   : > { %s4038_s8 = scalar_lea.sflag [#allocation5], %s4037_s7 }
 0x2aa   : > { %p4689_p0 = pnand %p4692_p13, %p4908_p6 }
 0x2ac   : > { %p4690_p1 = pneg %p4689_p0 }
 0x2ae   : > { %4812 = dma.done.wait (%p4690_p1), %s4038_s8, 1024  }
 0x2af   : > { %4814 = vsyncadd (%p4690_p1), %s4038_s8, 4294966272  ;;  %p15_p2 = scmp.ge.s32.totalorder %s4891_s24, 4   ;;  %s6214_s18 = smov %s4821_s19 }
 0x2b0   : > { %s6215_s19 = smov %s4825_s20  ;;  %s6216_s20 = smov %s4902_s27 }
 0x2b1   : > { %s6217_s21 = smov %s4891_s24  ;;  %17 = sbr.rel (!%p15_p2) target bundleno = 3 (0x3), region = 98 }
 0x2b6   :  { %4043 = vsyncpa [#allocation5], 1 }
 0x2b7   :  { %4045 = vsyncpa [#allocation5 + $0x1], 1 }

</bundles_post_ra>
